<compile_context>
chip_gen: v5e
topology: v5e:2x2
jax: 0.10.0
libtpu: 0.0.40
codegen_flags: <defaults>
</compile_context>

<pallas_src>
import functools
import math

import jax
import jax.numpy as jnp
import numpy as np
from jax import lax
from jax.experimental import pallas as pl
from jax.experimental.pallas import tpu as pltpu

LN_EPS = 1e-5
_INV_SQRT2 = 1.0 / math.sqrt(2.0)


# ----------------------------------------------------------------------------- helpers
def _layernorm(x, g, b):
    # x: (..., C), g/b: (1, C) fp32
    mu = jnp.mean(x, axis=-1, keepdims=True)
    var = jnp.mean((x - mu) ** 2, axis=-1, keepdims=True)
    return (x - mu) * lax.rsqrt(var + LN_EPS) * g + b


def _full_spec(shape):
    return pl.BlockSpec(shape, lambda i: (0,) * len(shape))


def _seq_block(num_seqs, seq_len, target_rows=512):
    """How many independent sequences to pack per grid step (M-dim ~ target_rows)."""
    return max(1, min(num_seqs, target_rows // max(seq_len, 1)))


# ----------------------------------------------------------------------------- kernels
def attn_block_kernel(x_ref, g_ref, b_ref, wqkv_ref, wproj_ref, bproj_ref, o_ref,
                      *, num_heads, scale):
    """Fused: LayerNorm -> qkv -> per-head softmax attention (batched over the
    packed sequences) -> ONE full-C output projection -> + residual (the input)."""
    x = x_ref[...]                                   # (BLK, N, C) fp32
    blk, n, c = x.shape
    hd = c // num_heads
    cdt = wqkv_ref.dtype                             # compute (MXU) dtype, e.g. bf16

    xn = _layernorm(x, g_ref[...], b_ref[...])       # fp32

    # qkv: one big (BLK*N, C) @ (C, 3C) matmul, fp32 accumulate.
    qkv = jnp.dot(xn.reshape(blk * n, c).astype(cdt), wqkv_ref[...],
                  preferred_element_type=jnp.float32).reshape(blk, n, 3 * c)

    heads = []
    for h in range(num_heads):                       # static unrolled loop over heads
        q = qkv[:, :, h * hd:(h + 1) * hd].astype(cdt)
        k = qkv[:, :, c + h * hd:c + (h + 1) * hd].astype(cdt)
        v = qkv[:, :, 2 * c + h * hd:2 * c + (h + 1) * hd].astype(cdt)
        s = jnp.einsum("bqd,bkd->bqk", q, k,
                       preferred_element_type=jnp.float32) * scale    # (BLK, N, N)
        s = s - jnp.max(s, axis=-1, keepdims=True)
        p = jnp.exp(s)
        p = p * pl.reciprocal(jnp.sum(p, axis=-1, keepdims=True), approx=True)
        heads.append(jnp.einsum("bqk,bkd->bqd", p.astype(cdt), v,
                                preferred_element_type=jnp.float32))  # (BLK, N, hd)

    attn_out = jnp.concatenate(heads, axis=-1)       # (BLK, N, C) fp32

    # Single full-C output projection (temporal_fc already folded in for the
    # temporal pass), then the residual add with the (fp32) kernel input.
    y = jnp.dot(attn_out.reshape(blk * n, c).astype(cdt), wproj_ref[...],
                preferred_element_type=jnp.float32).reshape(blk, n, c)
    o_ref[...] = (x + y + bproj_ref[...]).astype(o_ref.dtype)


def mlp_block_kernel(x_ref, g_ref, b_ref, w1_ref, b1_ref, w2_ref, b2_ref, o_ref):
    """Fused: LayerNorm -> fc1 -> exact GELU (erf) -> fc2 -> + residual (the input)."""
    x = x_ref[...]                                   # (TM, C) fp32
    cdt = w1_ref.dtype
    xn = _layernorm(x, g_ref[...], b_ref[...])
    h = jnp.dot(xn.astype(cdt), w1_ref[...],
                preferred_element_type=jnp.float32) + b1_ref[...]
    h = 0.5 * h * (1.0 + lax.erf(h * _INV_SQRT2))    # nn.GELU (exact)
    y = jnp.dot(h.astype(cdt), w2_ref[...],
                preferred_element_type=jnp.float32) + b2_ref[...]
    o_ref[...] = (x + y).astype(o_ref.dtype)


# ----------------------------------------------------------------------------- wrappers
def attn_call(x, g, b, wqkv_t, wproj_t, bproj, *, num_heads, scale):
    """x: (num_seqs, N, C).  Residual add is done in-kernel (residual == x)."""
    Bf, N, C = x.shape
    blk = _seq_block(Bf, N)
    grid = (pl.cdiv(Bf, blk),)
    kernel = functools.partial(attn_block_kernel, num_heads=num_heads, scale=scale)
    return pl.pallas_call(
        kernel,
        out_shape=jax.ShapeDtypeStruct((Bf, N, C), x.dtype),
        grid=grid,
        in_specs=[
            pl.BlockSpec((blk, N, C), lambda i: (i, 0, 0)),
            _full_spec(g.shape), _full_spec(b.shape),
            _full_spec(wqkv_t.shape), _full_spec(wproj_t.shape), _full_spec(bproj.shape),
        ],
        out_specs=pl.BlockSpec((blk, N, C), lambda i: (i, 0, 0)),
        compiler_params=pltpu.CompilerParams(dimension_semantics=("parallel",)),
    )(x, g, b, wqkv_t, wproj_t, bproj)


def mlp_call(x2f, g, b, w1_t, b1, w2_t, b2):
    """x2f: (rows, C) flattened tokens.  Residual add is done in-kernel."""
    R, C = x2f.shape
    tm = R if R <= 512 else 512                      # 512 is a multiple of 8
    grid = (pl.cdiv(R, tm),)
    return pl.pallas_call(
        mlp_block_kernel,
        out_shape=jax.ShapeDtypeStruct((R, C), x2f.dtype),
        grid=grid,
        in_specs=[
            pl.BlockSpec((tm, C), lambda i: (i, 0)),
            _full_spec(g.shape), _full_spec(b.shape),
            _full_spec(w1_t.shape), _full_spec(b1.shape),
            _full_spec(w2_t.shape), _full_spec(b2.shape),
        ],
        out_specs=pl.BlockSpec((tm, C), lambda i: (i, 0)),
        compiler_params=pltpu.CompilerParams(dimension_semantics=("parallel",)),
    )(x2f, g, b, w1_t, b1, w2_t, b2)


# ----------------------------------------------------------------------------- Block forward
def block_forward(x, params, *, B, T, W, num_heads, compute_dtype=jnp.bfloat16):
    """divided_space_time Block forward (eval mode: Dropout/DropPath = identity)."""
    _, N, C = x.shape
    hd = C // num_heads
    scale = hd ** (-0.5)
    Hh = N // (W * T)  # h inferred by rearrange('b (h w t) m -> ...', w=W, t=T)
    cdt = compute_dtype

    # ---- one-time weight prep: transpose to (in, out) layout + bf16 cast ------------
    wqkv_s = params["attn_wqkv"].T.astype(cdt)                 # (C, 3C)
    wproj_s = params["attn_wproj"].T.astype(cdt)               # (C, C)
    bproj_s = params["attn_bproj"]                             # (1, C) fp32

    wqkv_tm = params["tattn_wqkv"].T.astype(cdt)               # (C, 3C)
    # fold temporal_fc into the temporal proj:
    #   fc(proj(o)) = o @ (Wtfc @ Wproj).T + (bproj @ Wtfc.T + btfc)
    wproj_tm = (params["tfc_w"] @ params["tattn_wproj"]).T.astype(cdt)   # (C, C)
    bproj_tm = params["tattn_bproj"] @ params["tfc_w"].T + params["tfc_b"]  # (1,C) fp32

    w1_t = params["fc1_w"].T.astype(cdt)                       # (C, hidden)
    w2_t = params["fc2_w"].T.astype(cdt)                       # (hidden, C)

    # ---- temporal attention (+ folded temporal_fc + residual) ----------------------
    # 'b (h w t) m -> (b h w) t m' is a pure (free) reshape for token order (h w t).
    xt = x.reshape(B * Hh * W, T, C)
    xt2 = attn_call(xt, params["tnorm1_w"], params["tnorm1_b"],
                    wqkv_tm, wproj_tm, bproj_tm, num_heads=num_heads, scale=scale)
    xt2 = xt2.reshape(B, N, C)                                 # == x + temporal_fc(res_t)

    # ---- spatial attention (+ residual, added in transposed layout in-kernel) ------
    xs = xt2.reshape(B, Hh * W, T, C).transpose(0, 2, 1, 3).reshape(B * T, Hh * W, C)
    xs2 = attn_call(xs, params["norm1_w"], params["norm1_b"],
                    wqkv_s, wproj_s, bproj_s, num_heads=num_heads, scale=scale)
    x2 = xs2.reshape(B, T, Hh * W, C).transpose(0, 2, 1, 3).reshape(B, N, C)

    # ---- MLP (+ residual), rows independent -> flatten & row-tile -------------------
    out = mlp_call(x2.reshape(B * N, C), params["norm2_w"], params["norm2_b"],
                   w1_t, params["fc1_b"], w2_t, params["fc2_b"])
    return out.reshape(B, N, C)
    # TODO(synk): stochastic DropPath/Dropout (training=True) not implemented; eval-mode
    #             semantics (identity) are reproduced exactly.


# ----------------------------------------------------------------------------- pure-JAX reference
def _ref_ln(x, g, b):
    mu = x.mean(-1, keepdims=True)
    var = ((x - mu) ** 2).mean(-1, keepdims=True)
    return (x - mu) / jnp.sqrt(var + LN_EPS) * g.reshape(-1) + b.reshape(-1)


def _ref_attn(x, wqkv, wproj, bproj, num_heads, scale):
    Bf, N, C = x.shape
    hd = C // num_heads
    qkv = jnp.einsum("bnc,oc->bno", x, wqkv).reshape(Bf, N, 3, num_heads, hd)
    qkv = qkv.transpose(2, 0, 3, 1, 4)
    q, k, v = qkv[0], qkv[1], qkv[2]
    a = jnp.einsum("bhqd,bhkd->bhqk", q, k) * scale
    a = jax.nn.softmax(a, axis=-1)
    o = jnp.einsum("bhqk,bhkd->bhqd", a, v).transpose(0, 2, 1, 3).reshape(Bf, N, C)
    return jnp.einsum("bnc,oc->bno", o, wproj) + bproj.reshape(-1)


def _ref_mlp(x, w1, b1, w2, b2):
    h = jnp.einsum("bnc,oc->bno", x, w1) + b1.reshape(-1)
    h = 0.5 * h * (1.0 + jax.scipy.special.erf(h / jnp.sqrt(2.0)))
    return jnp.einsum("bnh,oh->bno", h, w2) + b2.reshape(-1)


def ref_block_forward(x, p, B, T, W, num_heads):
    _, N, C = x.shape
    scale = (C // num_heads) ** (-0.5)
    Hh = N // (W * T)
    xt = x.reshape(B * Hh * W, T, C)
    rt = _ref_attn(_ref_ln(xt, p["tnorm1_w"], p["tnorm1_b"]),
                   p["tattn_wqkv"], p["tattn_wproj"], p["tattn_bproj"], num_heads, scale)
    rt = rt.reshape(B, N, C)
    rt = jnp.einsum("bnc,oc->bno", rt, p["tfc_w"]) + p["tfc_b"].reshape(-1)
    xt2 = x + rt
    xs = xt2.reshape(B, Hh * W, T, C).transpose(0, 2, 1, 3).reshape(B * T, Hh * W, C)
    rs = _ref_attn(_ref_ln(xs, p["norm1_w"], p["norm1_b"]),
                   p["attn_wqkv"], p["attn_wproj"], p["attn_bproj"], num_heads, scale)
    rs = rs.reshape(B, T, Hh * W, C).transpose(0, 2, 1, 3).reshape(B, N, C)
    x2 = xt2 + rs
    m = _ref_mlp(_ref_ln(x2, p["norm2_w"], p["norm2_b"]),
                 p["fc1_w"], p["fc1_b"], p["fc2_w"], p["fc2_b"])
    return x2 + m


# ----------------------------------------------------------------------------- params
def init_params(key, dim, num_heads, mlp_ratio):
    hidden = int(dim * mlp_ratio)
    ks = jax.random.split(key, 12)

    def lin(k, o, i):
        return (jax.random.normal(k, (o, i), jnp.float32) * 0.02).astype(jnp.float32)

    def vec(k, n):
        return (jax.random.normal(k, (1, n), jnp.float32) * 0.02).astype(jnp.float32)

    return dict(
        norm1_w=jnp.ones((1, dim), jnp.float32), norm1_b=jnp.zeros((1, dim), jnp.float32),
        attn_wqkv=lin(ks[0], 3 * dim, dim),                       # qkv_bias=False
        attn_wproj=lin(ks[1], dim, dim), attn_bproj=vec(ks[2], dim),
        tnorm1_w=jnp.ones((1, dim), jnp.float32), tnorm1_b=jnp.zeros((1, dim), jnp.float32),
        tattn_wqkv=lin(ks[3], 3 * dim, dim),
        tattn_wproj=lin(ks[4], dim, dim), tattn_bproj=vec(ks[5], dim),
        tfc_w=lin(ks[6], dim, dim), tfc_b=vec(ks[7], dim),
        norm2_w=jnp.ones((1, dim), jnp.float32), norm2_b=jnp.zeros((1, dim), jnp.float32),
        fc1_w=lin(ks[8], hidden, dim), fc1_b=vec(ks[9], hidden),
        fc2_w=lin(ks[10], dim, hidden), fc2_b=vec(ks[11], dim),
    )


# ----------------------------------------------------------------------------- main
if __name__ == "__main__":
    dim, num_heads, mlp_ratio = 32, 4, 4.0
    B, T, W, Hh = 2, 2, 2, 2
    N = Hh * W * T                                   # 8 tokens, ordered (h w t)

    key = jax.random.PRNGKey(0)
    kx, kp = jax.random.split(key)
    x = jax.random.normal(kx, (B, N, dim), jnp.float32)
    params = init_params(kp, dim, num_heads, mlp_ratio)

    fwd = jax.jit(functools.partial(block_forward, B=B, T=T, W=W, num_heads=num_heads))
    out = jax.block_until_ready(fwd(x, params))

    ref = ref_block_forward(x, params, B, T, W, num_heads)
    # Tolerance accounts for bf16 MXU operands (fp32 accumulation) vs. fp32 reference.
    np.testing.assert_allclose(np.asarray(out), np.asarray(ref), rtol=5e-3, atol=5e-3)
    print("KERNEL_OK")
</pallas_src>

<mosaic_0001>
module attributes {stable_mosaic.version = 11 : i64} {
  func.func @attn_block_kernel(%arg0: i32, %arg1: memref<4x4x32xf32, #tpu.memory_space<vmem>>, %arg2: memref<1x32xf32, #tpu.memory_space<vmem>>, %arg3: memref<1x32xf32, #tpu.memory_space<vmem>>, %arg4: memref<32x96xbf16, #tpu.memory_space<vmem>>, %arg5: memref<32x32xbf16, #tpu.memory_space<vmem>>, %arg6: memref<1x32xf32, #tpu.memory_space<vmem>>, %arg7: memref<4x4x32xf32, #tpu.memory_space<vmem>>) attributes {dimension_semantics = [#tpu.dimension_semantics<parallel>], iteration_bounds = array<i64: 1>, scalar_prefetch = 0 : i64, scratch_operands = 0 : i64, tpu.core_type = #tpu.core_type<tc>, window_params = [{transform_indices = @transform_0, window_bounds = array<i64: 4, 4, 32>}, {pipeline_mode = #tpu.pipeline_mode<synchronous>, transform_indices = @transform_1, window_bounds = array<i64: 1, 32>}, {pipeline_mode = #tpu.pipeline_mode<synchronous>, transform_indices = @transform_2, window_bounds = array<i64: 1, 32>}, {pipeline_mode = #tpu.pipeline_mode<synchronous>, transform_indices = @transform_3, window_bounds = array<i64: 32, 96>}, {pipeline_mode = #tpu.pipeline_mode<synchronous>, transform_indices = @transform_4, window_bounds = array<i64: 32, 32>}, {pipeline_mode = #tpu.pipeline_mode<synchronous>, transform_indices = @transform_5, window_bounds = array<i64: 1, 32>}, {transform_indices = @transform_6, window_bounds = array<i64: 4, 4, 32>}]} {
    %c0 = arith.constant 0 : index
    %c0_0 = arith.constant 0 : index
    %c0_1 = arith.constant 0 : index
    %0 = vector.load %arg1[%c0, %c0_0, %c0_1] : memref<4x4x32xf32, #tpu.memory_space<vmem>>, vector<4x4x32xf32>
    %c0_2 = arith.constant 0 : index
    %c0_3 = arith.constant 0 : index
    %1 = vector.load %arg2[%c0_2, %c0_3] : memref<1x32xf32, #tpu.memory_space<vmem>>, vector<1x32xf32>
    %c0_4 = arith.constant 0 : index
    %c0_5 = arith.constant 0 : index
    %2 = vector.load %arg3[%c0_4, %c0_5] : memref<1x32xf32, #tpu.memory_space<vmem>>, vector<1x32xf32>
    %cst = arith.constant dense<0.000000e+00> : vector<4x4xf32>
    %3 = vector.multi_reduction <add>, %0, %cst [2] : vector<4x4x32xf32> to vector<4x4xf32>
    %4 = vector.shape_cast %3 : vector<4x4xf32> to vector<4x4x1xf32>
    %cst_6 = arith.constant 3.200000e+01 : f32
    %5 = vector.broadcast %cst_6 : f32 to vector<4x4x1xf32>
    %6 = arith.divf %4, %5 : vector<4x4x1xf32>
    %7 = vector.broadcast %6 : vector<4x4x1xf32> to vector<4x4x32xf32>
    %8 = arith.subf %0, %7 : vector<4x4x32xf32>
    %9 = arith.mulf %8, %8 : vector<4x4x32xf32>
    %cst_7 = arith.constant dense<0.000000e+00> : vector<4x4xf32>
    %10 = vector.multi_reduction <add>, %9, %cst_7 [2] : vector<4x4x32xf32> to vector<4x4xf32>
    %11 = vector.shape_cast %10 : vector<4x4xf32> to vector<4x4x1xf32>
    %cst_8 = arith.constant 3.200000e+01 : f32
    %12 = vector.broadcast %cst_8 : f32 to vector<4x4x1xf32>
    %13 = arith.divf %11, %12 : vector<4x4x1xf32>
    %14 = vector.broadcast %6 : vector<4x4x1xf32> to vector<4x4x32xf32>
    %15 = arith.subf %0, %14 : vector<4x4x32xf32>
    %cst_9 = arith.constant 9.99999974E-6 : f32
    %16 = vector.broadcast %cst_9 : f32 to vector<4x4x1xf32>
    %17 = arith.addf %13, %16 : vector<4x4x1xf32>
    %18 = math.rsqrt %17 : vector<4x4x1xf32>
    %19 = vector.broadcast %18 : vector<4x4x1xf32> to vector<4x4x32xf32>
    %20 = arith.mulf %15, %19 : vector<4x4x32xf32>
    %21 = vector.shape_cast %1 : vector<1x32xf32> to vector<1x1x32xf32>
    %22 = vector.broadcast %21 : vector<1x1x32xf32> to vector<4x4x32xf32>
    %23 = arith.mulf %20, %22 : vector<4x4x32xf32>
    %24 = vector.shape_cast %2 : vector<1x32xf32> to vector<1x1x32xf32>
    %25 = vector.broadcast %24 : vector<1x1x32xf32> to vector<4x4x32xf32>
    %26 = arith.addf %23, %25 : vector<4x4x32xf32>
    %27 = vector.shape_cast %26 : vector<4x4x32xf32> to vector<16x32xf32>
    %28 = arith.truncf %27 : vector<16x32xf32> to vector<16x32xbf16>
    %c0_10 = arith.constant 0 : index
    %c0_11 = arith.constant 0 : index
    %29 = vector.load %arg4[%c0_10, %c0_11] : memref<32x96xbf16, #tpu.memory_space<vmem>>, vector<32x96xbf16>
    %cst_12 = arith.constant dense<0.000000e+00> : vector<16x96xf32>
    %30 = tpu.matmul %28, %29, %cst_12 {dimension_numbers = #tpu.dot_dimension_numbers<[1], [0], [0], [1], [0, 0, 1, 1], [], []>} : vector<16x32xbf16>, vector<32x96xbf16>, vector<16x96xf32> -> vector<16x96xf32>
    %31 = vector.shape_cast %30 : vector<16x96xf32> to vector<4x4x96xf32>
    %32 = vector.extract_strided_slice %31 {offsets = [0, 0, 0], sizes = [4, 4, 8], strides = [1, 1, 1]} : vector<4x4x96xf32> to vector<4x4x8xf32>
    %33 = arith.truncf %32 : vector<4x4x8xf32> to vector<4x4x8xbf16>
    %34 = vector.extract_strided_slice %31 {offsets = [0, 0, 32], sizes = [4, 4, 8], strides = [1, 1, 1]} : vector<4x4x96xf32> to vector<4x4x8xf32>
    %35 = arith.truncf %34 : vector<4x4x8xf32> to vector<4x4x8xbf16>
    %36 = vector.extract_strided_slice %31 {offsets = [0, 0, 64], sizes = [4, 4, 8], strides = [1, 1, 1]} : vector<4x4x96xf32> to vector<4x4x8xf32>
    %37 = arith.truncf %36 : vector<4x4x8xf32> to vector<4x4x8xbf16>
    "tpu.trace_start"() <{level = 10 : i32, message = "bqd,bkd->bqk"}> : () -> ()
    %cst_13 = arith.constant dense<0.000000e+00> : vector<4x4x4xf32>
    %38 = tpu.matmul %33, %35, %cst_13 {dimension_numbers = #tpu.dot_dimension_numbers<[2], [2], [1], [1], [0, 0, 0, 1, 1, 1], [0], [0]>} : vector<4x4x8xbf16>, vector<4x4x8xbf16>, vector<4x4x4xf32> -> vector<4x4x4xf32>
    "tpu.trace_stop"() : () -> ()
    %cst_14 = arith.constant 0.353553385 : f32
    %39 = vector.broadcast %cst_14 : f32 to vector<4x4x4xf32>
    %40 = arith.mulf %38, %39 : vector<4x4x4xf32>
    %cst_15 = arith.constant dense<0xFF800000> : vector<4x4xf32>
    %41 = vector.multi_reduction <maximumf>, %40, %cst_15 [2] : vector<4x4x4xf32> to vector<4x4xf32>
    %42 = vector.shape_cast %41 : vector<4x4xf32> to vector<4x4x1xf32>
    %43 = vector.broadcast %42 : vector<4x4x1xf32> to vector<4x4x4xf32>
    %44 = arith.subf %40, %43 : vector<4x4x4xf32>
    %45 = math.exp %44 : vector<4x4x4xf32>
    %cst_16 = arith.constant dense<0.000000e+00> : vector<4x4xf32>
    %46 = vector.multi_reduction <add>, %45, %cst_16 [2] : vector<4x4x4xf32> to vector<4x4xf32>
    %47 = vector.shape_cast %46 : vector<4x4xf32> to vector<4x4x1xf32>
    %48 = tpu.reciprocal %47 {approx = true} : vector<4x4x1xf32> -> vector<4x4x1xf32>
    %49 = vector.broadcast %48 : vector<4x4x1xf32> to vector<4x4x4xf32>
    %50 = arith.mulf %45, %49 : vector<4x4x4xf32>
    %51 = arith.truncf %50 : vector<4x4x4xf32> to vector<4x4x4xbf16>
    "tpu.trace_start"() <{level = 10 : i32, message = "bqk,bkd->bqd"}> : () -> ()
    %cst_17 = arith.constant dense<0.000000e+00> : vector<4x4x8xf32>
    %52 = tpu.matmul %51, %37, %cst_17 {dimension_numbers = #tpu.dot_dimension_numbers<[2], [1], [1], [2], [0, 0, 0, 1, 1, 2], [0], [0]>} : vector<4x4x4xbf16>, vector<4x4x8xbf16>, vector<4x4x8xf32> -> vector<4x4x8xf32>
    "tpu.trace_stop"() : () -> ()
    %53 = vector.extract_strided_slice %31 {offsets = [0, 0, 8], sizes = [4, 4, 8], strides = [1, 1, 1]} : vector<4x4x96xf32> to vector<4x4x8xf32>
    %54 = arith.truncf %53 : vector<4x4x8xf32> to vector<4x4x8xbf16>
    %55 = vector.extract_strided_slice %31 {offsets = [0, 0, 40], sizes = [4, 4, 8], strides = [1, 1, 1]} : vector<4x4x96xf32> to vector<4x4x8xf32>
    %56 = arith.truncf %55 : vector<4x4x8xf32> to vector<4x4x8xbf16>
    %57 = vector.extract_strided_slice %31 {offsets = [0, 0, 72], sizes = [4, 4, 8], strides = [1, 1, 1]} : vector<4x4x96xf32> to vector<4x4x8xf32>
    %58 = arith.truncf %57 : vector<4x4x8xf32> to vector<4x4x8xbf16>
    "tpu.trace_start"() <{level = 10 : i32, message = "bqd,bkd->bqk"}> : () -> ()
    %cst_18 = arith.constant dense<0.000000e+00> : vector<4x4x4xf32>
    %59 = tpu.matmul %54, %56, %cst_18 {dimension_numbers = #tpu.dot_dimension_numbers<[2], [2], [1], [1], [0, 0, 0, 1, 1, 1], [0], [0]>} : vector<4x4x8xbf16>, vector<4x4x8xbf16>, vector<4x4x4xf32> -> vector<4x4x4xf32>
    "tpu.trace_stop"() : () -> ()
    %cst_19 = arith.constant 0.353553385 : f32
    %60 = vector.broadcast %cst_19 : f32 to vector<4x4x4xf32>
    %61 = arith.mulf %59, %60 : vector<4x4x4xf32>
    %cst_20 = arith.constant dense<0xFF800000> : vector<4x4xf32>
    %62 = vector.multi_reduction <maximumf>, %61, %cst_20 [2] : vector<4x4x4xf32> to vector<4x4xf32>
    %63 = vector.shape_cast %62 : vector<4x4xf32> to vector<4x4x1xf32>
    %64 = vector.broadcast %63 : vector<4x4x1xf32> to vector<4x4x4xf32>
    %65 = arith.subf %61, %64 : vector<4x4x4xf32>
    %66 = math.exp %65 : vector<4x4x4xf32>
    %cst_21 = arith.constant dense<0.000000e+00> : vector<4x4xf32>
    %67 = vector.multi_reduction <add>, %66, %cst_21 [2] : vector<4x4x4xf32> to vector<4x4xf32>
    %68 = vector.shape_cast %67 : vector<4x4xf32> to vector<4x4x1xf32>
    %69 = tpu.reciprocal %68 {approx = true} : vector<4x4x1xf32> -> vector<4x4x1xf32>
    %70 = vector.broadcast %69 : vector<4x4x1xf32> to vector<4x4x4xf32>
    %71 = arith.mulf %66, %70 : vector<4x4x4xf32>
    %72 = arith.truncf %71 : vector<4x4x4xf32> to vector<4x4x4xbf16>
    "tpu.trace_start"() <{level = 10 : i32, message = "bqk,bkd->bqd"}> : () -> ()
    %cst_22 = arith.constant dense<0.000000e+00> : vector<4x4x8xf32>
    %73 = tpu.matmul %72, %58, %cst_22 {dimension_numbers = #tpu.dot_dimension_numbers<[2], [1], [1], [2], [0, 0, 0, 1, 1, 2], [0], [0]>} : vector<4x4x4xbf16>, vector<4x4x8xbf16>, vector<4x4x8xf32> -> vector<4x4x8xf32>
    "tpu.trace_stop"() : () -> ()
    %74 = vector.extract_strided_slice %31 {offsets = [0, 0, 16], sizes = [4, 4, 8], strides = [1, 1, 1]} : vector<4x4x96xf32> to vector<4x4x8xf32>
    %75 = arith.truncf %74 : vector<4x4x8xf32> to vector<4x4x8xbf16>
    %76 = vector.extract_strided_slice %31 {offsets = [0, 0, 48], sizes = [4, 4, 8], strides = [1, 1, 1]} : vector<4x4x96xf32> to vector<4x4x8xf32>
    %77 = arith.truncf %76 : vector<4x4x8xf32> to vector<4x4x8xbf16>
    %78 = vector.extract_strided_slice %31 {offsets = [0, 0, 80], sizes = [4, 4, 8], strides = [1, 1, 1]} : vector<4x4x96xf32> to vector<4x4x8xf32>
    %79 = arith.truncf %78 : vector<4x4x8xf32> to vector<4x4x8xbf16>
    "tpu.trace_start"() <{level = 10 : i32, message = "bqd,bkd->bqk"}> : () -> ()
    %cst_23 = arith.constant dense<0.000000e+00> : vector<4x4x4xf32>
    %80 = tpu.matmul %75, %77, %cst_23 {dimension_numbers = #tpu.dot_dimension_numbers<[2], [2], [1], [1], [0, 0, 0, 1, 1, 1], [0], [0]>} : vector<4x4x8xbf16>, vector<4x4x8xbf16>, vector<4x4x4xf32> -> vector<4x4x4xf32>
    "tpu.trace_stop"() : () -> ()
    %cst_24 = arith.constant 0.353553385 : f32
    %81 = vector.broadcast %cst_24 : f32 to vector<4x4x4xf32>
    %82 = arith.mulf %80, %81 : vector<4x4x4xf32>
    %cst_25 = arith.constant dense<0xFF800000> : vector<4x4xf32>
    %83 = vector.multi_reduction <maximumf>, %82, %cst_25 [2] : vector<4x4x4xf32> to vector<4x4xf32>
    %84 = vector.shape_cast %83 : vector<4x4xf32> to vector<4x4x1xf32>
    %85 = vector.broadcast %84 : vector<4x4x1xf32> to vector<4x4x4xf32>
    %86 = arith.subf %82, %85 : vector<4x4x4xf32>
    %87 = math.exp %86 : vector<4x4x4xf32>
    %cst_26 = arith.constant dense<0.000000e+00> : vector<4x4xf32>
    %88 = vector.multi_reduction <add>, %87, %cst_26 [2] : vector<4x4x4xf32> to vector<4x4xf32>
    %89 = vector.shape_cast %88 : vector<4x4xf32> to vector<4x4x1xf32>
    %90 = tpu.reciprocal %89 {approx = true} : vector<4x4x1xf32> -> vector<4x4x1xf32>
    %91 = vector.broadcast %90 : vector<4x4x1xf32> to vector<4x4x4xf32>
    %92 = arith.mulf %87, %91 : vector<4x4x4xf32>
    %93 = arith.truncf %92 : vector<4x4x4xf32> to vector<4x4x4xbf16>
    "tpu.trace_start"() <{level = 10 : i32, message = "bqk,bkd->bqd"}> : () -> ()
    %cst_27 = arith.constant dense<0.000000e+00> : vector<4x4x8xf32>
    %94 = tpu.matmul %93, %79, %cst_27 {dimension_numbers = #tpu.dot_dimension_numbers<[2], [1], [1], [2], [0, 0, 0, 1, 1, 2], [0], [0]>} : vector<4x4x4xbf16>, vector<4x4x8xbf16>, vector<4x4x8xf32> -> vector<4x4x8xf32>
    "tpu.trace_stop"() : () -> ()
    %95 = vector.extract_strided_slice %31 {offsets = [0, 0, 24], sizes = [4, 4, 8], strides = [1, 1, 1]} : vector<4x4x96xf32> to vector<4x4x8xf32>
    %96 = arith.truncf %95 : vector<4x4x8xf32> to vector<4x4x8xbf16>
    %97 = vector.extract_strided_slice %31 {offsets = [0, 0, 56], sizes = [4, 4, 8], strides = [1, 1, 1]} : vector<4x4x96xf32> to vector<4x4x8xf32>
    %98 = arith.truncf %97 : vector<4x4x8xf32> to vector<4x4x8xbf16>
    %99 = vector.extract_strided_slice %31 {offsets = [0, 0, 88], sizes = [4, 4, 8], strides = [1, 1, 1]} : vector<4x4x96xf32> to vector<4x4x8xf32>
    %100 = arith.truncf %99 : vector<4x4x8xf32> to vector<4x4x8xbf16>
    "tpu.trace_start"() <{level = 10 : i32, message = "bqd,bkd->bqk"}> : () -> ()
    %cst_28 = arith.constant dense<0.000000e+00> : vector<4x4x4xf32>
    %101 = tpu.matmul %96, %98, %cst_28 {dimension_numbers = #tpu.dot_dimension_numbers<[2], [2], [1], [1], [0, 0, 0, 1, 1, 1], [0], [0]>} : vector<4x4x8xbf16>, vector<4x4x8xbf16>, vector<4x4x4xf32> -> vector<4x4x4xf32>
    "tpu.trace_stop"() : () -> ()
    %cst_29 = arith.constant 0.353553385 : f32
    %102 = vector.broadcast %cst_29 : f32 to vector<4x4x4xf32>
    %103 = arith.mulf %101, %102 : vector<4x4x4xf32>
    %cst_30 = arith.constant dense<0xFF800000> : vector<4x4xf32>
    %104 = vector.multi_reduction <maximumf>, %103, %cst_30 [2] : vector<4x4x4xf32> to vector<4x4xf32>
    %105 = vector.shape_cast %104 : vector<4x4xf32> to vector<4x4x1xf32>
    %106 = vector.broadcast %105 : vector<4x4x1xf32> to vector<4x4x4xf32>
    %107 = arith.subf %103, %106 : vector<4x4x4xf32>
    %108 = math.exp %107 : vector<4x4x4xf32>
    %cst_31 = arith.constant dense<0.000000e+00> : vector<4x4xf32>
    %109 = vector.multi_reduction <add>, %108, %cst_31 [2] : vector<4x4x4xf32> to vector<4x4xf32>
    %110 = vector.shape_cast %109 : vector<4x4xf32> to vector<4x4x1xf32>
    %111 = tpu.reciprocal %110 {approx = true} : vector<4x4x1xf32> -> vector<4x4x1xf32>
    %112 = vector.broadcast %111 : vector<4x4x1xf32> to vector<4x4x4xf32>
    %113 = arith.mulf %108, %112 : vector<4x4x4xf32>
    %114 = arith.truncf %113 : vector<4x4x4xf32> to vector<4x4x4xbf16>
    "tpu.trace_start"() <{level = 10 : i32, message = "bqk,bkd->bqd"}> : () -> ()
    %cst_32 = arith.constant dense<0.000000e+00> : vector<4x4x8xf32>
    %115 = tpu.matmul %114, %100, %cst_32 {dimension_numbers = #tpu.dot_dimension_numbers<[2], [1], [1], [2], [0, 0, 0, 1, 1, 2], [0], [0]>} : vector<4x4x4xbf16>, vector<4x4x8xbf16>, vector<4x4x8xf32> -> vector<4x4x8xf32>
    "tpu.trace_stop"() : () -> ()
    %116 = tpu.concatenate %52, %73, %94, %115 in 2 : vector<4x4x8xf32>, vector<4x4x8xf32>, vector<4x4x8xf32>, vector<4x4x8xf32> -> vector<4x4x32xf32>
    %117 = vector.shape_cast %116 : vector<4x4x32xf32> to vector<16x32xf32>
    %118 = arith.truncf %117 : vector<16x32xf32> to vector<16x32xbf16>
    %c0_33 = arith.constant 0 : index
    %c0_34 = arith.constant 0 : index
    %119 = vector.load %arg5[%c0_33, %c0_34] : memref<32x32xbf16, #tpu.memory_space<vmem>>, vector<32x32xbf16>
    %cst_35 = arith.constant dense<0.000000e+00> : vector<16x32xf32>
    %120 = tpu.matmul %118, %119, %cst_35 {dimension_numbers = #tpu.dot_dimension_numbers<[1], [0], [0], [1], [0, 0, 1, 1], [], []>} : vector<16x32xbf16>, vector<32x32xbf16>, vector<16x32xf32> -> vector<16x32xf32>
    %121 = vector.shape_cast %120 : vector<16x32xf32> to vector<4x4x32xf32>
    %122 = arith.addf %0, %121 : vector<4x4x32xf32>
    %c0_36 = arith.constant 0 : index
    %c0_37 = arith.constant 0 : index
    %123 = vector.load %arg6[%c0_36, %c0_37] : memref<1x32xf32, #tpu.memory_space<vmem>>, vector<1x32xf32>
    %124 = vector.shape_cast %123 : vector<1x32xf32> to vector<1x1x32xf32>
    %125 = vector.broadcast %124 : vector<1x1x32xf32> to vector<4x4x32xf32>
    %126 = arith.addf %122, %125 : vector<4x4x32xf32>
    %c0_38 = arith.constant 0 : index
    %c0_39 = arith.constant 0 : index
    %c0_40 = arith.constant 0 : index
    %127 = vector.load %arg7[%c0_38, %c0_39, %c0_40] : memref<4x4x32xf32, #tpu.memory_space<vmem>>, vector<4x4x32xf32>
    tpu.vector_store %arg7[%c0_38, %c0_39, %c0_40], %126 {strides = array<i32>} : memref<4x4x32xf32, #tpu.memory_space<vmem>>, vector<4x4x32xf32>,
    return
  }
  func.func @transform_0(%arg0: i32) -> (i32, i32, i32) {
    %c0_i32 = arith.constant 0 : i32
    %c0_i32_0 = arith.constant 0 : i32
    %c0_i32_1 = arith.constant 0 : i32
    return %arg0, %c0_i32, %c0_i32_0 : i32, i32, i32
  }
  func.func @transform_1(%arg0: i32) -> (i32, i32) {
    %c0_i32 = arith.constant 0 : i32
    %c0_i32_0 = arith.constant 0 : i32
    %c0_i32_1 = arith.constant 0 : i32
    return %c0_i32, %c0_i32_0 : i32, i32
  }
  func.func @transform_2(%arg0: i32) -> (i32, i32) {
    %c0_i32 = arith.constant 0 : i32
    %c0_i32_0 = arith.constant 0 : i32
    %c0_i32_1 = arith.constant 0 : i32
    return %c0_i32, %c0_i32_0 : i32, i32
  }
  func.func @transform_3(%arg0: i32) -> (i32, i32) {
    %c0_i32 = arith.constant 0 : i32
    %c0_i32_0 = arith.constant 0 : i32
    %c0_i32_1 = arith.constant 0 : i32
    return %c0_i32, %c0_i32_0 : i32, i32
  }
  func.func @transform_4(%arg0: i32) -> (i32, i32) {
    %c0_i32 = arith.constant 0 : i32
    %c0_i32_0 = arith.constant 0 : i32
    %c0_i32_1 = arith.constant 0 : i32
    return %c0_i32, %c0_i32_0 : i32, i32
  }
  func.func @transform_5(%arg0: i32) -> (i32, i32) {
    %c0_i32 = arith.constant 0 : i32
    %c0_i32_0 = arith.constant 0 : i32
    %c0_i32_1 = arith.constant 0 : i32
    return %c0_i32, %c0_i32_0 : i32, i32
  }
  func.func @transform_6(%arg0: i32) -> (i32, i32, i32) {
    %c0_i32 = arith.constant 0 : i32
    %c0_i32_0 = arith.constant 0 : i32
    %c0_i32_1 = arith.constant 0 : i32
    return %arg0, %c0_i32, %c0_i32_0 : i32, i32, i32
  }
}

module attributes {stable_mosaic.version = 11 : i64} {
  func.func @attn_block_kernel(%arg0: i32, %arg1: memref<8x2x32xf32, #tpu.memory_space<vmem>>, %arg2: memref<1x32xf32, #tpu.memory_space<vmem>>, %arg3: memref<1x32xf32, #tpu.memory_space<vmem>>, %arg4: memref<32x96xbf16, #tpu.memory_space<vmem>>, %arg5: memref<32x32xbf16, #tpu.memory_space<vmem>>, %arg6: memref<1x32xf32, #tpu.memory_space<vmem>>, %arg7: memref<8x2x32xf32, #tpu.memory_space<vmem>>) attributes {dimension_semantics = [#tpu.dimension_semantics<parallel>], iteration_bounds = array<i64: 1>, scalar_prefetch = 0 : i64, scratch_operands = 0 : i64, tpu.core_type = #tpu.core_type<tc>, window_params = [{transform_indices = @transform_0, window_bounds = array<i64: 8, 2, 32>}, {pipeline_mode = #tpu.pipeline_mode<synchronous>, transform_indices = @transform_1, window_bounds = array<i64: 1, 32>}, {pipeline_mode = #tpu.pipeline_mode<synchronous>, transform_indices = @transform_2, window_bounds = array<i64: 1, 32>}, {pipeline_mode = #tpu.pipeline_mode<synchronous>, transform_indices = @transform_3, window_bounds = array<i64: 32, 96>}, {pipeline_mode = #tpu.pipeline_mode<synchronous>, transform_indices = @transform_4, window_bounds = array<i64: 32, 32>}, {pipeline_mode = #tpu.pipeline_mode<synchronous>, transform_indices = @transform_5, window_bounds = array<i64: 1, 32>}, {transform_indices = @transform_6, window_bounds = array<i64: 8, 2, 32>}]} {
    %c0 = arith.constant 0 : index
    %c0_0 = arith.constant 0 : index
    %c0_1 = arith.constant 0 : index
    %0 = vector.load %arg1[%c0, %c0_0, %c0_1] : memref<8x2x32xf32, #tpu.memory_space<vmem>>, vector<8x2x32xf32>
    %c0_2 = arith.constant 0 : index
    %c0_3 = arith.constant 0 : index
    %1 = vector.load %arg2[%c0_2, %c0_3] : memref<1x32xf32, #tpu.memory_space<vmem>>, vector<1x32xf32>
    %c0_4 = arith.constant 0 : index
    %c0_5 = arith.constant 0 : index
    %2 = vector.load %arg3[%c0_4, %c0_5] : memref<1x32xf32, #tpu.memory_space<vmem>>, vector<1x32xf32>
    %cst = arith.constant dense<0.000000e+00> : vector<8x2xf32>
    %3 = vector.multi_reduction <add>, %0, %cst [2] : vector<8x2x32xf32> to vector<8x2xf32>
    %4 = vector.shape_cast %3 : vector<8x2xf32> to vector<8x2x1xf32>
    %cst_6 = arith.constant 3.200000e+01 : f32
    %5 = vector.broadcast %cst_6 : f32 to vector<8x2x1xf32>
    %6 = arith.divf %4, %5 : vector<8x2x1xf32>
    %7 = vector.broadcast %6 : vector<8x2x1xf32> to vector<8x2x32xf32>
    %8 = arith.subf %0, %7 : vector<8x2x32xf32>
    %9 = arith.mulf %8, %8 : vector<8x2x32xf32>
    %cst_7 = arith.constant dense<0.000000e+00> : vector<8x2xf32>
    %10 = vector.multi_reduction <add>, %9, %cst_7 [2] : vector<8x2x32xf32> to vector<8x2xf32>
    %11 = vector.shape_cast %10 : vector<8x2xf32> to vector<8x2x1xf32>
    %cst_8 = arith.constant 3.200000e+01 : f32
    %12 = vector.broadcast %cst_8 : f32 to vector<8x2x1xf32>
    %13 = arith.divf %11, %12 : vector<8x2x1xf32>
    %14 = vector.broadcast %6 : vector<8x2x1xf32> to vector<8x2x32xf32>
    %15 = arith.subf %0, %14 : vector<8x2x32xf32>
    %cst_9 = arith.constant 9.99999974E-6 : f32
    %16 = vector.broadcast %cst_9 : f32 to vector<8x2x1xf32>
    %17 = arith.addf %13, %16 : vector<8x2x1xf32>
    %18 = math.rsqrt %17 : vector<8x2x1xf32>
    %19 = vector.broadcast %18 : vector<8x2x1xf32> to vector<8x2x32xf32>
    %20 = arith.mulf %15, %19 : vector<8x2x32xf32>
    %21 = vector.shape_cast %1 : vector<1x32xf32> to vector<1x1x32xf32>
    %22 = vector.broadcast %21 : vector<1x1x32xf32> to vector<8x2x32xf32>
    %23 = arith.mulf %20, %22 : vector<8x2x32xf32>
    %24 = vector.shape_cast %2 : vector<1x32xf32> to vector<1x1x32xf32>
    %25 = vector.broadcast %24 : vector<1x1x32xf32> to vector<8x2x32xf32>
    %26 = arith.addf %23, %25 : vector<8x2x32xf32>
    %27 = vector.shape_cast %26 : vector<8x2x32xf32> to vector<16x32xf32>
    %28 = arith.truncf %27 : vector<16x32xf32> to vector<16x32xbf16>
    %c0_10 = arith.constant 0 : index
    %c0_11 = arith.constant 0 : index
    %29 = vector.load %arg4[%c0_10, %c0_11] : memref<32x96xbf16, #tpu.memory_space<vmem>>, vector<32x96xbf16>
    %cst_12 = arith.constant dense<0.000000e+00> : vector<16x96xf32>
    %30 = tpu.matmul %28, %29, %cst_12 {dimension_numbers = #tpu.dot_dimension_numbers<[1], [0], [0], [1], [0, 0, 1, 1], [], []>} : vector<16x32xbf16>, vector<32x96xbf16>, vector<16x96xf32> -> vector<16x96xf32>
    %31 = vector.shape_cast %30 : vector<16x96xf32> to vector<8x2x96xf32>
    %32 = vector.extract_strided_slice %31 {offsets = [0, 0, 0], sizes = [8, 2, 8], strides = [1, 1, 1]} : vector<8x2x96xf32> to vector<8x2x8xf32>
    %33 = arith.truncf %32 : vector<8x2x8xf32> to vector<8x2x8xbf16>
    %34 = vector.extract_strided_slice %31 {offsets = [0, 0, 32], sizes = [8, 2, 8], strides = [1, 1, 1]} : vector<8x2x96xf32> to vector<8x2x8xf32>
    %35 = arith.truncf %34 : vector<8x2x8xf32> to vector<8x2x8xbf16>
    %36 = vector.extract_strided_slice %31 {offsets = [0, 0, 64], sizes = [8, 2, 8], strides = [1, 1, 1]} : vector<8x2x96xf32> to vector<8x2x8xf32>
    %37 = arith.truncf %36 : vector<8x2x8xf32> to vector<8x2x8xbf16>
    "tpu.trace_start"() <{level = 10 : i32, message = "bqd,bkd->bqk"}> : () -> ()
    %cst_13 = arith.constant dense<0.000000e+00> : vector<8x2x2xf32>
    %38 = tpu.matmul %33, %35, %cst_13 {dimension_numbers = #tpu.dot_dimension_numbers<[2], [2], [1], [1], [0, 0, 0, 1, 1, 1], [0], [0]>} : vector<8x2x8xbf16>, vector<8x2x8xbf16>, vector<8x2x2xf32> -> vector<8x2x2xf32>
    "tpu.trace_stop"() : () -> ()
    %cst_14 = arith.constant 0.353553385 : f32
    %39 = vector.broadcast %cst_14 : f32 to vector<8x2x2xf32>
    %40 = arith.mulf %38, %39 : vector<8x2x2xf32>
    %cst_15 = arith.constant dense<0xFF800000> : vector<8x2xf32>
    %41 = vector.multi_reduction <maximumf>, %40, %cst_15 [2] : vector<8x2x2xf32> to vector<8x2xf32>
    %42 = vector.shape_cast %41 : vector<8x2xf32> to vector<8x2x1xf32>
    %43 = vector.broadcast %42 : vector<8x2x1xf32> to vector<8x2x2xf32>
    %44 = arith.subf %40, %43 : vector<8x2x2xf32>
    %45 = math.exp %44 : vector<8x2x2xf32>
    %cst_16 = arith.constant dense<0.000000e+00> : vector<8x2xf32>
    %46 = vector.multi_reduction <add>, %45, %cst_16 [2] : vector<8x2x2xf32> to vector<8x2xf32>
    %47 = vector.shape_cast %46 : vector<8x2xf32> to vector<8x2x1xf32>
    %48 = tpu.reciprocal %47 {approx = true} : vector<8x2x1xf32> -> vector<8x2x1xf32>
    %49 = vector.broadcast %48 : vector<8x2x1xf32> to vector<8x2x2xf32>
    %50 = arith.mulf %45, %49 : vector<8x2x2xf32>
    %51 = arith.truncf %50 : vector<8x2x2xf32> to vector<8x2x2xbf16>
    "tpu.trace_start"() <{level = 10 : i32, message = "bqk,bkd->bqd"}> : () -> ()
    %cst_17 = arith.constant dense<0.000000e+00> : vector<8x2x8xf32>
    %52 = tpu.matmul %51, %37, %cst_17 {dimension_numbers = #tpu.dot_dimension_numbers<[2], [1], [1], [2], [0, 0, 0, 1, 1, 2], [0], [0]>} : vector<8x2x2xbf16>, vector<8x2x8xbf16>, vector<8x2x8xf32> -> vector<8x2x8xf32>
    "tpu.trace_stop"() : () -> ()
    %53 = vector.extract_strided_slice %31 {offsets = [0, 0, 8], sizes = [8, 2, 8], strides = [1, 1, 1]} : vector<8x2x96xf32> to vector<8x2x8xf32>
    %54 = arith.truncf %53 : vector<8x2x8xf32> to vector<8x2x8xbf16>
    %55 = vector.extract_strided_slice %31 {offsets = [0, 0, 40], sizes = [8, 2, 8], strides = [1, 1, 1]} : vector<8x2x96xf32> to vector<8x2x8xf32>
    %56 = arith.truncf %55 : vector<8x2x8xf32> to vector<8x2x8xbf16>
    %57 = vector.extract_strided_slice %31 {offsets = [0, 0, 72], sizes = [8, 2, 8], strides = [1, 1, 1]} : vector<8x2x96xf32> to vector<8x2x8xf32>
    %58 = arith.truncf %57 : vector<8x2x8xf32> to vector<8x2x8xbf16>
    "tpu.trace_start"() <{level = 10 : i32, message = "bqd,bkd->bqk"}> : () -> ()
    %cst_18 = arith.constant dense<0.000000e+00> : vector<8x2x2xf32>
    %59 = tpu.matmul %54, %56, %cst_18 {dimension_numbers = #tpu.dot_dimension_numbers<[2], [2], [1], [1], [0, 0, 0, 1, 1, 1], [0], [0]>} : vector<8x2x8xbf16>, vector<8x2x8xbf16>, vector<8x2x2xf32> -> vector<8x2x2xf32>
    "tpu.trace_stop"() : () -> ()
    %cst_19 = arith.constant 0.353553385 : f32
    %60 = vector.broadcast %cst_19 : f32 to vector<8x2x2xf32>
    %61 = arith.mulf %59, %60 : vector<8x2x2xf32>
    %cst_20 = arith.constant dense<0xFF800000> : vector<8x2xf32>
    %62 = vector.multi_reduction <maximumf>, %61, %cst_20 [2] : vector<8x2x2xf32> to vector<8x2xf32>
    %63 = vector.shape_cast %62 : vector<8x2xf32> to vector<8x2x1xf32>
    %64 = vector.broadcast %63 : vector<8x2x1xf32> to vector<8x2x2xf32>
    %65 = arith.subf %61, %64 : vector<8x2x2xf32>
    %66 = math.exp %65 : vector<8x2x2xf32>
    %cst_21 = arith.constant dense<0.000000e+00> : vector<8x2xf32>
    %67 = vector.multi_reduction <add>, %66, %cst_21 [2] : vector<8x2x2xf32> to vector<8x2xf32>
    %68 = vector.shape_cast %67 : vector<8x2xf32> to vector<8x2x1xf32>
    %69 = tpu.reciprocal %68 {approx = true} : vector<8x2x1xf32> -> vector<8x2x1xf32>
    %70 = vector.broadcast %69 : vector<8x2x1xf32> to vector<8x2x2xf32>
    %71 = arith.mulf %66, %70 : vector<8x2x2xf32>
    %72 = arith.truncf %71 : vector<8x2x2xf32> to vector<8x2x2xbf16>
    "tpu.trace_start"() <{level = 10 : i32, message = "bqk,bkd->bqd"}> : () -> ()
    %cst_22 = arith.constant dense<0.000000e+00> : vector<8x2x8xf32>
    %73 = tpu.matmul %72, %58, %cst_22 {dimension_numbers = #tpu.dot_dimension_numbers<[2], [1], [1], [2], [0, 0, 0, 1, 1, 2], [0], [0]>} : vector<8x2x2xbf16>, vector<8x2x8xbf16>, vector<8x2x8xf32> -> vector<8x2x8xf32>
    "tpu.trace_stop"() : () -> ()
    %74 = vector.extract_strided_slice %31 {offsets = [0, 0, 16], sizes = [8, 2, 8], strides = [1, 1, 1]} : vector<8x2x96xf32> to vector<8x2x8xf32>
    %75 = arith.truncf %74 : vector<8x2x8xf32> to vector<8x2x8xbf16>
    %76 = vector.extract_strided_slice %31 {offsets = [0, 0, 48], sizes = [8, 2, 8], strides = [1, 1, 1]} : vector<8x2x96xf32> to vector<8x2x8xf32>
    %77 = arith.truncf %76 : vector<8x2x8xf32> to vector<8x2x8xbf16>
    %78 = vector.extract_strided_slice %31 {offsets = [0, 0, 80], sizes = [8, 2, 8], strides = [1, 1, 1]} : vector<8x2x96xf32> to vector<8x2x8xf32>
    %79 = arith.truncf %78 : vector<8x2x8xf32> to vector<8x2x8xbf16>
    "tpu.trace_start"() <{level = 10 : i32, message = "bqd,bkd->bqk"}> : () -> ()
    %cst_23 = arith.constant dense<0.000000e+00> : vector<8x2x2xf32>
    %80 = tpu.matmul %75, %77, %cst_23 {dimension_numbers = #tpu.dot_dimension_numbers<[2], [2], [1], [1], [0, 0, 0, 1, 1, 1], [0], [0]>} : vector<8x2x8xbf16>, vector<8x2x8xbf16>, vector<8x2x2xf32> -> vector<8x2x2xf32>
    "tpu.trace_stop"() : () -> ()
    %cst_24 = arith.constant 0.353553385 : f32
    %81 = vector.broadcast %cst_24 : f32 to vector<8x2x2xf32>
    %82 = arith.mulf %80, %81 : vector<8x2x2xf32>
    %cst_25 = arith.constant dense<0xFF800000> : vector<8x2xf32>
    %83 = vector.multi_reduction <maximumf>, %82, %cst_25 [2] : vector<8x2x2xf32> to vector<8x2xf32>
    %84 = vector.shape_cast %83 : vector<8x2xf32> to vector<8x2x1xf32>
    %85 = vector.broadcast %84 : vector<8x2x1xf32> to vector<8x2x2xf32>
    %86 = arith.subf %82, %85 : vector<8x2x2xf32>
    %87 = math.exp %86 : vector<8x2x2xf32>
    %cst_26 = arith.constant dense<0.000000e+00> : vector<8x2xf32>
    %88 = vector.multi_reduction <add>, %87, %cst_26 [2] : vector<8x2x2xf32> to vector<8x2xf32>
    %89 = vector.shape_cast %88 : vector<8x2xf32> to vector<8x2x1xf32>
    %90 = tpu.reciprocal %89 {approx = true} : vector<8x2x1xf32> -> vector<8x2x1xf32>
    %91 = vector.broadcast %90 : vector<8x2x1xf32> to vector<8x2x2xf32>
    %92 = arith.mulf %87, %91 : vector<8x2x2xf32>
    %93 = arith.truncf %92 : vector<8x2x2xf32> to vector<8x2x2xbf16>
    "tpu.trace_start"() <{level = 10 : i32, message = "bqk,bkd->bqd"}> : () -> ()
    %cst_27 = arith.constant dense<0.000000e+00> : vector<8x2x8xf32>
    %94 = tpu.matmul %93, %79, %cst_27 {dimension_numbers = #tpu.dot_dimension_numbers<[2], [1], [1], [2], [0, 0, 0, 1, 1, 2], [0], [0]>} : vector<8x2x2xbf16>, vector<8x2x8xbf16>, vector<8x2x8xf32> -> vector<8x2x8xf32>
    "tpu.trace_stop"() : () -> ()
    %95 = vector.extract_strided_slice %31 {offsets = [0, 0, 24], sizes = [8, 2, 8], strides = [1, 1, 1]} : vector<8x2x96xf32> to vector<8x2x8xf32>
    %96 = arith.truncf %95 : vector<8x2x8xf32> to vector<8x2x8xbf16>
    %97 = vector.extract_strided_slice %31 {offsets = [0, 0, 56], sizes = [8, 2, 8], strides = [1, 1, 1]} : vector<8x2x96xf32> to vector<8x2x8xf32>
    %98 = arith.truncf %97 : vector<8x2x8xf32> to vector<8x2x8xbf16>
    %99 = vector.extract_strided_slice %31 {offsets = [0, 0, 88], sizes = [8, 2, 8], strides = [1, 1, 1]} : vector<8x2x96xf32> to vector<8x2x8xf32>
    %100 = arith.truncf %99 : vector<8x2x8xf32> to vector<8x2x8xbf16>
    "tpu.trace_start"() <{level = 10 : i32, message = "bqd,bkd->bqk"}> : () -> ()
    %cst_28 = arith.constant dense<0.000000e+00> : vector<8x2x2xf32>
    %101 = tpu.matmul %96, %98, %cst_28 {dimension_numbers = #tpu.dot_dimension_numbers<[2], [2], [1], [1], [0, 0, 0, 1, 1, 1], [0], [0]>} : vector<8x2x8xbf16>, vector<8x2x8xbf16>, vector<8x2x2xf32> -> vector<8x2x2xf32>
    "tpu.trace_stop"() : () -> ()
    %cst_29 = arith.constant 0.353553385 : f32
    %102 = vector.broadcast %cst_29 : f32 to vector<8x2x2xf32>
    %103 = arith.mulf %101, %102 : vector<8x2x2xf32>
    %cst_30 = arith.constant dense<0xFF800000> : vector<8x2xf32>
    %104 = vector.multi_reduction <maximumf>, %103, %cst_30 [2] : vector<8x2x2xf32> to vector<8x2xf32>
    %105 = vector.shape_cast %104 : vector<8x2xf32> to vector<8x2x1xf32>
    %106 = vector.broadcast %105 : vector<8x2x1xf32> to vector<8x2x2xf32>
    %107 = arith.subf %103, %106 : vector<8x2x2xf32>
    %108 = math.exp %107 : vector<8x2x2xf32>
    %cst_31 = arith.constant dense<0.000000e+00> : vector<8x2xf32>
    %109 = vector.multi_reduction <add>, %108, %cst_31 [2] : vector<8x2x2xf32> to vector<8x2xf32>
    %110 = vector.shape_cast %109 : vector<8x2xf32> to vector<8x2x1xf32>
    %111 = tpu.reciprocal %110 {approx = true} : vector<8x2x1xf32> -> vector<8x2x1xf32>
    %112 = vector.broadcast %111 : vector<8x2x1xf32> to vector<8x2x2xf32>
    %113 = arith.mulf %108, %112 : vector<8x2x2xf32>
    %114 = arith.truncf %113 : vector<8x2x2xf32> to vector<8x2x2xbf16>
    "tpu.trace_start"() <{level = 10 : i32, message = "bqk,bkd->bqd"}> : () -> ()
    %cst_32 = arith.constant dense<0.000000e+00> : vector<8x2x8xf32>
    %115 = tpu.matmul %114, %100, %cst_32 {dimension_numbers = #tpu.dot_dimension_numbers<[2], [1], [1], [2], [0, 0, 0, 1, 1, 2], [0], [0]>} : vector<8x2x2xbf16>, vector<8x2x8xbf16>, vector<8x2x8xf32> -> vector<8x2x8xf32>
    "tpu.trace_stop"() : () -> ()
    %116 = tpu.concatenate %52, %73, %94, %115 in 2 : vector<8x2x8xf32>, vector<8x2x8xf32>, vector<8x2x8xf32>, vector<8x2x8xf32> -> vector<8x2x32xf32>
    %117 = vector.shape_cast %116 : vector<8x2x32xf32> to vector<16x32xf32>
    %118 = arith.truncf %117 : vector<16x32xf32> to vector<16x32xbf16>
    %c0_33 = arith.constant 0 : index
    %c0_34 = arith.constant 0 : index
    %119 = vector.load %arg5[%c0_33, %c0_34] : memref<32x32xbf16, #tpu.memory_space<vmem>>, vector<32x32xbf16>
    %cst_35 = arith.constant dense<0.000000e+00> : vector<16x32xf32>
    %120 = tpu.matmul %118, %119, %cst_35 {dimension_numbers = #tpu.dot_dimension_numbers<[1], [0], [0], [1], [0, 0, 1, 1], [], []>} : vector<16x32xbf16>, vector<32x32xbf16>, vector<16x32xf32> -> vector<16x32xf32>
    %121 = vector.shape_cast %120 : vector<16x32xf32> to vector<8x2x32xf32>
    %122 = arith.addf %0, %121 : vector<8x2x32xf32>
    %c0_36 = arith.constant 0 : index
    %c0_37 = arith.constant 0 : index
    %123 = vector.load %arg6[%c0_36, %c0_37] : memref<1x32xf32, #tpu.memory_space<vmem>>, vector<1x32xf32>
    %124 = vector.shape_cast %123 : vector<1x32xf32> to vector<1x1x32xf32>
    %125 = vector.broadcast %124 : vector<1x1x32xf32> to vector<8x2x32xf32>
    %126 = arith.addf %122, %125 : vector<8x2x32xf32>
    %c0_38 = arith.constant 0 : index
    %c0_39 = arith.constant 0 : index
    %c0_40 = arith.constant 0 : index
    %127 = vector.load %arg7[%c0_38, %c0_39, %c0_40] : memref<8x2x32xf32, #tpu.memory_space<vmem>>, vector<8x2x32xf32>
    tpu.vector_store %arg7[%c0_38, %c0_39, %c0_40], %126 {strides = array<i32>} : memref<8x2x32xf32, #tpu.memory_space<vmem>>, vector<8x2x32xf32>,
    return
  }
  func.func @transform_0(%arg0: i32) -> (i32, i32, i32) {
    %c0_i32 = arith.constant 0 : i32
    %c0_i32_0 = arith.constant 0 : i32
    %c0_i32_1 = arith.constant 0 : i32
    return %arg0, %c0_i32, %c0_i32_0 : i32, i32, i32
  }
  func.func @transform_1(%arg0: i32) -> (i32, i32) {
    %c0_i32 = arith.constant 0 : i32
    %c0_i32_0 = arith.constant 0 : i32
    %c0_i32_1 = arith.constant 0 : i32
    return %c0_i32, %c0_i32_0 : i32, i32
  }
  func.func @transform_2(%arg0: i32) -> (i32, i32) {
    %c0_i32 = arith.constant 0 : i32
    %c0_i32_0 = arith.constant 0 : i32
    %c0_i32_1 = arith.constant 0 : i32
    return %c0_i32, %c0_i32_0 : i32, i32
  }
  func.func @transform_3(%arg0: i32) -> (i32, i32) {
    %c0_i32 = arith.constant 0 : i32
    %c0_i32_0 = arith.constant 0 : i32
    %c0_i32_1 = arith.constant 0 : i32
    return %c0_i32, %c0_i32_0 : i32, i32
  }
  func.func @transform_4(%arg0: i32) -> (i32, i32) {
    %c0_i32 = arith.constant 0 : i32
    %c0_i32_0 = arith.constant 0 : i32
    %c0_i32_1 = arith.constant 0 : i32
    return %c0_i32, %c0_i32_0 : i32, i32
  }
  func.func @transform_5(%arg0: i32) -> (i32, i32) {
    %c0_i32 = arith.constant 0 : i32
    %c0_i32_0 = arith.constant 0 : i32
    %c0_i32_1 = arith.constant 0 : i32
    return %c0_i32, %c0_i32_0 : i32, i32
  }
  func.func @transform_6(%arg0: i32) -> (i32, i32, i32) {
    %c0_i32 = arith.constant 0 : i32
    %c0_i32_0 = arith.constant 0 : i32
    %c0_i32_1 = arith.constant 0 : i32
    return %arg0, %c0_i32, %c0_i32_0 : i32, i32, i32
  }
}

module attributes {stable_mosaic.version = 11 : i64} {
  func.func @mlp_block_kernel(%arg0: i32, %arg1: memref<16x32xf32, #tpu.memory_space<vmem>>, %arg2: memref<1x32xf32, #tpu.memory_space<vmem>>, %arg3: memref<1x32xf32, #tpu.memory_space<vmem>>, %arg4: memref<32x128xbf16, #tpu.memory_space<vmem>>, %arg5: memref<1x128xf32, #tpu.memory_space<vmem>>, %arg6: memref<128x32xbf16, #tpu.memory_space<vmem>>, %arg7: memref<1x32xf32, #tpu.memory_space<vmem>>, %arg8: memref<16x32xf32, #tpu.memory_space<vmem>>) attributes {dimension_semantics = [#tpu.dimension_semantics<parallel>], iteration_bounds = array<i64: 1>, scalar_prefetch = 0 : i64, scratch_operands = 0 : i64, tpu.core_type = #tpu.core_type<tc>, window_params = [{transform_indices = @transform_0, window_bounds = array<i64: 16, 32>}, {pipeline_mode = #tpu.pipeline_mode<synchronous>, transform_indices = @transform_1, window_bounds = array<i64: 1, 32>}, {pipeline_mode = #tpu.pipeline_mode<synchronous>, transform_indices = @transform_2, window_bounds = array<i64: 1, 32>}, {pipeline_mode = #tpu.pipeline_mode<synchronous>, transform_indices = @transform_3, window_bounds = array<i64: 32, 128>}, {pipeline_mode = #tpu.pipeline_mode<synchronous>, transform_indices = @transform_4, window_bounds = array<i64: 1, 128>}, {pipeline_mode = #tpu.pipeline_mode<synchronous>, transform_indices = @transform_5, window_bounds = array<i64: 128, 32>}, {pipeline_mode = #tpu.pipeline_mode<synchronous>, transform_indices = @transform_6, window_bounds = array<i64: 1, 32>}, {transform_indices = @transform_7, window_bounds = array<i64: 16, 32>}]} {
    %c0 = arith.constant 0 : index
    %c0_0 = arith.constant 0 : index
    %0 = vector.load %arg1[%c0, %c0_0] : memref<16x32xf32, #tpu.memory_space<vmem>>, vector<16x32xf32>
    %c0_1 = arith.constant 0 : index
    %c0_2 = arith.constant 0 : index
    %1 = vector.load %arg2[%c0_1, %c0_2] : memref<1x32xf32, #tpu.memory_space<vmem>>, vector<1x32xf32>
    %c0_3 = arith.constant 0 : index
    %c0_4 = arith.constant 0 : index
    %2 = vector.load %arg3[%c0_3, %c0_4] : memref<1x32xf32, #tpu.memory_space<vmem>>, vector<1x32xf32>
    %cst = arith.constant dense<0.000000e+00> : vector<16xf32>
    %3 = vector.multi_reduction <add>, %0, %cst [1] : vector<16x32xf32> to vector<16xf32>
    %4 = vector.shape_cast %3 : vector<16xf32> to vector<16x1xf32>
    %cst_5 = arith.constant 3.200000e+01 : f32
    %5 = vector.broadcast %cst_5 : f32 to vector<16x1xf32>
    %6 = arith.divf %4, %5 : vector<16x1xf32>
    %7 = vector.broadcast %6 : vector<16x1xf32> to vector<16x32xf32>
    %8 = arith.subf %0, %7 : vector<16x32xf32>
    %9 = arith.mulf %8, %8 : vector<16x32xf32>
    %cst_6 = arith.constant dense<0.000000e+00> : vector<16xf32>
    %10 = vector.multi_reduction <add>, %9, %cst_6 [1] : vector<16x32xf32> to vector<16xf32>
    %11 = vector.shape_cast %10 : vector<16xf32> to vector<16x1xf32>
    %cst_7 = arith.constant 3.200000e+01 : f32
    %12 = vector.broadcast %cst_7 : f32 to vector<16x1xf32>
    %13 = arith.divf %11, %12 : vector<16x1xf32>
    %14 = vector.broadcast %6 : vector<16x1xf32> to vector<16x32xf32>
    %15 = arith.subf %0, %14 : vector<16x32xf32>
    %cst_8 = arith.constant 9.99999974E-6 : f32
    %16 = vector.broadcast %cst_8 : f32 to vector<16x1xf32>
    %17 = arith.addf %13, %16 : vector<16x1xf32>
    %18 = math.rsqrt %17 : vector<16x1xf32>
    %19 = vector.broadcast %18 : vector<16x1xf32> to vector<16x32xf32>
    %20 = arith.mulf %15, %19 : vector<16x32xf32>
    %21 = vector.broadcast %1 : vector<1x32xf32> to vector<16x32xf32>
    %22 = arith.mulf %20, %21 : vector<16x32xf32>
    %23 = vector.broadcast %2 : vector<1x32xf32> to vector<16x32xf32>
    %24 = arith.addf %22, %23 : vector<16x32xf32>
    %25 = arith.truncf %24 : vector<16x32xf32> to vector<16x32xbf16>
    %c0_9 = arith.constant 0 : index
    %c0_10 = arith.constant 0 : index
    %26 = vector.load %arg4[%c0_9, %c0_10] : memref<32x128xbf16, #tpu.memory_space<vmem>>, vector<32x128xbf16>
    %cst_11 = arith.constant dense<0.000000e+00> : vector<16x128xf32>
    %27 = tpu.matmul %25, %26, %cst_11 {dimension_numbers = #tpu.dot_dimension_numbers<[1], [0], [0], [1], [0, 0, 1, 1], [], []>} : vector<16x32xbf16>, vector<32x128xbf16>, vector<16x128xf32> -> vector<16x128xf32>
    %c0_12 = arith.constant 0 : index
    %c0_13 = arith.constant 0 : index
    %28 = vector.load %arg5[%c0_12, %c0_13] : memref<1x128xf32, #tpu.memory_space<vmem>>, vector<1x128xf32>
    %29 = vector.broadcast %28 : vector<1x128xf32> to vector<16x128xf32>
    %30 = arith.addf %27, %29 : vector<16x128xf32>
    %cst_14 = arith.constant 5.000000e-01 : f32
    %31 = vector.broadcast %cst_14 : f32 to vector<16x128xf32>
    %32 = arith.mulf %31, %30 : vector<16x128xf32>
    %cst_15 = arith.constant 0.707106769 : f32
    %33 = vector.broadcast %cst_15 : f32 to vector<16x128xf32>
    %34 = arith.mulf %30, %33 : vector<16x128xf32>
    %35 = math.erf %34 : vector<16x128xf32>
    %cst_16 = arith.constant 1.000000e+00 : f32
    %36 = vector.broadcast %cst_16 : f32 to vector<16x128xf32>
    %37 = arith.addf %36, %35 : vector<16x128xf32>
    %38 = arith.mulf %32, %37 : vector<16x128xf32>
    %39 = arith.truncf %38 : vector<16x128xf32> to vector<16x128xbf16>
    %c0_17 = arith.constant 0 : index
    %c0_18 = arith.constant 0 : index
    %40 = vector.load %arg6[%c0_17, %c0_18] : memref<128x32xbf16, #tpu.memory_space<vmem>>, vector<128x32xbf16>
    %cst_19 = arith.constant dense<0.000000e+00> : vector<16x32xf32>
    %41 = tpu.matmul %39, %40, %cst_19 {dimension_numbers = #tpu.dot_dimension_numbers<[1], [0], [0], [1], [0, 0, 1, 1], [], []>} : vector<16x128xbf16>, vector<128x32xbf16>, vector<16x32xf32> -> vector<16x32xf32>
    %c0_20 = arith.constant 0 : index
    %c0_21 = arith.constant 0 : index
    %42 = vector.load %arg7[%c0_20, %c0_21] : memref<1x32xf32, #tpu.memory_space<vmem>>, vector<1x32xf32>
    %43 = vector.broadcast %42 : vector<1x32xf32> to vector<16x32xf32>
    %44 = arith.addf %41, %43 : vector<16x32xf32>
    %45 = arith.addf %0, %44 : vector<16x32xf32>
    %c0_22 = arith.constant 0 : index
    %c0_23 = arith.constant 0 : index
    %46 = vector.load %arg8[%c0_22, %c0_23] : memref<16x32xf32, #tpu.memory_space<vmem>>, vector<16x32xf32>
    tpu.vector_store %arg8[%c0_22, %c0_23], %45 {strides = array<i32>} : memref<16x32xf32, #tpu.memory_space<vmem>>, vector<16x32xf32>,
    return
  }
  func.func @transform_0(%arg0: i32) -> (i32, i32) {
    %c0_i32 = arith.constant 0 : i32
    %c0_i32_0 = arith.constant 0 : i32
    return %arg0, %c0_i32 : i32, i32
  }
  func.func @transform_1(%arg0: i32) -> (i32, i32) {
    %c0_i32 = arith.constant 0 : i32
    %c0_i32_0 = arith.constant 0 : i32
    %c0_i32_1 = arith.constant 0 : i32
    return %c0_i32, %c0_i32_0 : i32, i32
  }
  func.func @transform_2(%arg0: i32) -> (i32, i32) {
    %c0_i32 = arith.constant 0 : i32
    %c0_i32_0 = arith.constant 0 : i32
    %c0_i32_1 = arith.constant 0 : i32
    return %c0_i32, %c0_i32_0 : i32, i32
  }
  func.func @transform_3(%arg0: i32) -> (i32, i32) {
    %c0_i32 = arith.constant 0 : i32
    %c0_i32_0 = arith.constant 0 : i32
    %c0_i32_1 = arith.constant 0 : i32
    return %c0_i32, %c0_i32_0 : i32, i32
  }
  func.func @transform_4(%arg0: i32) -> (i32, i32) {
    %c0_i32 = arith.constant 0 : i32
    %c0_i32_0 = arith.constant 0 : i32
    %c0_i32_1 = arith.constant 0 : i32
    return %c0_i32, %c0_i32_0 : i32, i32
  }
  func.func @transform_5(%arg0: i32) -> (i32, i32) {
    %c0_i32 = arith.constant 0 : i32
    %c0_i32_0 = arith.constant 0 : i32
    %c0_i32_1 = arith.constant 0 : i32
    return %c0_i32, %c0_i32_0 : i32, i32
  }
  func.func @transform_6(%arg0: i32) -> (i32, i32) {
    %c0_i32 = arith.constant 0 : i32
    %c0_i32_0 = arith.constant 0 : i32
    %c0_i32_1 = arith.constant 0 : i32
    return %c0_i32, %c0_i32_0 : i32, i32
  }
  func.func @transform_7(%arg0: i32) -> (i32, i32) {
    %c0_i32 = arith.constant 0 : i32
    %c0_i32_0 = arith.constant 0 : i32
    return %arg0, %c0_i32 : i32, i32
  }
}

</mosaic_0001>

<bundles_post_ra>
// kernel: block_forward.5
= control target key start
LH: loop header
LB: loop body
LE: loop exit
PB: predicated region body
PF: predicated region fallthrough
CT: control target
= control target key end

     0   :  { %vm32_vm0 = vcmask 261120   ;;  %s552_s0 = inlined_call_operand.vmem [shape: f32[16,32], index: 0, kind: input, shape index: {}]   ;;  %s553_s1 = inlined_call_operand.vmem [shape: f32[1,32], index: 1, kind: input, shape index: {}]   ;;  %s554_s2 = inlined_call_operand.vmem [shape: f32[1,32], index: 2, kind: input, shape index: {}]   ;;  %s555_s3 = inlined_call_operand.vmem [shape: bf16[32,128], index: 3, kind: input, shape index: {}]   ;;  %s556_s4 = inlined_call_operand.vmem [shape: f32[1,128], index: 4, kind: input, shape index: {}]   ;;  %s557_s5 = inlined_call_operand.vmem [shape: bf16[128,32], index: 5, kind: input, shape index: {}]   ;;  %s558_s6 = inlined_call_operand.vmem [shape: f32[1,32], index: 6, kind: input, shape index: {}]   ;;  %s559_s7 = inlined_call_operand.hbm [shape: f32[16,32], index: 7, kind: output, shape index: {}]  }
   0x1   :  { %v469_v0 = vld [vmem:[%s552_s0] sm:$0xff] }
   0x2   :  { %v33_v1 = vsel %vm32_vm0, %v469_v0, 0.0 }
   0x3   :  { %34 = vadd.xlane.f32.xlu0 %v33_v1 }
   0x4   :  { %12 = vsyncpa [#allocation3], 0  ;;  %v476_v2 = vld [vmem:[%s552_s0 + $0x8] sm:$0xff]  ;;  %v422_v4 = vmov 32.0   ;;  %v368_v23 = vld [vmem:[%s555_s3] sm:$0xff]  ;;  %s423_s27 = smov [#allocation2]  }
   0x5   :  { %v36_v3 = vsel %vm32_vm0, %v476_v2, 0.0  ;;  %386 = vrcp.f32 %v422_v4  ;;  %v369_v21 = vld [vmem:[%s555_s3 + $0x8] sm:$0xff]  ;;  %v382_v42 = vld [vmem:[%s553_s1] ss:$0 sm:$0xff]  ;;  %v377_v53 = vld [vmem:[%s557_s5 + $0x38] sm:$0xff]  ;;  %s311_s0 = sshll.u32 %s423_s27, 4  ;;  %s312_s0 = int_to_ptr.vmem [resolvable:$true] %s311_s0 }
   0x6   :  { %124 = vmatpush.bf16.msra.mxu0 %v369_v21  ;;  %v383_v47 = vld [vmem:[%s554_s2] ss:$0 sm:$0xff]  ;;  %289 = vmatpush.bf16.msra.mxu1 %v377_v53  ;;  %v376_v57 = vld [vmem:[%s557_s5 + $0x30] sm:$0xff]  ;;  %v375_v59 = vld [vmem:[%s557_s5 + $0x28] sm:$0xff]  ;;  %s313_s30 = sshll.u32 %s559_s7, 4  ;;  %s425_s3 = smov 8   ;;  %s314_s30 = int_to_ptr.hbm [resolvable:$true] %s313_s30 }
   0x7   :  { %v384_v52 = vld [vmem:[%s556_s4] ss:$0 sm:$0xff] }
   0x8   :  { %v374_v1 = vld [vmem:[%s557_s5 + $0x20] sm:$0xff] }
   0xa   :  { %125 = vmatpush.bf16.msra.mxu0 %v368_v23  ;;  %290 = vmatpush.bf16.msra.mxu1 %v376_v57 }
   0xb   :  { %37 = vadd.xlane.f32.xlu0 %v36_v3  ;;  %v387_v5 = vpop.eup %386 }
   0xc   :  { %v40_v6 = vmul.f32 32.0, %v387_v5  ;;  %vm44_vm1 = vweird.f32 %v387_v5 }
   0xe   :  { %v41_v7 = vsub.f32 1.0, %v40_v6  ;;  %291 = vmatpush.bf16.msra.mxu1 %v375_v59 }
  0x10   :  { %v42_v8 = vmul.f32 %v387_v5, %v41_v7 }
  0x12   :  { %v43_v9 = vadd.f32 %v387_v5, %v42_v8  ;;  %292 = vmatpush.bf16.msra.mxu1 %v374_v1  ;;  %v373_v8 = vld [vmem:[%s557_s5 + $0x18] sm:$0xff] }
  0x14   :  { %v45_v10 = vsel %vm44_vm1, %v387_v5, %v43_v9 }
  0x16   :  { %293 = vmatpush.bf16.msra.mxu1 %v373_v8 }
  0x76   :  { %v35_v11 = vpop.xlane.xlu0 %34 }
  0x77   :  { %v46_v12 = vmul.f32 %v45_v10, %v35_v11 }
  0x79   :  { %v48_v13 = vsub.f32 %v469_v0, %v46_v12 }
  0x7b   :  { %v50_v14 = vmul.f32 %v48_v13, %v48_v13 }
  0x7d   :  { %v52_v15 = vsel %vm32_vm0, %v50_v14, 0.0  ;;  %v372_v14 = vld [vmem:[%s557_s5 + $0x10] sm:$0xff] }
  0x7e   :  { %53 = vadd.xlane.f32.xlu1 %v52_v15  ;;  %v38_v16 = vpop.xlane.xlu0 %37  ;;  %294 = vmatpush.bf16.msra.mxu1 %v372_v14 }
  0x7f   :  { %v47_v17 = vmul.f32 %v45_v10, %v38_v16 }
  0x81   :  { %v49_v18 = vsub.f32 %v476_v2, %v47_v17 }
  0x83   :  { %v51_v19 = vmul.f32 %v49_v18, %v49_v18 }
  0x85   :  { %v55_v20 = vsel %vm32_vm0, %v51_v19, 0.0 }
  0x86   :  { %56 = vadd.xlane.f32.xlu1 %v55_v20 }
  0xf1   :  { %v54_v22 = vpop.xlane.xlu1 %53 }
  0xf2   :  { %v58_v24 = vmul.f32 %v54_v22, %v45_v10  ;;  %v371_v22 = vld [vmem:[%s557_s5 + $0x8] sm:$0xff] }
  0xf3   :  { %295 = vmatpush.bf16.msra.mxu1 %v371_v22 }
  0xf4   :  { %v60_v25 = vadd.f32 1e-05, %v58_v24 }
  0xf6   :  { %388 = vrsqrt.f32 %v60_v25  ;;  %vm68_vm3 = vweird.f32 %v60_v25 }
  0xf9   :  { %v57_v26 = vpop.xlane.xlu1 %56 }
  0xfa   :  { %v59_v27 = vmul.f32 %v57_v26, %v45_v10 }
  0xfc   :  { %v389_v28 = vpop.eup %388  ;;  %v61_v29 = vadd.f32 1e-05, %v59_v27 }
  0xfd   :  { %v63_v30 = vmul.f32 %v389_v28, %v60_v25  ;;  %vm69_vm2 = vweird.f32 %v389_v28 }
  0xfe   :  { %390 = vrsqrt.f32 %v61_v29  ;;  %vm70_vm4 = vmor %vm68_vm3, %vm69_vm2  ;;  %vm78_vm6 = vweird.f32 %v61_v29 }
  0xff   :  { %v64_v31 = vmul.f32 %v389_v28, %v63_v30 }
 0x101   :  { %v65_v32 = vmul.f32 0.5, %v64_v31 }
 0x103   :  { %v66_v33 = vsub.f32 1.5, %v65_v32 }
 0x104   :  { %v391_v34 = vpop.eup %390 }
 0x105   :  { %v67_v35 = vmul.f32 %v389_v28, %v66_v33  ;;  %v73_v36 = vmul.f32 %v391_v34, %v61_v29  ;;  %vm79_vm5 = vweird.f32 %v391_v34  ;;  %v370_v29 = vld [vmem:[%s557_s5] sm:$0xff] }
 0x106   :  { %vm80_vm7 = vmor %vm78_vm6, %vm79_vm5  ;;  %296 = vmatpush.bf16.msra.mxu1 %v370_v29 }
 0x107   :  { %v74_v37 = vmul.f32 %v391_v34, %v73_v36  ;;  %v71_v38 = vsel %vm70_vm4, %v389_v28, %v67_v35 }
 0x108   :  { %v82_v41 = vmul.f32 %v71_v38, %v48_v13 }
 0x109   :  { %v75_v39 = vmul.f32 0.5, %v74_v37 }
 0x10a   :  { %v87_v46 = vmul.f32 %v382_v42, %v82_v41 }
 0x10b   :  { %v76_v40 = vsub.f32 1.5, %v75_v39 }
 0x10c   :  { %v92_v49 = vadd.f32 %v383_v47, %v87_v46 }
 0x10d   :  { %v77_v43 = vmul.f32 %v391_v34, %v76_v40 }
 0x10f   :  { %v81_v44 = vsel %vm80_vm7, %v391_v34, %v77_v43 }
 0x110   :  { %v83_v45 = vmul.f32 %v81_v44, %v49_v18 }
 0x112   :  { %v88_v48 = vmul.f32 %v382_v42, %v83_v45 }
 0x114   :  { %v93_v50 = vadd.f32 %v383_v47, %v88_v48 }
 0x116   :  { %v94_v51 = vpack.c.bf16 %v93_v50, %v92_v49 }
 0x118   :  { %333 = vmatmul.msk.bf16.vlgmr.msra.gmra.mxu0 %vm32_vm0, %v94_v51 }
 0x195   :  { %v127_v54 = vpop.f32.mrf.mxu0 }
 0x196   :  { %v503_v55 = vadd.f32 %v384_v52, %v127_v54 }
 0x198   :  { %v506_v56 = vmul.f32 0.70710677, %v503_v55 }
 0x19a   :  { %v136_v58 = vmul.f32 %v506_v56, %v506_v56 }
 0x19c   :  { %v137_v60 = vmin.f32 %v136_v58, 16.0 }
 0x19d   :  { %v129_v61 = vpop.f32.mrf.mxu0 }
 0x19e   :  { %v138_v62 = vmul.f32 2.1237322e-06, %v137_v60  ;;  %v516_v63 = vadd.f32 %v384_v52, %v129_v61  ;;  %v149_v3 = vmul.f32 3.8918573e-05, %v137_v60 }
 0x1a0   :  { %v139_v4 = vadd.f32 0.00028619796, %v138_v62  ;;  %v522_v5 = vmul.f32 0.70710677, %v516_v63  ;;  %v150_v6 = vadd.f32 0.001143296, %v149_v3 }
 0x1a2   :  { %v176_v7 = vmul.f32 %v522_v5, %v522_v5  ;;  %v140_v9 = vmul.f32 %v139_v4, %v137_v60  ;;  %v151_v10 = vmul.f32 %v150_v6, %v137_v60 }
 0x1a4   :  { %v177_v11 = vmin.f32 %v176_v7, 16.0  ;;  %v152_v12 = vadd.f32 0.014752088, %v151_v10  ;;  %v141_v16 = vadd.f32 0.0036580483, %v140_v9 }
 0x1a6   :  { %v178_v13 = vmul.f32 2.1237322e-06, %v177_v11  ;;  %v189_v15 = vmul.f32 3.8918573e-05, %v177_v11  ;;  %v153_v17 = vmul.f32 %v152_v12, %v137_v60  ;;  %v142_v24 = vmul.f32 %v141_v16, %v137_v60 }
 0x1a8   :  { %v179_v18 = vadd.f32 0.00028619796, %v178_v13  ;;  %v190_v19 = vadd.f32 0.001143296, %v189_v15  ;;  %v154_v20 = vadd.f32 0.112945676, %v153_v17 }
 0x1a9   :  { %v143_v31 = vadd.f32 0.05243302, %v142_v24  ;;  %v132_v17 = vmul.f32 0.5, %v503_v55 }
 0x1aa   :  { %v180_v21 = vmul.f32 %v179_v18, %v177_v11  ;;  %v191_v23 = vmul.f32 %v190_v19, %v177_v11  ;;  %v155_v25 = vmul.f32 %v154_v20, %v137_v60  ;;  %v133_v18 = vmul.f32 0.5, %v516_v63 }
 0x1ab   :  { %v144_v37 = vmul.f32 %v143_v31, %v137_v60 }
 0x1ac   :  { %v181_v26 = vadd.f32 0.0036580483, %v180_v21  ;;  %v192_v27 = vadd.f32 0.014752088, %v191_v23  ;;  %v156_v28 = vadd.f32 0.4994258, %v155_v25 }
 0x1ad   :  { %v145_v41 = vadd.f32 0.18741608, %v144_v37 }
 0x1ae   :  { %v193_v30 = vmul.f32 %v192_v27, %v177_v11  ;;  %v157_v32 = vmul.f32 %v156_v28, %v137_v60  ;;  %v182_v33 = vmul.f32 %v181_v26, %v177_v11 }
 0x1af   :  { %v146_v46 = vmul.f32 %v145_v41, %v137_v60 }
 0x1b0   :  { %v194_v34 = vadd.f32 0.112945676, %v193_v30  ;;  %v158_v35 = vadd.f32 1.0, %v157_v32  ;;  %v183_v38 = vadd.f32 0.05243302, %v182_v33 }
 0x1b1   :  { %v147_v52 = vadd.f32 1.1283791, %v146_v46 }
 0x1b2   :  { %v195_v36 = vmul.f32 %v194_v34, %v177_v11  ;;  %392 = vrcp.f32 %v158_v35  ;;  %v184_v42 = vmul.f32 %v183_v38, %v177_v11  ;;  %v170_v49 = vand.u32 2147483648, %v158_v35 }
 0x1b3   :  { %v168_v51 = vand.u32 2147483647, %v158_v35  ;;  %vm164_vm9 = vweird.f32 %v158_v35  ;;  %v148_v62 = vmul.f32 %v147_v52, %v506_v56 }
 0x1b4   :  { %v196_v39 = vadd.f32 0.4994258, %v195_v36  ;;  %v185_v47 = vadd.f32 0.18741608, %v184_v42  ;;  %v171_v58 = vor.u32 1.1754944e-38, %v170_v49 }
 0x1b5   :  { %vm169_vm11 = vcmp.eq.f32.partialorder %v168_v51, 8.507059e+37 }
 0x1b6   :  { %v197_v40 = vmul.f32 %v196_v39, %v177_v11  ;;  %v186_v54 = vmul.f32 %v185_v47, %v177_v11 }
 0x1b8   :  { %v198_v43 = vadd.f32 1.0, %v197_v40  ;;  %v393_v44 = vpop.eup %392  ;;  %v187_v3 = vadd.f32 1.1283791, %v186_v54 }
 0x1b9   :  { %v160_v45 = vmul.f32 %v393_v44, %v158_v35  ;;  %vm165_vm8 = vweird.f32 %v393_v44 }
 0x1ba   :  { %394 = vrcp.f32 %v198_v43  ;;  %vm166_vm10 = vmor %vm164_vm9, %vm165_vm8  ;;  %v210_v4 = vand.u32 2147483648, %v198_v43  ;;  %v208_v8 = vand.u32 2147483647, %v198_v43  ;;  %vm204_vm13 = vweird.f32 %v198_v43 }
 0x1bb   :  { %v161_v48 = vsub.f32 1.0, %v160_v45  ;;  %v188_v11 = vmul.f32 %v187_v3, %v522_v5  ;;  %v385_v5 = vld [vmem:[%s558_s6] ss:$0 sm:$0xff]  ;;  %s424_s6 = smov 128  }
 0x1bc   :  { %v211_v10 = vor.u32 1.1754944e-38, %v210_v4  ;;  %vm209_vm15 = vcmp.eq.f32.partialorder %v208_v8, 8.507059e+37 }
 0x1bd   :  { %v162_v50 = vmul.f32 %v393_v44, %v161_v48 }
 0x1bf   :  { %v163_v57 = vadd.f32 %v393_v44, %v162_v50 }
 0x1c0   :  { %v395_v53 = vpop.eup %394 }
 0x1c1   :  { %v200_v59 = vmul.f32 %v395_v53, %v198_v43  ;;  %v167_v61 = vsel %vm166_vm10, %v393_v44, %v163_v57  ;;  %vm205_vm12 = vweird.f32 %v395_v53 }
 0x1c2   :  { %v172_v1 = vsel %vm169_vm11, %v171_v58, %v167_v61  ;;  %vm206_vm14 = vmor %vm204_vm13, %vm205_vm12 }
 0x1c3   :  { %v201_v60 = vsub.f32 1.0, %v200_v59  ;;  %v173_v6 = vmul.f32 %v172_v1, %v148_v62 }
 0x1c5   :  { %v202_v7 = vmul.f32 %v395_v53, %v201_v60  ;;  %v334_v12 = vclamps-f32 %v173_v6, 1.0 }
 0x1c7   :  { %v203_v9 = vadd.f32 %v395_v53, %v202_v7  ;;  %v216_v16 = vadd.f32 1.0, %v334_v12 }
 0x1c9   :  { %v207_v13 = vsel %vm206_vm14, %v395_v53, %v203_v9  ;;  %v218_v20 = vmul.f32 %v216_v16, %v132_v17 }
 0x1ca   :  { %v212_v14 = vsel %vm209_vm15, %v211_v10, %v207_v13 }
 0x1cb   :  { %v213_v15 = vmul.f32 %v212_v14, %v188_v11 }
 0x1cd   :  { %v335_v56 = vclamps-f32 %v213_v15, 1.0 }
 0x1cf   :  { %v217_v19 = vadd.f32 1.0, %v335_v56 }
 0x1d1   :  { %v219_v21 = vmul.f32 %v217_v19, %v133_v18 }
 0x1d3   :  { %v220_v22 = vpack.c.bf16 %v219_v21, %v218_v20 }
 0x1d5   :  { %297 = vmatmul.bf16.vlgmr.msra.gmra.mxu1 %v220_v22 }
 0x252   :  { %v298_v23 = vpop.f32.mrf.mxu1 }
 0x253   :  { %v299_v24 = vadd.f32 %v385_v5, %v298_v23 }
 0x255   :  { %v303_v25 = vadd.f32 %v299_v24, %v469_v0 }
 0x257   :  { %305 = vst.msk [vmem:[#allocation2] sm:$0xff] %vm32_vm0, %v303_v25 }
 0x25a   :  { %v300_v55 = vpop.f32.mrf.mxu1 }
 0x25b   :  { %v301_v63 = vadd.f32 %v385_v5, %v300_v55 }
 0x25d   :  { %v304_v26 = vadd.f32 %v301_v63, %v476_v2 }
 0x25f   :  { %306 = vst.msk [vmem:[#allocation2 + $0x8] sm:$0xff] %vm32_vm0, %v304_v26 }
 0x260   :  { %319 = dma.vmem_to_hbm [thread:$0]  %s312_s0, 256, %s314_s30, [#allocation3], %s424_s6, %s424_s6, %s425_s3  }
 0x261   :  { %420 = dma.done.wait [#allocation3], 256  }
 0x262   :  { %421 = vsyncadd [#allocation3], 4294967040 }
 0x263   :  { %324 = vsyncpa [#allocation3], 1 }

// kernel: block_forward.4
= control target key start
LH: loop header
LB: loop body
LE: loop exit
PB: predicated region body
PF: predicated region fallthrough
CT: control target
= control target key end

     0   :  { %vm30_vm0 = vcmask 257024   ;;  %v1407_v8 = vmov 32.0   ;;  %vm172_vm14 = vcmask 261120   ;;  %vm205_vm15 = vcmask 64512   ;;  %s1410_s12 = smov 88   ;;  %s1411_s13 = smov 120   ;;  %s1775_s0 = inlined_call_operand.vmem [shape: f32[4,4,32], index: 0, kind: input, shape index: {}]   ;;  %s1776_s1 = inlined_call_operand.vmem [shape: f32[1,32], index: 1, kind: input, shape index: {}]   ;;  %s1777_s2 = inlined_call_operand.vmem [shape: f32[1,32], index: 2, kind: input, shape index: {}]   ;;  %s1778_s3 = inlined_call_operand.vmem [shape: bf16[32,96], index: 3, kind: input, shape index: {}]   ;;  %s1779_s5 = inlined_call_operand.vmem [shape: f32[1,32], index: 5, kind: input, shape index: {}]   ;;  %s1780_s4 = inlined_call_operand.vmem [shape: bf16[32,32], index: 4, kind: input, shape index: {}]   ;;  %s1781_s6 = inlined_call_operand.vmem [shape: f32[4,4,32], index: 6, kind: output, shape index: {}]  }
   0x1   :  { %v26_v0 = vld [vmem:[%s1775_s0 + $0x8] sm:$0xf]  ;;  %v24_v1 = vld [vmem:[%s1775_s0] sm:$0xf]  ;;  %v27_v4 = vld [vmem:[%s1775_s0 + $0xc] sm:$0xf]  ;;  %1329 = vrcp.f32 %v1407_v8 }
   0x2   :  { %v37_v2 = vsel %vm30_vm0, %v26_v0, 0.0  ;;  %v31_v3 = vsel %vm30_vm0, %v24_v1, 0.0  ;;  %v25_v5 = vld [vmem:[%s1775_s0 + $0x4] sm:$0xf]  ;;  %v40_v6 = vsel %vm30_vm0, %v27_v4, 0.0  ;;  %v1308_v41 = vld [vmem:[%s1778_s3 + $0x8] sm:$0xff] }
   0x3   :  { %38 = vadd.xlane.f32.xlu1 %v37_v2  ;;  %32 = vadd.xlane.f32.xlu0 %v31_v3  ;;  %v34_v7 = vsel %vm30_vm0, %v25_v5, 0.0  ;;  %v1307_v44 = vld [vmem:[%s1778_s3] sm:$0xff]  ;;  %s1412_s14 = smov 56   ;;  %s1413_s15 = smov 80  }
   0x4   :  { %182 = vmatpush.bf16.msra.mxu0 %v1308_v41  ;;  %v1326_v63 = vld [vmem:[%s1776_s1] ss:$0 sm:$0xff]  ;;  %s1408_s1 = smov 96   ;;  %s1414_s16 = smov 112  }
   0x5   :  { %s1415_s17 = smov 48   ;;  %s1416_s18 = smov 72  }
   0x6   :  { %s1417_s19 = smov 104   ;;  %s1418_s20 = smov 40  }
   0x7   :  { %v1330_v9 = vpop.eup %1329  ;;  %s1419_s21 = smov 8   ;;  %s1420_s22 = smov 16  }
   0x8   :  { %v44_v10 = vmul.f32 32.0, %v1330_v9  ;;  %vm48_vm1 = vweird.f32 %v1330_v9  ;;  %183 = vmatpush.bf16.msra.mxu0 %v1307_v44  ;;  %s1421_s23 = smov 24  }
   0xa   :  { %v45_v11 = vsub.f32 1.0, %v44_v10 }
   0xb   :  { %41 = vadd.xlane.f32.xlu1 %v40_v6  ;;  %35 = vadd.xlane.f32.xlu0 %v34_v7 }
   0xc   :  { %v46_v12 = vmul.f32 %v1330_v9, %v45_v11 }
   0xe   :  { %v47_v13 = vadd.f32 %v1330_v9, %v46_v12 }
  0x10   :  { %v49_v14 = vsel %vm48_vm1, %v1330_v9, %v47_v13  ;;  %vm356_vm1 = vcmask 1041408  }
  0x76   :  { %v39_v15 = vpop.xlane.xlu1 %38  ;;  %v33_v16 = vpop.xlane.xlu0 %32 }
  0x77   :  { %v52_v17 = vmul.f32 %v49_v14, %v39_v15  ;;  %v50_v18 = vmul.f32 %v49_v14, %v33_v16 }
  0x79   :  { %v1473_v19 = vsub.f32 %v26_v0, %v52_v17  ;;  %v1475_v20 = vsub.f32 %v24_v1, %v50_v18 }
  0x7b   :  { %v60_v21 = vmul.f32 %v1473_v19, %v1473_v19  ;;  %v58_v22 = vmul.f32 %v1475_v20, %v1475_v20 }
  0x7d   :  { %v68_v23 = vsel %vm30_vm0, %v60_v21, 0.0  ;;  %v62_v24 = vsel %vm30_vm0, %v58_v22, 0.0 }
  0x7e   :  { %v42_v25 = vpop.xlane.xlu1 %41  ;;  %69 = vadd.xlane.f32.xlu0 %v68_v23  ;;  %63 = vadd.xlane.f32.xlu2 %v62_v24  ;;  %v36_v26 = vpop.xlane.xlu0 %35 }
  0x7f   :  { %v53_v27 = vmul.f32 %v49_v14, %v42_v25  ;;  %v51_v28 = vmul.f32 %v49_v14, %v36_v26 }
  0x81   :  { %v1483_v29 = vsub.f32 %v27_v4, %v53_v27  ;;  %v1485_v30 = vsub.f32 %v25_v5, %v51_v28  ;;  %v1327_v4 = vld [vmem:[%s1777_s2] ss:$0 sm:$0xff]  ;;  %s1409_s2 = smov 64  }
  0x83   :  { %v61_v31 = vmul.f32 %v1483_v29, %v1483_v29  ;;  %v59_v32 = vmul.f32 %v1485_v30, %v1485_v30 }
  0x85   :  { %v71_v33 = vsel %vm30_vm0, %v61_v31, 0.0  ;;  %v65_v34 = vsel %vm30_vm0, %v59_v32, 0.0 }
  0x86   :  { %72 = vadd.xlane.f32.xlu1 %v71_v33  ;;  %66 = vadd.xlane.f32.xlu2 %v65_v34 }
  0xf1   :  { %v64_v35 = vpop.xlane.xlu2 %63  ;;  %v70_v36 = vpop.xlane.xlu0 %69 }
  0xf2   :  { %v74_v37 = vmul.f32 %v64_v35, %v49_v14  ;;  %v76_v38 = vmul.f32 %v70_v36, %v49_v14 }
  0xf4   :  { %v78_v39 = vadd.f32 1e-05, %v74_v37  ;;  %v80_v40 = vadd.f32 1e-05, %v76_v38 }
  0xf6   :  { %1331 = vrsqrt.f32 %v78_v39  ;;  %vm88_vm4 = vweird.f32 %v78_v39  ;;  %vm108_vm6 = vweird.f32 %v80_v40 }
  0xf7   :  { %1333 = vrsqrt.f32 %v80_v40 }
  0xf9   :  { %v73_v42 = vpop.xlane.xlu1 %72  ;;  %v67_v43 = vpop.xlane.xlu2 %66 }
  0xfa   :  { %v77_v45 = vmul.f32 %v73_v42, %v49_v14  ;;  %v75_v46 = vmul.f32 %v67_v43, %v49_v14 }
  0xfc   :  { %v1332_v47 = vpop.eup %1331  ;;  %v81_v48 = vadd.f32 1e-05, %v77_v45  ;;  %v79_v49 = vadd.f32 1e-05, %v75_v46 }
  0xfd   :  { %v1334_v50 = vpop.eup %1333  ;;  %v83_v51 = vmul.f32 %v1332_v47, %v78_v39  ;;  %vm89_vm2 = vweird.f32 %v1332_v47 }
  0xfe   :  { %v103_v52 = vmul.f32 %v1334_v50, %v80_v40  ;;  %1335 = vrsqrt.f32 %v81_v48  ;;  %vm109_vm3 = vweird.f32 %v1334_v50  ;;  %vm90_vm5 = vmor %vm88_vm4, %vm89_vm2  ;;  %vm118_vm10 = vweird.f32 %v81_v48 }
  0xff   :  { %v84_v53 = vmul.f32 %v1332_v47, %v83_v51  ;;  %1337 = vrsqrt.f32 %v79_v49  ;;  %vm110_vm7 = vmor %vm108_vm6, %vm109_vm3  ;;  %vm98_vm12 = vweird.f32 %v79_v49  ;;  %vm301_vm2 = vcmask 27648  }
 0x100   :  { %v104_v54 = vmul.f32 %v1334_v50, %v103_v52  ;;  %vm352_vm3 = vcmask 31744   ;;  %vm1177_vm4 = vcmask 195584  }
 0x101   :  { %v85_v55 = vmul.f32 0.5, %v84_v53 }
 0x102   :  { %v105_v56 = vmul.f32 0.5, %v104_v54 }
 0x103   :  { %v86_v57 = vsub.f32 1.5, %v85_v55 }
 0x104   :  { %v1336_v58 = vpop.eup %1335  ;;  %v106_v59 = vsub.f32 1.5, %v105_v56 }
 0x105   :  { %v1338_v60 = vpop.eup %1337  ;;  %v87_v61 = vmul.f32 %v1332_v47, %v86_v57  ;;  %v113_v62 = vmul.f32 %v1336_v58, %v81_v48  ;;  %vm119_vm8 = vweird.f32 %v1336_v58 }
 0x106   :  { %v107_v0 = vmul.f32 %v1334_v50, %v106_v59  ;;  %v93_v1 = vmul.f32 %v1338_v60, %v79_v49  ;;  %vm99_vm9 = vweird.f32 %v1338_v60  ;;  %vm120_vm11 = vmor %vm118_vm10, %vm119_vm8 }
 0x107   :  { %v91_v2 = vsel %vm90_vm5, %v1332_v47, %v87_v61  ;;  %v114_v3 = vmul.f32 %v1336_v58, %v113_v62  ;;  %vm100_vm13 = vmor %vm98_vm12, %vm99_vm9  ;;  %vm1172_vm5 = vcmask 130048  }
 0x108   :  { %v122_v5 = vmul.f32 %v91_v2, %v1475_v20  ;;  %v111_v6 = vsel %vm110_vm7, %v1334_v50, %v107_v0  ;;  %v94_v7 = vmul.f32 %v1338_v60, %v93_v1 }
 0x109   :  { %v124_v8 = vmul.f32 %v111_v6, %v1473_v19  ;;  %v115_v9 = vmul.f32 0.5, %v114_v3 }
 0x10a   :  { %v129_v10 = vmul.f32 %v1326_v63, %v122_v5  ;;  %v95_v11 = vmul.f32 0.5, %v94_v7 }
 0x10b   :  { %v131_v12 = vmul.f32 %v1326_v63, %v124_v8  ;;  %v116_v13 = vsub.f32 1.5, %v115_v9 }
 0x10c   :  { %v136_v14 = vadd.f32 %v1327_v4, %v129_v10  ;;  %v96_v15 = vsub.f32 1.5, %v95_v11 }
 0x10d   :  { %v138_v16 = vadd.f32 %v1327_v4, %v131_v12  ;;  %v117_v17 = vmul.f32 %v1336_v58, %v116_v13 }
 0x10e   :  { %144 = vst [vmem:[#allocation1] ss:$2 sm:$0xff] %v136_v14  ;;  %v97_v18 = vmul.f32 %v1338_v60, %v96_v15 }
 0x10f   :  { %148 = vst [vmem:[#allocation1 + $0x10] ss:$2 sm:$0xff] %v138_v16  ;;  %v121_v20 = vsel %vm120_vm11, %v1336_v58, %v117_v17 }
 0x110   :  { %v125_v19 = vmul.f32 %v121_v20, %v1483_v29  ;;  %v101_v21 = vsel %vm100_vm13, %v1338_v60, %v97_v18 }
 0x111   :  { %v123_v22 = vmul.f32 %v101_v21, %v1485_v30 }
 0x112   :  { %v132_v23 = vmul.f32 %v1326_v63, %v125_v19 }
 0x113   :  { %v130_v24 = vmul.f32 %v1326_v63, %v123_v22 }
 0x114   :  { %v139_v25 = vadd.f32 %v1327_v4, %v132_v23 }
 0x115   :  { %v137_v26 = vadd.f32 %v1327_v4, %v130_v24 }
 0x116   :  { %150 = vst [vmem:[#allocation1 + $0x11] ss:$2 sm:$0xff] %v139_v25 }
 0x117   :  { %146 = vst [vmem:[#allocation1 + $0x1] ss:$2 sm:$0xff] %v137_v26 }
 0x11d   :  { %v152_v27 = vld.sshfl [vmem:[#allocation1 + $0x10] sm:$0xff pattern:$0x75316420] }
 0x11e   :  { %v151_v28 = vld.sshfl [vmem:[#allocation1] sm:$0xff pattern:$0x75316420] }
 0x11f   :  { %v155_v31 = vpack.c.bf16 %v152_v27, %v151_v28 }
 0x121   :  { %1265 = vmatmul.msk.bf16.vlgmr.msra.gmra.mxu0 %vm172_vm14, %v155_v31 }
 0x19e   :  { %v185_v32 = vpop.f32.mrf.mxu0 }
 0x19f   :  { %v192_v33 = vrot.slane %v185_v32, 4  ;;  %v196_v34 = vpack.c.bf16 %v185_v32, %v185_v32 }
 0x1a1   :  { %v197_v35 = vpack.c.bf16 %v192_v33, %v192_v33  ;;  %v201_v29 = vunpack.c.l.b16 %v196_v34 }
 0x1a3   :  { %v1510_v36 = vpack.c.b16 %v201_v29, %v201_v29  ;;  %v226_v30 = vunpack.c.l.b16 %v197_v35 }
 0x1a5   :  { %v1512_v37 = vpack.c.b16 %v226_v30, %v226_v30  ;;  %203 = vrot.lane.b32.xlu1 %v1510_v36, %s1408_s1 }
 0x1a6   :  { %v187_v38 = vpop.f32.mrf.mxu0 }
 0x1a7   :  { %v193_v39 = vrot.slane %v187_v38, 4  ;;  %v198_v40 = vpack.c.bf16 %v187_v38, %v187_v38  ;;  %228 = vrot.lane.b32.xlu2 %v1512_v37, %s1408_s1 }
 0x1a9   :  { %v199_v41 = vpack.c.bf16 %v193_v39, %v193_v39  ;;  %v250_v42 = vunpack.c.l.b16 %v198_v40 }
 0x1ab   :  { %v1516_v43 = vpack.c.b16 %v250_v42, %v250_v42  ;;  %v274_v44 = vunpack.c.l.b16 %v199_v41 }
 0x1ad   :  { %v1518_v45 = vpack.c.b16 %v274_v44, %v274_v44  ;;  %252 = vrot.lane.b32.xlu0 %v1516_v43, %s1408_s1 }
 0x1af   :  { %276 = vrot.lane.b32.xlu2 %v1518_v45, %s1408_s1 }
 0x1b5   :  { %373 = vrot.lane.b32.xlu0 %v1512_v37, %s1409_s2 }
 0x201   :  { %v229_v46 = vpop.permute.xlu2 %228 }
 0x202   :  { %v234_v47 = vsel %vm205_vm15, %v229_v46, 0 }
 0x203   :  { %243 = vmatpush.bf16.xpose.msra.mxu2 %v234_v47 }
 0x209   :  { %v277_v48 = vpop.permute.xlu2 %276 }
 0x20a   :  { %1267 = vmatmul.msk.bf16.vlgmr.msra.gmra.mxu2 %vm205_vm15, %v197_v35  ;;  %v282_v49 = vsel %vm205_vm15, %v277_v48, 0 }
 0x20b   :  { %291 = vmatpush.bf16.xpose.msrb.mxu0 %v282_v49 }
 0x212   :  { %1269 = vmatmul.msk.bf16.vlgmr.msrb.gmra.mxu0 %vm205_vm15, %v199_v41 }
 0x217   :  { %v204_v50 = vpop.permute.xlu1 %203 }
 0x218   :  { %v210_v51 = vsel %vm205_vm15, %v204_v50, 0 }
 0x219   :  { %219 = vmatpush.bf16.xpose.msra.mxu1 %v210_v51 }
 0x21f   :  { %v253_v52 = vpop.permute.xlu0 %252 }
 0x220   :  { %1266 = vmatmul.msk.bf16.vlgmr.msra.gmra.mxu1 %vm205_vm15, %v196_v34  ;;  %v258_v53 = vsel %vm205_vm15, %v253_v52, 0 }
 0x221   :  { %267 = vmatpush.bf16.xpose.msra.mxu3 %v258_v53 }
 0x227   :  { %v374_v54 = vpop.permute.xlu0 %373 }
 0x228   :  { %1268 = vmatmul.msk.bf16.vlgmr.msra.gmra.mxu3 %vm205_vm15, %v198_v40  ;;  %v379_v55 = vsel %vm356_vm1, %v374_v54, 0 }
 0x229   :  { %388 = vmatpush.bf16.msrb.mxu2 %v379_v55 }
 0x28d   :  { %v245_v56 = vpop.f32.mrf.mxu2 }
 0x28e   :  { %v298_v57 = vmul.f32 0.35355338, %v245_v56 }
 0x28f   :  { %v293_v58 = vpop.f32.mrf.mxu0 }
 0x290   :  { %v305_v59 = vsel %vm301_vm2, %v298_v57, -inf  ;;  %v300_v60 = vmul.f32 0.35355338, %v293_v58 }
 0x291   :  { %306 = vmax.xlane.f32.xlu0 %v305_v59 }
 0x292   :  { %v311_v63 = vsel %vm301_vm2, %v300_v60, -inf }
 0x295   :  { %v247_v61 = vpop.f32.mrf.mxu2 }
 0x297   :  { %v295_v62 = vpop.f32.mrf.mxu0 }
 0x299   :  { %312 = vmax.xlane.f32.xlu0 %v311_v63 }
 0x29d   :  { %v221_v0 = vpop.f32.mrf.mxu1 }
 0x29e   :  { %v297_v1 = vmul.f32 0.35355338, %v221_v0 }
 0x2a0   :  { %v302_v2 = vsel %vm301_vm2, %v297_v1, -inf }
 0x2a1   :  { %303 = vmax.xlane.f32.xlu1 %v302_v2 }
 0x2a5   :  { %v223_v3 = vpop.f32.mrf.mxu1 }
 0x2ab   :  { %v269_v4 = vpop.f32.mrf.mxu3 }
 0x2ac   :  { %v299_v5 = vmul.f32 0.35355338, %v269_v4 }
 0x2ad   :  { %484 = vrot.lane.b32.xlu0 %v1516_v43, %s1410_s12 }
 0x2ae   :  { %v308_v6 = vsel %vm301_vm2, %v299_v5, -inf }
 0x2af   :  { %309 = vmax.xlane.f32.xlu2 %v308_v6 }
 0x2b3   :  { %v271_v7 = vpop.f32.mrf.mxu3 }
 0x2ba   :  { %461 = vrot.lane.b32.xlu1 %v1512_v37, %s1410_s12 }
 0x2c2   :  { %459 = vrot.lane.b32.xlu1 %v1512_v37, %s1411_s13 }
 0x2c7   :  { %394 = vrot.lane.b32.xlu2 %v1516_v43, %s1409_s2 }
 0x2ca   :  { %482 = vrot.lane.b32.xlu1 %v1516_v43, %s1411_s13 }
 0x2d2   :  { %350 = vrot.lane.b32.xlu1 %v1510_v36, %s1409_s2 }
 0x304   :  { %v307_v8 = vpop.xlane.xlu0 %306 }
 0x305   :  { %v315_v9 = vsub.f32 %v298_v57, %v307_v8 }
 0x307   :  { %v320_v10 = vmul.f32 1.442695, %v315_v9 }
 0x309   :  { %1339 = vpow2.f32 %v320_v10 }
 0x30c   :  { %v313_v11 = vpop.xlane.xlu0 %312 }
 0x30d   :  { %v317_v12 = vsub.f32 %v300_v60, %v313_v11 }
 0x30f   :  { %v1340_v13 = vpop.eup %1339  ;;  %v324_v14 = vmul.f32 1.442695, %v317_v12 }
 0x310   :  { %v329_v15 = vsel %vm301_vm2, %v1340_v13, 0.0 }
 0x311   :  { %1341 = vpow2.f32 %v324_v14  ;;  %330 = vadd.xlane.f32.xlu2 %v329_v15 }
 0x314   :  { %v304_v16 = vpop.xlane.xlu1 %303 }
 0x315   :  { %v314_v17 = vsub.f32 %v297_v1, %v304_v16 }
 0x317   :  { %v1342_v18 = vpop.eup %1341  ;;  %v318_v20 = vmul.f32 1.442695, %v314_v17 }
 0x318   :  { %v335_v19 = vsel %vm301_vm2, %v1342_v18, 0.0 }
 0x319   :  { %1343 = vpow2.f32 %v318_v20  ;;  %336 = vadd.xlane.f32.xlu0 %v335_v19 }
 0x31f   :  { %v1344_v21 = vpop.eup %1343  ;;  %v485_v26 = vpop.permute.xlu0 %484 }
 0x320   :  { %v326_v22 = vsel %vm301_vm2, %v1344_v21, 0.0  ;;  %v490_v31 = vsel %vm205_vm15, %v485_v26, 0 }
 0x321   :  { %327 = vadd.xlane.f32.xlu2 %v326_v22 }
 0x322   :  { %v310_v23 = vpop.xlane.xlu2 %309 }
 0x323   :  { %v316_v24 = vsub.f32 %v299_v5, %v310_v23 }
 0x325   :  { %v322_v25 = vmul.f32 1.442695, %v316_v24 }
 0x327   :  { %1345 = vpow2.f32 %v322_v25 }
 0x32a   :  { %v395_v27 = vpop.permute.xlu2 %394 }
 0x32b   :  { %v400_v28 = vsel %vm356_vm1, %v395_v27, 0 }
 0x32c   :  { %v462_v32 = vpop.permute.xlu1 %461  ;;  %409 = vmatpush.bf16.msrb.mxu3 %v400_v28 }
 0x32d   :  { %v1346_v33 = vpop.eup %1345  ;;  %v467_v34 = vsel %vm205_vm15, %v462_v32, 0  ;;  %436 = vrot.lane.b32.xlu0 %v1510_v36, %s1411_s13 }
 0x32e   :  { %476 = vmatpush.bf16.xpose.msra.mxu2 %v467_v34  ;;  %v332_v35 = vsel %vm301_vm2, %v1346_v33, 0.0 }
 0x32f   :  { %333 = vadd.xlane.f32.xlu1 %v332_v35 }
 0x330   :  { %499 = vmatpush.bf16.xpose.msra.mxu3 %v490_v31 }
 0x334   :  { %v460_v29 = vpop.permute.xlu1 %459 }
 0x339   :  { %507 = vrot.lane.b32.xlu2 %v1518_v45, %s1410_s12 }
 0x33c   :  { %v483_v30 = vpop.permute.xlu1 %482 }
 0x344   :  { %v351_v38 = vpop.permute.xlu1 %350 }
 0x345   :  { %v358_v39 = vsel %vm356_vm1, %v351_v38, 0 }
 0x346   :  { %367 = vmatpush.bf16.msrb.mxu1 %v358_v39 }
 0x348   :  { %415 = vrot.lane.b32.xlu1 %v1518_v45, %s1409_s2 }
 0x350   :  { %438 = vrot.lane.b32.xlu1 %v1510_v36, %s1410_s12 }
 0x358   :  { %505 = vrot.lane.b32.xlu1 %v1518_v45, %s1411_s13 }
 0x360   :  { %622 = vrot.lane.b32.xlu1 %v1516_v43, %s1412_s14 }
 0x384   :  { %v331_v40 = vpop.xlane.xlu2 %330 }
 0x385   :  { %1347 = vrcp.f32 %v331_v40 }
 0x38b   :  { %v1348_v41 = vpop.eup %1347 }
 0x38c   :  { %v343_v42 = vmul.f32 %v1348_v41, %v1340_v13  ;;  %v337_v54 = vpop.xlane.xlu0 %336 }
 0x38e   :  { %v347_v44 = vpack.c.bf16 %v343_v42, %v343_v42 }
 0x390   :  { %1271 = vmatmul.msk.bf16.vlgmr.msrb.gmra.mxu2 %vm352_vm3, %v347_v44 }
 0x394   :  { %v328_v46 = vpop.xlane.xlu2 %327 }
 0x395   :  { %1349 = vrcp.f32 %v328_v46 }
 0x39b   :  { %v1350_v47 = vpop.eup %1349 }
 0x39c   :  { %v342_v48 = vmul.f32 %v1350_v47, %v1344_v21  ;;  %v508_v57 = vpop.permute.xlu2 %507 }
 0x39d   :  { %v513_v60 = vsel %vm205_vm15, %v508_v57, 0 }
 0x39e   :  { %v346_v49 = vpack.c.bf16 %v342_v48, %v342_v48 }
 0x39f   :  { %v437_v0 = vpop.permute.xlu0 %436 }
 0x3a0   :  { %1270 = vmatmul.msk.bf16.vlgmr.msrb.gmra.mxu1 %vm352_vm3, %v346_v49  ;;  %1275 = vmatmul.msk.bf16.vlgmr.msra.gmra.mxu2 %vm205_vm15, %v460_v29 }
 0x3a2   :  { %v334_v50 = vpop.xlane.xlu1 %333 }
 0x3a3   :  { %1351 = vrcp.f32 %v334_v50 }
 0x3a4   :  { %1353 = vrcp.f32 %v337_v54 }
 0x3a9   :  { %v1352_v51 = vpop.eup %1351 }
 0x3aa   :  { %v344_v52 = vmul.f32 %v1352_v51, %v1346_v33  ;;  %v1354_v55 = vpop.eup %1353 }
 0x3ab   :  { %v345_v56 = vmul.f32 %v1354_v55, %v1342_v18 }
 0x3ac   :  { %v348_v53 = vpack.c.bf16 %v344_v52, %v344_v52 }
 0x3ad   :  { %v349_v61 = vpack.c.bf16 %v345_v56, %v345_v56 }
 0x3ae   :  { %1272 = vmatmul.msk.bf16.vlgmr.msrb.gmra.mxu3 %vm352_vm3, %v348_v53 }
 0x3ba   :  { %v416_v58 = vpop.permute.xlu1 %415 }
 0x3bb   :  { %v421_v59 = vsel %vm356_vm1, %v416_v58, 0 }
 0x3bc   :  { %430 = vmatpush.bf16.msra.mxu0 %v421_v59 }
 0x3be   :  { %1276 = vmatmul.msk.bf16.vlgmr.msra.gmra.mxu3 %vm205_vm15, %v483_v30 }
 0x3bf   :  { %1273 = vmatmul.msk.bf16.vlgmr.msra.gmra.mxu0 %vm352_vm3, %v349_v61 }
 0x3c0   :  { %522 = vmatpush.bf16.xpose.msrb.mxu0 %v513_v60 }
 0x3c2   :  { %v439_v62 = vpop.permute.xlu1 %438 }
 0x3c3   :  { %v444_v63 = vsel %vm205_vm15, %v439_v62, 0 }
 0x3c4   :  { %453 = vmatpush.bf16.xpose.msra.mxu1 %v444_v63 }
 0x3ca   :  { %v506_v1 = vpop.permute.xlu1 %505 }
 0x3cb   :  { %1274 = vmatmul.msk.bf16.vlgmr.msra.gmra.mxu1 %vm205_vm15, %v437_v0 }
 0x3cf   :  { %1277 = vmatmul.msk.bf16.vlgmr.msrb.gmra.mxu0 %vm205_vm15, %v506_v1 }
 0x3d2   :  { %v623_v2 = vpop.permute.xlu1 %622 }
 0x3d3   :  { %v628_v3 = vsel %vm356_vm1, %v623_v2, 0 }
 0x3d4   :  { %637 = vmatpush.bf16.msrb.mxu3 %v628_v3 }
 0x413   :  { %v1581_v4 = vpop.f32.mrf.mxu2 }
 0x41b   :  { %v392_v5 = vpop.f32.mrf.mxu2 }
 0x41d   :  { %v1583_v6 = vpop.f32.mrf.mxu1 }
 0x423   :  { %v478_v7 = vpop.f32.mrf.mxu2 }
 0x424   :  { %v529_v25 = vmul.f32 0.35355338, %v478_v7 }
 0x425   :  { %v371_v8 = vpop.f32.mrf.mxu1 }
 0x426   :  { %v535_v27 = vsel %vm301_vm2, %v529_v25, -inf }
 0x42b   :  { %v480_v9 = vpop.f32.mrf.mxu2 }
 0x431   :  { %v1585_v10 = vpop.f32.mrf.mxu3 }
 0x439   :  { %v413_v11 = vpop.f32.mrf.mxu3 }
 0x43c   :  { %v1587_v12 = vpop.f32.mrf.mxu0 }
 0x441   :  { %v501_v13 = vpop.f32.mrf.mxu3 }
 0x442   :  { %v530_v14 = vmul.f32 0.35355338, %v501_v13 }
 0x444   :  { %v434_v15 = vpop.f32.mrf.mxu0  ;;  %v538_v16 = vsel %vm301_vm2, %v530_v14, -inf }
 0x445   :  { %539 = vmax.xlane.f32.xlu0 %v538_v16 }
 0x448   :  { %v455_v17 = vpop.f32.mrf.mxu1 }
 0x449   :  { %v528_v18 = vmul.f32 0.35355338, %v455_v17  ;;  %v503_v20 = vpop.f32.mrf.mxu3 }
 0x44b   :  { %v532_v19 = vsel %vm301_vm2, %v528_v18, -inf }
 0x44c   :  { %533 = vmax.xlane.f32.xlu2 %v532_v19  ;;  %v524_v21 = vpop.f32.mrf.mxu0 }
 0x44d   :  { %v531_v22 = vmul.f32 0.35355338, %v524_v21 }
 0x44f   :  { %v541_v23 = vsel %vm301_vm2, %v531_v22, -inf }
 0x450   :  { %v457_v24 = vpop.f32.mrf.mxu1  ;;  %542 = vmax.xlane.f32.xlu1 %v541_v23 }
 0x454   :  { %v526_v26 = vpop.f32.mrf.mxu0 }
 0x458   :  { %536 = vmax.xlane.f32.xlu1 %v535_v27 }
 0x459   :  { %689 = vrot.lane.b32.xlu0 %v1512_v37, %s1413_s15 }
 0x464   :  { %601 = vrot.lane.b32.xlu2 %v1512_v37, %s1412_s14 }
 0x46c   :  { %712 = vrot.lane.b32.xlu2 %v1516_v43, %s1413_s15 }
 0x471   :  { %580 = vrot.lane.b32.xlu1 %v1510_v36, %s1412_s14 }
 0x474   :  { %643 = vrot.lane.b32.xlu2 %v1518_v45, %s1412_s14 }
 0x479   :  { %687 = vrot.lane.b32.xlu1 %v1512_v37, %s1414_s16 }
 0x47c   :  { %710 = vrot.lane.b32.xlu2 %v1516_v43, %s1414_s16 }
 0x484   :  { %664 = vrot.lane.b32.xlu2 %v1510_v36, %s1414_s16 }
 0x48c   :  { %850 = vrot.lane.b32.xlu2 %v1516_v43, %s1415_s17 }
 0x494   :  { %917 = vrot.lane.b32.xlu2 %v1512_v37, %s1416_s18 }
 0x4b8   :  { %v540_v33 = vpop.xlane.xlu0 %539 }
 0x4b9   :  { %v546_v40 = vsub.f32 %v530_v14, %v540_v33 }
 0x4bb   :  { %v552_v48 = vmul.f32 1.442695, %v546_v40 }
 0x4bf   :  { %v534_v28 = vpop.xlane.xlu2 %533 }
 0x4c0   :  { %v544_v31 = vsub.f32 %v528_v18, %v534_v28 }
 0x4c2   :  { %v548_v32 = vmul.f32 1.442695, %v544_v31 }
 0x4c3   :  { %v543_v34 = vpop.xlane.xlu1 %542 }
 0x4c4   :  { %1355 = vpow2.f32 %v548_v32  ;;  %v547_v35 = vsub.f32 %v531_v22, %v543_v34 }
 0x4c6   :  { %v554_v29 = vmul.f32 1.442695, %v547_v35 }
 0x4c7   :  { %v602_v30 = vpop.permute.xlu2 %601 }
 0x4c8   :  { %v607_v38 = vsel %vm356_vm1, %v602_v30, 0  ;;  %1357 = vpow2.f32 %v554_v29 }
 0x4c9   :  { %616 = vmatpush.bf16.msrb.mxu2 %v607_v38 }
 0x4ca   :  { %v1356_v39 = vpop.eup %1355 }
 0x4cb   :  { %v690_v41 = vpop.permute.xlu0 %689  ;;  %v537_v42 = vpop.xlane.xlu1 %536  ;;  %v556_v44 = vsel %vm301_vm2, %v1356_v39, 0.0 }
 0x4cc   :  { %v695_v46 = vsel %vm205_vm15, %v690_v41, 0  ;;  %v545_v47 = vsub.f32 %v529_v25, %v537_v42  ;;  %557 = vadd.xlane.f32.xlu0 %v556_v44 }
 0x4cd   :  { %704 = vmatpush.bf16.xpose.msra.mxu2 %v695_v46 }
 0x4ce   :  { %v550_v49 = vmul.f32 1.442695, %v545_v47  ;;  %v1358_v51 = vpop.eup %1357 }
 0x4cf   :  { %v713_v50 = vpop.permute.xlu2 %712  ;;  %v565_v53 = vsel %vm301_vm2, %v1358_v51, 0.0 }
 0x4d0   :  { %1359 = vpow2.f32 %v550_v49  ;;  %v718_v52 = vsel %vm205_vm15, %v713_v50, 0 }
 0x4d1   :  { %727 = vmatpush.bf16.xpose.msra.mxu3 %v718_v52  ;;  %1361 = vpow2.f32 %v552_v48 }
 0x4d4   :  { %566 = vadd.xlane.f32.xlu0 %v565_v53 }
 0x4d6   :  { %v1360_v54 = vpop.eup %1359 }
 0x4d7   :  { %v644_v55 = vpop.permute.xlu2 %643  ;;  %v559_v56 = vsel %vm301_vm2, %v1360_v54, 0.0  ;;  %v1362_v57 = vpop.eup %1361 }
 0x4d8   :  { %v649_v58 = vsel %vm356_vm1, %v644_v55, 0  ;;  %560 = vadd.xlane.f32.xlu1 %v559_v56  ;;  %v562_v59 = vsel %vm301_vm2, %v1362_v57, 0.0 }
 0x4d9   :  { %658 = vmatpush.bf16.msra.mxu0 %v649_v58 }
 0x4dc   :  { %563 = vadd.xlane.f32.xlu0 %v562_v59 }
 0x4df   :  { %v711_v0 = vpop.permute.xlu2 %710 }
 0x4e3   :  { %v581_v60 = vpop.permute.xlu1 %580 }
 0x4e4   :  { %v586_v61 = vsel %vm356_vm1, %v581_v60, 0 }
 0x4e5   :  { %595 = vmatpush.bf16.msrb.mxu1 %v586_v61 }
 0x4e7   :  { %v665_v9 = vpop.permute.xlu2 %664 }
 0x4eb   :  { %v688_v63 = vpop.permute.xlu1 %687 }
 0x4ef   :  { %v851_v19 = vpop.permute.xlu2 %850 }
 0x4f0   :  { %666 = vrot.lane.b32.xlu0 %v1510_v36, %s1413_s15  ;;  %v856_v22 = vsel %vm356_vm1, %v851_v19, 0 }
 0x4f1   :  { %735 = vrot.lane.b32.xlu1 %v1518_v45, %s1413_s15 }
 0x4f7   :  { %v918_v58 = vpop.permute.xlu2 %917 }
 0x4f8   :  { %733 = vrot.lane.b32.xlu0 %v1518_v45, %s1414_s16 }
 0x53f   :  { %v558_v62 = vpop.xlane.xlu0 %557 }
 0x540   :  { %1363 = vrcp.f32 %v558_v62 }
 0x546   :  { %v1364_v1 = vpop.eup %1363 }
 0x547   :  { %v572_v2 = vmul.f32 %v1364_v1, %v1356_v39  ;;  %v567_v3 = vpop.xlane.xlu0 %566 }
 0x548   :  { %1365 = vrcp.f32 %v567_v3 }
 0x549   :  { %v576_v5 = vpack.c.bf16 %v572_v2, %v572_v2 }
 0x54b   :  { %v561_v7 = vpop.xlane.xlu1 %560  ;;  %1278 = vmatmul.msk.bf16.vlgmr.msrb.gmra.mxu1 %vm352_vm3, %v576_v5 }
 0x54c   :  { %1367 = vrcp.f32 %v561_v7 }
 0x54e   :  { %v1366_v8 = vpop.eup %1365 }
 0x54f   :  { %v575_v11 = vmul.f32 %v1366_v8, %v1358_v51  ;;  %v564_v13 = vpop.xlane.xlu0 %563 }
 0x550   :  { %1369 = vrcp.f32 %v564_v13 }
 0x551   :  { %v579_v14 = vpack.c.bf16 %v575_v11, %v575_v11 }
 0x552   :  { %v1368_v15 = vpop.eup %1367 }
 0x553   :  { %v573_v16 = vmul.f32 %v1368_v15, %v1360_v54  ;;  %1281 = vmatmul.msk.bf16.vlgmr.msra.gmra.mxu0 %vm352_vm3, %v579_v14 }
 0x555   :  { %v577_v17 = vpack.c.bf16 %v573_v16, %v573_v16 }
 0x556   :  { %v1370_v18 = vpop.eup %1369 }
 0x557   :  { %v574_v20 = vmul.f32 %v1370_v18, %v1362_v57  ;;  %1279 = vmatmul.msk.bf16.vlgmr.msrb.gmra.mxu2 %vm352_vm3, %v577_v17 }
 0x559   :  { %v578_v21 = vpack.c.bf16 %v574_v20, %v574_v20 }
 0x55b   :  { %1280 = vmatmul.msk.bf16.vlgmr.msrb.gmra.mxu3 %vm352_vm3, %v578_v21 }
 0x55c   :  { %865 = vmatpush.bf16.msrb.mxu3 %v856_v22 }
 0x562   :  { %v667_v23 = vpop.permute.xlu0 %666 }
 0x563   :  { %v672_v24 = vsel %vm205_vm15, %v667_v23, 0  ;;  %v736_v25 = vpop.permute.xlu1 %735  ;;  %v923_v23 = vsel %vm205_vm15, %v918_v58, 0 }
 0x564   :  { %v741_v26 = vsel %vm205_vm15, %v736_v25, 0  ;;  %681 = vmatpush.bf16.xpose.msra.mxu1 %v672_v24 }
 0x565   :  { %750 = vmatpush.bf16.xpose.msrb.mxu0 %v741_v26 }
 0x567   :  { %1283 = vmatmul.msk.bf16.vlgmr.msra.gmra.mxu2 %vm205_vm15, %v688_v63 }
 0x56a   :  { %v734_v27 = vpop.permute.xlu0 %733 }
 0x56b   :  { %1282 = vmatmul.msk.bf16.vlgmr.msra.gmra.mxu1 %vm205_vm15, %v665_v9  ;;  %1284 = vmatmul.msk.bf16.vlgmr.msra.gmra.mxu3 %vm205_vm15, %v711_v0 }
 0x56c   :  { %1285 = vmatmul.msk.bf16.vlgmr.msrb.gmra.mxu0 %vm205_vm15, %v734_v27 }
 0x5c8   :  { %v1639_v28 = vpop.f32.mrf.mxu1 }
 0x5d0   :  { %v599_v31 = vpop.f32.mrf.mxu1  ;;  %v1641_v32 = vpop.f32.mrf.mxu0 }
 0x5d8   :  { %v662_v33 = vpop.f32.mrf.mxu0 }
 0x5da   :  { %v1643_v34 = vpop.f32.mrf.mxu2 }
 0x5de   :  { %v1645_v35 = vpop.f32.mrf.mxu3 }
 0x5e2   :  { %v620_v29 = vpop.f32.mrf.mxu2 }
 0x5e6   :  { %v641_v30 = vpop.f32.mrf.mxu3 }
 0x5e8   :  { %v683_v38 = vpop.f32.mrf.mxu1 }
 0x5e9   :  { %v756_v39 = vmul.f32 0.35355338, %v683_v38  ;;  %v752_v40 = vpop.f32.mrf.mxu0 }
 0x5ea   :  { %v706_v41 = vpop.f32.mrf.mxu2  ;;  %v759_v50 = vmul.f32 0.35355338, %v752_v40 }
 0x5eb   :  { %v757_v42 = vmul.f32 0.35355338, %v706_v41  ;;  %v760_v44 = vsel %vm301_vm2, %v756_v39, -inf }
 0x5ec   :  { %761 = vmax.xlane.f32.xlu0 %v760_v44  ;;  %v769_v54 = vsel %vm301_vm2, %v759_v50, -inf }
 0x5ed   :  { %v763_v46 = vsel %vm301_vm2, %v757_v42, -inf }
 0x5ee   :  { %764 = vmax.xlane.f32.xlu1 %v763_v46  ;;  %v729_v47 = vpop.f32.mrf.mxu3 }
 0x5ef   :  { %v758_v48 = vmul.f32 0.35355338, %v729_v47 }
 0x5f0   :  { %v685_v49 = vpop.f32.mrf.mxu1 }
 0x5f1   :  { %v754_v51 = vpop.f32.mrf.mxu0  ;;  %v766_v52 = vsel %vm301_vm2, %v758_v48, -inf }
 0x5f2   :  { %v708_v53 = vpop.f32.mrf.mxu2  ;;  %767 = vmax.xlane.f32.xlu2 %v766_v52 }
 0x5f6   :  { %770 = vmax.xlane.f32.xlu1 %v769_v54  ;;  %v731_v55 = vpop.f32.mrf.mxu3 }
 0x600   :  { %808 = vrot.lane.b32.xlu0 %v1510_v36, %s1415_s17 }
 0x608   :  { %894 = vrot.lane.b32.xlu0 %v1510_v36, %s1416_s18 }
 0x60a   :  { %915 = vrot.lane.b32.xlu2 %v1512_v37, %s1417_s19 }
 0x60f   :  { %829 = vrot.lane.b32.xlu1 %v1512_v37, %s1415_s17 }
 0x617   :  { %871 = vrot.lane.b32.xlu1 %v1518_v45, %s1415_s17 }
 0x61f   :  { %940 = vrot.lane.b32.xlu1 %v1516_v43, %s1416_s18 }
 0x627   :  { %938 = vrot.lane.b32.xlu1 %v1516_v43, %s1417_s19 }
 0x62f   :  { %892 = vrot.lane.b32.xlu1 %v1510_v36, %s1417_s19 }
 0x65f   :  { %v762_v56 = vpop.xlane.xlu0 %761 }
 0x660   :  { %v772_v57 = vsub.f32 %v756_v39, %v762_v56 }
 0x661   :  { %v765_v59 = vpop.xlane.xlu1 %764 }
 0x662   :  { %v776_v60 = vmul.f32 1.442695, %v772_v57  ;;  %v773_v61 = vsub.f32 %v757_v42, %v765_v59 }
 0x664   :  { %1371 = vpow2.f32 %v776_v60  ;;  %v778_v62 = vmul.f32 1.442695, %v773_v61 }
 0x665   :  { %v768_v63 = vpop.xlane.xlu2 %767 }
 0x666   :  { %1373 = vpow2.f32 %v778_v62  ;;  %v774_v7 = vsub.f32 %v758_v48, %v768_v63 }
 0x668   :  { %v780_v11 = vmul.f32 1.442695, %v774_v7 }
 0x669   :  { %v771_v0 = vpop.xlane.xlu1 %770 }
 0x66a   :  { %v1372_v1 = vpop.eup %1371  ;;  %v775_v2 = vsub.f32 %v759_v50, %v771_v0 }
 0x66b   :  { %v784_v3 = vsel %vm301_vm2, %v1372_v1, 0.0 }
 0x66c   :  { %v1374_v5 = vpop.eup %1373  ;;  %v782_v8 = vmul.f32 1.442695, %v775_v2  ;;  %785 = vadd.xlane.f32.xlu0 %v784_v3 }
 0x66d   :  { %v787_v9 = vsel %vm301_vm2, %v1374_v5, 0.0  ;;  %v916_v31 = vpop.permute.xlu2 %915 }
 0x66e   :  { %1375 = vpow2.f32 %v782_v8  ;;  %788 = vadd.xlane.f32.xlu2 %v787_v9 }
 0x66f   :  { %1377 = vpow2.f32 %v780_v11 }
 0x672   :  { %v809_v13 = vpop.permute.xlu0 %808 }
 0x673   :  { %v814_v14 = vsel %vm356_vm1, %v809_v13, 0 }
 0x674   :  { %v1376_v15 = vpop.eup %1375  ;;  %823 = vmatpush.bf16.msrb.mxu1 %v814_v14 }
 0x675   :  { %v793_v16 = vsel %vm301_vm2, %v1376_v15, 0.0  ;;  %v1378_v17 = vpop.eup %1377 }
 0x676   :  { %794 = vadd.xlane.f32.xlu0 %v793_v16  ;;  %v790_v19 = vsel %vm301_vm2, %v1378_v17, 0.0 }
 0x67a   :  { %v895_v18 = vpop.permute.xlu0 %894 }
 0x67b   :  { %v900_v20 = vsel %vm205_vm15, %v895_v18, 0 }
 0x67c   :  { %909 = vmatpush.bf16.xpose.msra.mxu1 %v900_v20 }
 0x67e   :  { %791 = vadd.xlane.f32.xlu0 %v790_v19 }
 0x681   :  { %v830_v21 = vpop.permute.xlu1 %829 }
 0x682   :  { %v835_v22 = vsel %vm356_vm1, %v830_v21, 0 }
 0x683   :  { %844 = vmatpush.bf16.msrb.mxu2 %v835_v22 }
 0x686   :  { %963 = vrot.lane.b32.xlu2 %v1518_v45, %s1416_s18 }
 0x687   :  { %932 = vmatpush.bf16.xpose.msra.mxu2 %v923_v23 }
 0x689   :  { %v872_v24 = vpop.permute.xlu1 %871 }
 0x68a   :  { %v877_v25 = vsel %vm356_vm1, %v872_v24, 0 }
 0x68b   :  { %886 = vmatpush.bf16.msra.mxu0 %v877_v25 }
 0x691   :  { %v941_v26 = vpop.permute.xlu1 %940 }
 0x692   :  { %v946_v27 = vsel %vm205_vm15, %v941_v26, 0  ;;  %961 = vrot.lane.b32.xlu0 %v1518_v45, %s1417_s19 }
 0x693   :  { %955 = vmatpush.bf16.xpose.msra.mxu3 %v946_v27 }
 0x699   :  { %v939_v49 = vpop.permute.xlu1 %938 }
 0x6a1   :  { %v893_v55 = vpop.permute.xlu1 %892 }
 0x6df   :  { %v786_v33 = vpop.xlane.xlu0 %785 }
 0x6e0   :  { %1379 = vrcp.f32 %v786_v33 }
 0x6e1   :  { %v789_v29 = vpop.xlane.xlu2 %788 }
 0x6e2   :  { %1381 = vrcp.f32 %v789_v29 }
 0x6e6   :  { %v1380_v30 = vpop.eup %1379 }
 0x6e7   :  { %v800_v38 = vmul.f32 %v1380_v30, %v1372_v1 }
 0x6e8   :  { %v1382_v39 = vpop.eup %1381 }
 0x6e9   :  { %v804_v40 = vpack.c.bf16 %v800_v38, %v800_v38  ;;  %v801_v41 = vmul.f32 %v1382_v39, %v1374_v5  ;;  %v795_v42 = vpop.xlane.xlu0 %794  ;;  %v964_v44 = vpop.permute.xlu2 %963 }
 0x6ea   :  { %1383 = vrcp.f32 %v795_v42  ;;  %v969_v46 = vsel %vm205_vm15, %v964_v44, 0 }
 0x6eb   :  { %v805_v47 = vpack.c.bf16 %v801_v41, %v801_v41  ;;  %1286 = vmatmul.msk.bf16.vlgmr.msrb.gmra.mxu1 %vm352_vm3, %v804_v40  ;;  %978 = vmatpush.bf16.xpose.msrb.mxu0 %v969_v46 }
 0x6ed   :  { %1287 = vmatmul.msk.bf16.vlgmr.msrb.gmra.mxu2 %vm352_vm3, %v805_v47 }
 0x6f0   :  { %v1384_v48 = vpop.eup %1383 }
 0x6f1   :  { %v803_v50 = vmul.f32 %v1384_v48, %v1376_v15  ;;  %v792_v51 = vpop.xlane.xlu0 %791 }
 0x6f2   :  { %1385 = vrcp.f32 %v792_v51 }
 0x6f3   :  { %v807_v52 = vpack.c.bf16 %v803_v50, %v803_v50 }
 0x6f5   :  { %1289 = vmatmul.msk.bf16.vlgmr.msra.gmra.mxu0 %vm352_vm3, %v807_v52 }
 0x6f8   :  { %v1386_v53 = vpop.eup %1385 }
 0x6f9   :  { %v802_v54 = vmul.f32 %v1386_v53, %v1378_v17 }
 0x6fb   :  { %v806_v56 = vpack.c.bf16 %v802_v54, %v802_v54  ;;  %1290 = vmatmul.msk.bf16.vlgmr.msra.gmra.mxu1 %vm205_vm15, %v893_v55 }
 0x6fd   :  { %1288 = vmatmul.msk.bf16.vlgmr.msrb.gmra.mxu3 %vm352_vm3, %v806_v56  ;;  %1291 = vmatmul.msk.bf16.vlgmr.msra.gmra.mxu2 %vm205_vm15, %v916_v31 }
 0x704   :  { %v962_v57 = vpop.permute.xlu0 %961 }
 0x705   :  { %1293 = vmatmul.msk.bf16.vlgmr.msrb.gmra.mxu0 %vm205_vm15, %v962_v57 }
 0x70d   :  { %1292 = vmatmul.msk.bf16.vlgmr.msra.gmra.mxu3 %vm205_vm15, %v939_v49 }
 0x768   :  { %v825_v58 = vpop.f32.mrf.mxu1 }
 0x770   :  { %v827_v59 = vpop.f32.mrf.mxu1  ;;  %v1690_v60 = vpop.f32.mrf.mxu2 }
 0x772   :  { %v888_v61 = vpop.f32.mrf.mxu0 }
 0x778   :  { %v848_v62 = vpop.f32.mrf.mxu2  ;;  %v911_v63 = vpop.f32.mrf.mxu1 }
 0x779   :  { %v984_v0 = vmul.f32 0.35355338, %v911_v63 }
 0x77a   :  { %v890_v1 = vpop.f32.mrf.mxu0 }
 0x77b   :  { %v988_v2 = vsel %vm301_vm2, %v984_v0, -inf }
 0x77c   :  { %989 = vmax.xlane.f32.xlu0 %v988_v2 }
 0x780   :  { %v867_v3 = vpop.f32.mrf.mxu3  ;;  %v913_v5 = vpop.f32.mrf.mxu1 }
 0x781   :  { %v934_v7 = vpop.f32.mrf.mxu2 }
 0x782   :  { %v985_v8 = vmul.f32 0.35355338, %v934_v7  ;;  %v980_v9 = vpop.f32.mrf.mxu0 }
 0x783   :  { %v987_v13 = vmul.f32 0.35355338, %v980_v9 }
 0x784   :  { %v991_v11 = vsel %vm301_vm2, %v985_v8, -inf }
 0x785   :  { %992 = vmax.xlane.f32.xlu2 %v991_v11  ;;  %v997_v17 = vsel %vm301_vm2, %v987_v13, -inf }
 0x788   :  { %v869_v14 = vpop.f32.mrf.mxu3 }
 0x789   :  { %v936_v15 = vpop.f32.mrf.mxu2 }
 0x78a   :  { %v982_v16 = vpop.f32.mrf.mxu0 }
 0x78d   :  { %998 = vmax.xlane.f32.xlu2 %v997_v17 }
 0x790   :  { %v957_v18 = vpop.f32.mrf.mxu3 }
 0x791   :  { %v986_v20 = vmul.f32 0.35355338, %v957_v18 }
 0x793   :  { %v994_v19 = vsel %vm301_vm2, %v986_v20, -inf }
 0x794   :  { %995 = vmax.xlane.f32.xlu1 %v994_v19 }
 0x798   :  { %v959_v21 = vpop.f32.mrf.mxu3 }
 0x7ef   :  { %v990_v22 = vpop.xlane.xlu0 %989 }
 0x7f0   :  { %v1000_v23 = vsub.f32 %v984_v0, %v990_v22 }
 0x7f2   :  { %v1004_v24 = vmul.f32 1.442695, %v1000_v23 }
 0x7f4   :  { %1387 = vpow2.f32 %v1004_v24 }
 0x7f8   :  { %v993_v25 = vpop.xlane.xlu2 %992 }
 0x7f9   :  { %v1001_v29 = vsub.f32 %v985_v8, %v993_v25  ;;  %v1310_v25 = vld [vmem:[%s1780_s4 + $0x8] sm:$0xff] }
 0x7fa   :  { %v1696_v26 = vpop.eup %1387 }
 0x7fb   :  { %v1012_v27 = vsel %vm301_vm2, %v1696_v26, 0.0  ;;  %v1006_v38 = vmul.f32 1.442695, %v1001_v29 }
 0x7fc   :  { %1013 = vadd.xlane.f32.xlu0 %v1012_v27  ;;  %v1309_v27 = vld [vmem:[%s1780_s4] sm:$0xff] }
 0x800   :  { %v999_v31 = vpop.xlane.xlu2 %998 }
 0x801   :  { %v1003_v33 = vsub.f32 %v987_v13, %v999_v31 }
 0x803   :  { %v1010_v30 = vmul.f32 1.442695, %v1003_v33 }
 0x805   :  { %1389 = vpow2.f32 %v1010_v30 }
 0x806   :  { %1391 = vpow2.f32 %v1006_v38 }
 0x807   :  { %v996_v39 = vpop.xlane.xlu1 %995 }
 0x808   :  { %v1002_v40 = vsub.f32 %v986_v20, %v996_v39 }
 0x80a   :  { %v1008_v41 = vmul.f32 1.442695, %v1002_v40 }
 0x80b   :  { %v1390_v42 = vpop.eup %1389 }
 0x80c   :  { %1393 = vpow2.f32 %v1008_v41  ;;  %v1021_v44 = vsel %vm301_vm2, %v1390_v42, 0.0  ;;  %v1392_v46 = vpop.eup %1391 }
 0x80d   :  { %1022 = vadd.xlane.f32.xlu1 %v1021_v44  ;;  %v1015_v49 = vsel %vm301_vm2, %v1392_v46, 0.0 }
 0x810   :  { %1078 = vrot.lane.b32.xlu0 %v1516_v43, %s1418_s20 }
 0x812   :  { %v1394_v47 = vpop.eup %1393 }
 0x813   :  { %v1018_v48 = vsel %vm301_vm2, %v1394_v47, 0.0 }
 0x814   :  { %1019 = vadd.xlane.f32.xlu2 %v1018_v48 }
 0x815   :  { %1016 = vadd.xlane.f32.xlu1 %v1015_v49 }
 0x818   :  { %1099 = vrot.lane.b32.xlu0 %v1518_v45, %s1418_s20 }
 0x820   :  { %1126 = vrot.lane.b32.xlu0 %v1643_v34, %s1419_s21 }
 0x828   :  { %1140 = vrot.lane.b32.xlu0 %v825_v58, %s1420_s22 }
 0x82c   :  { %1057 = vrot.lane.b32.xlu2 %v1512_v37, %s1418_s20 }
 0x82e   :  { %1036 = vrot.lane.b32.xlu1 %v1510_v36, %s1418_s20 }
 0x830   :  { %1146 = vrot.lane.b32.xlu0 %v888_v61, %s1420_s22 }
 0x834   :  { %1124 = vrot.lane.b32.xlu2 %v1639_v28, %s1419_s21 }
 0x836   :  { %1128 = vrot.lane.b32.xlu1 %v1645_v35, %s1419_s21 }
 0x83c   :  { %1130 = vrot.lane.b32.xlu2 %v1641_v32, %s1419_s21 }
 0x83e   :  { %1142 = vrot.lane.b32.xlu1 %v1690_v60, %s1420_s22 }
 0x844   :  { %1144 = vrot.lane.b32.xlu2 %v867_v3, %s1420_s22 }
 0x86f   :  { %v1014_v43 = vpop.xlane.xlu0 %1013 }
 0x880   :  { %v1023_v45 = vpop.xlane.xlu1 %1022 }
 0x881   :  { %1395 = vrcp.f32 %v1023_v45 }
 0x882   :  { %v1079_v34 = vpop.permute.xlu0 %1078 }
 0x883   :  { %v1084_v50 = vsel %vm356_vm1, %v1079_v34, 0  ;;  %v1404_v34 = vld [vmem:[%s1775_s0 + $0x4] sm:$0xf] }
 0x884   :  { %1093 = vmatpush.bf16.msrb.mxu3 %v1084_v50 }
 0x887   :  { %v1396_v37 = vpop.eup %1395  ;;  %v1020_v51 = vpop.xlane.xlu2 %1019 }
 0x888   :  { %v1017_v36 = vpop.xlane.xlu1 %1016  ;;  %1397 = vrcp.f32 %v1020_v51  ;;  %v1031_v52 = vmul.f32 %v1396_v37, %v1390_v42 }
 0x889   :  { %1399 = vrcp.f32 %v1017_v36 }
 0x88a   :  { %v1100_v28 = vpop.permute.xlu0 %1099  ;;  %v1035_v32 = vpack.c.bf16 %v1031_v52, %v1031_v52  ;;  %1401 = vrcp.f32 %v1014_v43 }
 0x88b   :  { %v1105_v35 = vsel %vm356_vm1, %v1100_v28, 0  ;;  %v1405_v28 = vld [vmem:[%s1775_s0 + $0x8] sm:$0xf] }
 0x88c   :  { %1114 = vmatpush.bf16.msra.mxu0 %v1105_v35 }
 0x88e   :  { %v1398_v53 = vpop.eup %1397 }
 0x88f   :  { %v1400_v54 = vpop.eup %1399  ;;  %v1030_v55 = vmul.f32 %v1398_v53, %v1394_v47  ;;  %1297 = vmatmul.msk.bf16.vlgmr.msra.gmra.mxu0 %vm352_vm3, %v1035_v32  ;;  %v1058_v56 = vpop.permute.xlu2 %1057  ;;  %v1406_v32 = vld [vmem:[%s1775_s0 + $0xc] sm:$0xf] }
 0x890   :  { %v1029_v57 = vmul.f32 %v1400_v54, %v1392_v46  ;;  %v1063_v58 = vsel %vm356_vm1, %v1058_v56, 0  ;;  %v1402_v61 = vpop.eup %1401 }
 0x891   :  { %v1034_v59 = vpack.c.bf16 %v1030_v55, %v1030_v55  ;;  %1072 = vmatpush.bf16.msrb.mxu2 %v1063_v58  ;;  %v1028_v62 = vmul.f32 %v1402_v61, %v1696_v26 }
 0x892   :  { %v1033_v60 = vpack.c.bf16 %v1029_v57, %v1029_v57  ;;  %v1127_v18 = vpop.permute.xlu0 %1126 }
 0x893   :  { %1296 = vmatmul.msk.bf16.vlgmr.msrb.gmra.mxu3 %vm352_vm3, %v1034_v59  ;;  %v1032_v1 = vpack.c.bf16 %v1028_v62, %v1028_v62  ;;  %v1169_v19 = vsel %vm205_vm15, %v1581_v4, %v1127_v18 }
 0x894   :  { %1295 = vmatmul.msk.bf16.vlgmr.msrb.gmra.mxu2 %vm352_vm3, %v1033_v60 }
 0x897   :  { %v1125_v14 = vpop.permute.xlu2 %1124 }
 0x898   :  { %v1168_v30 = vsel %vm205_vm15, %v1583_v6, %v1125_v14  ;;  %v1328_v6 = vld [vmem:[%s1779_s5] ss:$0 sm:$0xff] }
 0x89a   :  { %v1141_v24 = vpop.permute.xlu0 %1140 }
 0x89b   :  { %v1173_v38 = vsel %vm1172_vm5, %v1168_v30, %v1141_v24 }
 0x89f   :  { %v1131_v15 = vpop.permute.xlu2 %1130 }
 0x8a0   :  { %v1037_v63 = vpop.permute.xlu1 %1036  ;;  %v1171_v41 = vsel %vm205_vm15, %v1587_v12, %v1131_v15  ;;  %v1403_v12 = vld [vmem:[%s1775_s0] sm:$0xf] }
 0x8a1   :  { %v1042_v0 = vsel %vm356_vm1, %v1037_v63, 0 }
 0x8a2   :  { %1051 = vmatpush.bf16.msrb.mxu1 %v1042_v0  ;;  %v1147_v26 = vpop.permute.xlu0 %1146 }
 0x8a5   :  { %1294 = vmatmul.msk.bf16.vlgmr.msrb.gmra.mxu1 %vm352_vm3, %v1032_v1 }
 0x8a6   :  { %1223 = vmatpush.bf16.msra.mxu1 %v1310_v25 }
 0x8a7   :  { %v1145_v17 = vpop.permute.xlu2 %1144 }
 0x8a8   :  { %v1129_v16 = vpop.permute.xlu1 %1128 }
 0x8a9   :  { %v1170_v4 = vsel %vm205_vm15, %v1585_v10, %v1129_v16  ;;  %v1176_v10 = vsel %vm1172_vm5, %v1171_v41, %v1147_v26 }
 0x8aa   :  { %1224 = vmatpush.bf16.msra.mxu1 %v1309_v27  ;;  %v1175_v31 = vsel %vm1172_vm5, %v1170_v4, %v1145_v17 }
 0x8b0   :  { %v1143_v20 = vpop.permute.xlu1 %1142 }
 0x8b1   :  { %v1174_v21 = vsel %vm1172_vm5, %v1169_v19, %v1143_v20 }
 0x90c   :  { %v1116_v2 = vpop.f32.mrf.mxu0 }
 0x914   :  { %v1118_v3 = vpop.f32.mrf.mxu0 }
 0x916   :  { %v1095_v5 = vpop.f32.mrf.mxu3 }
 0x917   :  { %1160 = vrot.lane.b32.xlu0 %v1095_v5, %s1421_s23  ;;  %v1074_v7 = vpop.f32.mrf.mxu2 }
 0x918   :  { %1158 = vrot.lane.b32.xlu2 %v1074_v7, %s1421_s23 }
 0x91e   :  { %v1097_v8 = vpop.f32.mrf.mxu3 }
 0x91f   :  { %v1076_v9 = vpop.f32.mrf.mxu2 }
 0x922   :  { %v1053_v11 = vpop.f32.mrf.mxu1 }
 0x923   :  { %1156 = vrot.lane.b32.xlu1 %v1053_v11, %s1421_s23 }
 0x92a   :  { %v1055_v13 = vpop.f32.mrf.mxu1 }
 0x92b   :  { %1162 = vrot.lane.b32.xlu1 %v1116_v2, %s1421_s23 }
 0x972   :  { %v1159_v22 = vpop.permute.xlu2 %1158 }
 0x973   :  { %v1179_v23 = vsel %vm1177_vm4, %v1174_v21, %v1159_v22 }
 0x974   :  { %1188 = vst [vmem:[#allocation1 + $0x1] ss:$2 sm:$0xff] %v1179_v23 }
 0x989   :  { %v1161_v33 = vpop.permute.xlu0 %1160 }
 0x98a   :  { %v1180_v29 = vsel %vm1177_vm4, %v1175_v31, %v1161_v33 }
 0x98b   :  { %1190 = vst [vmem:[#allocation1 + $0x10] ss:$2 sm:$0xff] %v1180_v29 }
 0x995   :  { %v1157_v39 = vpop.permute.xlu1 %1156 }
 0x996   :  { %v1178_v40 = vsel %vm1177_vm4, %v1173_v38, %v1157_v39 }
 0x997   :  { %1186 = vst [vmem:[#allocation1] ss:$2 sm:$0xff] %v1178_v40 }
 0x99d   :  { %v1163_v42 = vpop.permute.xlu1 %1162 }
 0x99e   :  { %v1181_v44 = vsel %vm1177_vm4, %v1176_v10, %v1163_v42  ;;  %v1193_v46 = vld.sshfl [vmem:[#allocation1] sm:$0xff pattern:$0x75316420] }
 0x99f   :  { %1192 = vst [vmem:[#allocation1 + $0x11] ss:$2 sm:$0xff] %v1181_v44 }
 0x9a6   :  { %v1194_v47 = vld.sshfl [vmem:[#allocation1 + $0x10] sm:$0xff pattern:$0x75316420] }
 0x9a7   :  { %v1197_v48 = vpack.c.bf16 %v1194_v47, %v1193_v46 }
 0x9a9   :  { %1306 = vmatmul.msk.bf16.vlgmr.msra.gmra.mxu1 %vm172_vm14, %v1197_v48 }
 0xa26   :  { %v1226_v49 = vpop.f32.mrf.mxu1 }
 0xa27   :  { %v1233_v43 = vrot.slane %v1226_v49, 4  ;;  %v1237_v45 = vadd.f32 %v1403_v12, %v1226_v49 }
 0xa29   :  { %v1238_v50 = vadd.f32 %v1404_v34, %v1233_v43  ;;  %v1245_v37 = vadd.f32 %v1328_v6, %v1237_v45 }
 0xa2b   :  { %v1246_v51 = vadd.f32 %v1328_v6, %v1238_v50  ;;  %1249 = vst.msk [vmem:[%s1781_s6] sm:$0xf] %vm30_vm0, %v1245_v37 }
 0xa2d   :  { %1250 = vst.msk [vmem:[%s1781_s6 + $0x4] sm:$0xf] %vm30_vm0, %v1246_v51 }
 0xa2e   :  { %v1228_v36 = vpop.f32.mrf.mxu1 }
 0xa2f   :  { %v1234_v52 = vrot.slane %v1228_v36, 4  ;;  %v1239_v35 = vadd.f32 %v1405_v28, %v1228_v36 }
 0xa31   :  { %v1240_v53 = vadd.f32 %v1406_v32, %v1234_v52  ;;  %v1247_v54 = vadd.f32 %v1328_v6, %v1239_v35 }
 0xa33   :  { %v1248_v55 = vadd.f32 %v1328_v6, %v1240_v53  ;;  %1251 = vst.msk [vmem:[%s1781_s6 + $0x8] sm:$0xf] %vm30_vm0, %v1247_v54 }
 0xa35   :  { %1252 = vst.msk [vmem:[%s1781_s6 + $0xc] sm:$0xf] %vm30_vm0, %v1248_v55 }

// kernel: block_forward.3
= control target key start
LH: loop header
LB: loop body
LE: loop exit
PB: predicated region body
PF: predicated region fallthrough
CT: control target
= control target key end

     0   :  { %vm34_vm0 = vcmask 254976   ;;  %v2647_v16 = vmov 32.0   ;;  %s2649_s19 = smov 64   ;;  %s2650_s20 = smov 88   ;;  %s3638_s0 = inlined_call_operand.vmem [shape: f32[8,2,32], index: 0, kind: input, shape index: {}]   ;;  %s3639_s1 = inlined_call_operand.vmem [shape: f32[1,32], index: 1, kind: input, shape index: {}]   ;;  %s3640_s2 = inlined_call_operand.vmem [shape: f32[1,32], index: 2, kind: input, shape index: {}]   ;;  %s3641_s3 = inlined_call_operand.vmem [shape: bf16[32,96], index: 3, kind: input, shape index: {}]   ;;  %s3642_s5 = inlined_call_operand.vmem [shape: f32[1,32], index: 5, kind: input, shape index: {}]   ;;  %s3643_s4 = inlined_call_operand.vmem [shape: bf16[32,32], index: 4, kind: input, shape index: {}]   ;;  %s3644_s6 = inlined_call_operand.vmem [shape: f32[8,2,32], index: 6, kind: output, shape index: {}]  }
   0x1   :  { %v28_v0 = vld [vmem:[%s3638_s0 + $0x8] sm:$0x3]  ;;  %v26_v1 = vld [vmem:[%s3638_s0 + $0x4] sm:$0x3]  ;;  %v24_v2 = vld [vmem:[%s3638_s0] sm:$0x3]  ;;  %2493 = vrcp.f32 %v2647_v16 }
   0x2   :  { %v47_v3 = vsel %vm34_vm0, %v28_v0, 0.0  ;;  %v41_v4 = vsel %vm34_vm0, %v26_v1, 0.0  ;;  %v35_v5 = vsel %vm34_vm0, %v24_v2, 0.0  ;;  %v29_v6 = vld [vmem:[%s3638_s0 + $0xa] sm:$0x3]  ;;  %s2651_s21 = smov 120  }
   0x3   :  { %48 = vadd.xlane.f32.xlu2 %v47_v3  ;;  %42 = vadd.xlane.f32.xlu1 %v41_v4  ;;  %v27_v7 = vld [vmem:[%s3638_s0 + $0x6] sm:$0x3]  ;;  %v25_v8 = vld [vmem:[%s3638_s0 + $0x2] sm:$0x3]  ;;  %v50_v9 = vsel %vm34_vm0, %v29_v6, 0.0  ;;  %s2652_s22 = smov 56  }
   0x4   :  { %36 = vadd.xlane.f32.xlu0 %v35_v5  ;;  %v44_v10 = vsel %vm34_vm0, %v27_v7, 0.0  ;;  %v38_v11 = vsel %vm34_vm0, %v25_v8, 0.0  ;;  %v31_v12 = vld [vmem:[%s3638_s0 + $0xe] sm:$0x3]  ;;  %v30_v13 = vld [vmem:[%s3638_s0 + $0xc] sm:$0x3] }
   0x5   :  { %v56_v14 = vsel %vm34_vm0, %v31_v12, 0.0  ;;  %v53_v15 = vsel %vm34_vm0, %v30_v13, 0.0  ;;  %s2653_s23 = smov 80   ;;  %s2654_s24 = smov 112  }
   0x6   :  { %s2655_s25 = smov 48   ;;  %s2656_s26 = smov 72  }
   0x7   :  { %v2494_v17 = vpop.eup %2493  ;;  %s2657_s27 = smov 104   ;;  %s2658_s28 = smov 40  }
   0x8   :  { %v60_v18 = vmul.f32 32.0, %v2494_v17  ;;  %vm64_vm1 = vweird.f32 %v2494_v17  ;;  %s2659_s29 = smov 8   ;;  %s2660_s30 = smov 16  }
   0x9   :  { %s2661_s7 = smov 24  }
   0xa   :  { %v61_v19 = vsub.f32 1.0, %v60_v18 }
   0xb   :  { %51 = vadd.xlane.f32.xlu2 %v50_v9  ;;  %45 = vadd.xlane.f32.xlu1 %v44_v10 }
   0xc   :  { %39 = vadd.xlane.f32.xlu0 %v38_v11  ;;  %v62_v20 = vmul.f32 %v2494_v17, %v61_v19 }
   0xe   :  { %v63_v21 = vadd.f32 %v2494_v17, %v62_v20 }
  0x10   :  { %v2729_v22 = vsel %vm64_vm1, %v2494_v17, %v63_v21 }
  0x13   :  { %57 = vadd.xlane.f32.xlu1 %v56_v14 }
  0x14   :  { %54 = vadd.xlane.f32.xlu0 %v53_v15 }
  0x76   :  { %v49_v23 = vpop.xlane.xlu2 %48  ;;  %v43_v24 = vpop.xlane.xlu1 %42 }
  0x77   :  { %v68_v25 = vmul.f32 %v2729_v22, %v43_v24  ;;  %v37_v26 = vpop.xlane.xlu0 %36  ;;  %v70_v39 = vmul.f32 %v2729_v22, %v49_v23 }
  0x78   :  { %v66_v27 = vmul.f32 %v2729_v22, %v37_v26 }
  0x79   :  { %v2733_v28 = vsub.f32 %v26_v1, %v68_v25  ;;  %v2757_v46 = vsub.f32 %v28_v0, %v70_v39 }
  0x7a   :  { %v2735_v29 = vsub.f32 %v24_v2, %v66_v27 }
  0x7b   :  { %v84_v30 = vmul.f32 %v2733_v28, %v2733_v28  ;;  %v86_v55 = vmul.f32 %v2757_v46, %v2757_v46 }
  0x7c   :  { %v82_v31 = vmul.f32 %v2735_v29, %v2735_v29 }
  0x7d   :  { %v96_v32 = vsel %vm34_vm0, %v84_v30, 0.0  ;;  %v102_v58 = vsel %vm34_vm0, %v86_v55, 0.0 }
  0x7e   :  { %v52_v33 = vpop.xlane.xlu2 %51  ;;  %97 = vadd.xlane.f32.xlu1 %v96_v32  ;;  %v46_v34 = vpop.xlane.xlu1 %45  ;;  %v90_v35 = vsel %vm34_vm0, %v82_v31, 0.0 }
  0x7f   :  { %v71_v36 = vmul.f32 %v2729_v22, %v52_v33  ;;  %v69_v37 = vmul.f32 %v2729_v22, %v46_v34  ;;  %91 = vadd.xlane.f32.xlu2 %v90_v35  ;;  %v40_v38 = vpop.xlane.xlu0 %39 }
  0x80   :  { %v67_v40 = vmul.f32 %v2729_v22, %v40_v38 }
  0x81   :  { %v2747_v41 = vsub.f32 %v29_v6, %v71_v36  ;;  %v2749_v42 = vsub.f32 %v27_v7, %v69_v37  ;;  %v2801_v37 = vld [vmem:[%s3639_s1] ss:$0 sm:$0xff] }
  0x82   :  { %v2751_v43 = vsub.f32 %v25_v8, %v67_v40 }
  0x83   :  { %v87_v44 = vmul.f32 %v2747_v41, %v2747_v41  ;;  %v85_v45 = vmul.f32 %v2749_v42, %v2749_v42 }
  0x84   :  { %v83_v47 = vmul.f32 %v2751_v43, %v2751_v43 }
  0x85   :  { %v105_v48 = vsel %vm34_vm0, %v87_v44, 0.0  ;;  %v99_v49 = vsel %vm34_vm0, %v85_v45, 0.0 }
  0x86   :  { %106 = vadd.xlane.f32.xlu1 %v105_v48  ;;  %v93_v50 = vsel %vm34_vm0, %v83_v47, 0.0  ;;  %v58_v51 = vpop.xlane.xlu1 %57  ;;  %v2813_v48 = vld [vmem:[%s3640_s2] ss:$0 sm:$0xff] }
  0x87   :  { %100 = vadd.xlane.f32.xlu2 %v99_v49  ;;  %94 = vadd.xlane.f32.xlu0 %v93_v50  ;;  %v55_v52 = vpop.xlane.xlu0 %54  ;;  %v73_v54 = vmul.f32 %v2729_v22, %v58_v51 }
  0x88   :  { %v72_v53 = vmul.f32 %v2729_v22, %v55_v52  ;;  %v2472_v52 = vld [vmem:[%s3641_s3 + $0x8] sm:$0xff] }
  0x89   :  { %v2770_v57 = vsub.f32 %v31_v12, %v73_v54  ;;  %294 = vmatpush.bf16.msra.mxu0 %v2472_v52 }
  0x8a   :  { %v2768_v56 = vsub.f32 %v30_v13, %v72_v53 }
  0x8b   :  { %v89_v61 = vmul.f32 %v2770_v57, %v2770_v57 }
  0x8c   :  { %v88_v59 = vmul.f32 %v2768_v56, %v2768_v56 }
  0x8d   :  { %v111_v62 = vsel %vm34_vm0, %v89_v61, 0.0 }
  0x8e   :  { %v108_v60 = vsel %vm34_vm0, %v88_v59, 0.0 }
  0x8f   :  { %103 = vadd.xlane.f32.xlu0 %v102_v58  ;;  %109 = vadd.xlane.f32.xlu2 %v108_v60  ;;  %v2471_v60 = vld [vmem:[%s3641_s3] sm:$0xff]  ;;  %s2648_s3 = smov 96  }
  0x90   :  { %295 = vmatpush.bf16.msra.mxu0 %v2471_v60 }
  0x97   :  { %112 = vadd.xlane.f32.xlu0 %v111_v62 }
  0xf1   :  { %v98_v63 = vpop.xlane.xlu1 %97 }
  0xf2   :  { %v116_v0 = vmul.f32 %v98_v63, %v2729_v22  ;;  %v92_v1 = vpop.xlane.xlu2 %91 }
  0xf3   :  { %v114_v2 = vmul.f32 %v92_v1, %v2729_v22 }
  0xf4   :  { %v124_v3 = vadd.f32 1e-05, %v116_v0 }
  0xf5   :  { %v122_v4 = vadd.f32 1e-05, %v114_v2 }
  0xf6   :  { %2495 = vrsqrt.f32 %v124_v3  ;;  %vm156_vm2 = vweird.f32 %v124_v3 }
  0xf7   :  { %2497 = vrsqrt.f32 %v122_v4  ;;  %vm136_vm6 = vweird.f32 %v122_v4 }
  0xf9   :  { %v107_v5 = vpop.xlane.xlu1 %106 }
  0xfa   :  { %v119_v6 = vmul.f32 %v107_v5, %v2729_v22  ;;  %v101_v7 = vpop.xlane.xlu2 %100  ;;  %v95_v8 = vpop.xlane.xlu0 %94 }
  0xfb   :  { %v117_v9 = vmul.f32 %v101_v7, %v2729_v22  ;;  %v115_v10 = vmul.f32 %v95_v8, %v2729_v22 }
  0xfc   :  { %v2496_v11 = vpop.eup %2495  ;;  %v127_v12 = vadd.f32 1e-05, %v119_v6 }
  0xfd   :  { %v2498_v13 = vpop.eup %2497  ;;  %v151_v14 = vmul.f32 %v2496_v11, %v124_v3  ;;  %v2784_v15 = vadd.f32 1e-05, %v117_v9  ;;  %v2786_v16 = vadd.f32 1e-05, %v115_v10  ;;  %vm157_vm3 = vweird.f32 %v2496_v11 }
  0xfe   :  { %v131_v17 = vmul.f32 %v2498_v13, %v122_v4  ;;  %2499 = vrsqrt.f32 %v127_v12  ;;  %vm137_vm4 = vweird.f32 %v2498_v13  ;;  %vm158_vm5 = vmor %vm156_vm2, %vm157_vm3  ;;  %vm186_vm8 = vweird.f32 %v127_v12 }
  0xff   :  { %v152_v18 = vmul.f32 %v2496_v11, %v151_v14  ;;  %2501 = vrsqrt.f32 %v2784_v15  ;;  %vm138_vm7 = vmor %vm136_vm6, %vm137_vm4  ;;  %vm166_vm10 = vweird.f32 %v2784_v15  ;;  %vm146_vm15 = vweird.f32 %v2786_v16 }
 0x100   :  { %v132_v19 = vmul.f32 %v2498_v13, %v131_v17  ;;  %2503 = vrsqrt.f32 %v2786_v16 }
 0x101   :  { %v153_v20 = vmul.f32 0.5, %v152_v18 }
 0x102   :  { %v133_v21 = vmul.f32 0.5, %v132_v19  ;;  %v110_v23 = vpop.xlane.xlu2 %109  ;;  %v104_v24 = vpop.xlane.xlu0 %103 }
 0x103   :  { %v154_v25 = vsub.f32 1.5, %v153_v20  ;;  %v120_v26 = vmul.f32 %v110_v23, %v2729_v22  ;;  %v118_v27 = vmul.f32 %v104_v24, %v2729_v22 }
 0x104   :  { %v2500_v30 = vpop.eup %2499  ;;  %v134_v31 = vsub.f32 1.5, %v133_v21 }
 0x105   :  { %v2792_v32 = vpop.eup %2501  ;;  %v155_v33 = vmul.f32 %v2496_v11, %v154_v25  ;;  %v181_v34 = vmul.f32 %v2500_v30, %v127_v12  ;;  %v2794_v35 = vadd.f32 1e-05, %v120_v26  ;;  %v2806_v40 = vadd.f32 1e-05, %v118_v27 }
 0x106   :  { %v2796_v36 = vpop.eup %2503  ;;  %v135_v38 = vmul.f32 %v2498_v13, %v134_v31  ;;  %v161_v39 = vmul.f32 %v2792_v32, %v2784_v15  ;;  %vm187_vm9 = vweird.f32 %v2500_v30  ;;  %vm167_vm12 = vweird.f32 %v2792_v32 }
 0x107   :  { %v159_v44 = vsel %vm158_vm5, %v2496_v11, %v155_v33  ;;  %v182_v45 = vmul.f32 %v2500_v30, %v181_v34  ;;  %v141_v47 = vmul.f32 %v2796_v36, %v2786_v16  ;;  %2505 = vrsqrt.f32 %v2794_v35  ;;  %vm2833_vm11 = vmor %vm186_vm8, %vm187_vm9 }
 0x108   :  { %v212_v49 = vmul.f32 %v159_v44, %v2733_v28  ;;  %v139_v50 = vsel %vm138_vm7, %v2498_v13, %v135_v38  ;;  %v162_v51 = vmul.f32 %v2792_v32, %v161_v39  ;;  %2507 = vrsqrt.f32 %v2806_v40  ;;  %vm168_vm14 = vmor %vm166_vm10, %vm167_vm12 }
 0x109   :  { %v210_v53 = vmul.f32 %v139_v50, %v2735_v29  ;;  %v183_v54 = vmul.f32 0.5, %v182_v45  ;;  %v142_v55 = vmul.f32 %v2796_v36, %v141_v47  ;;  %vm147_vm13 = vweird.f32 %v2796_v36 }
 0x10a   :  { %v223_v58 = vmul.f32 %v2801_v37, %v212_v49  ;;  %v163_v59 = vmul.f32 0.5, %v162_v51  ;;  %v113_v28 = vpop.xlane.xlu0 %112  ;;  %vm148_vm1 = vmor %vm146_vm15, %vm147_vm13  ;;  %vm196_vm2 = vweird.f32 %v2794_v35  ;;  %vm176_vm6 = vweird.f32 %v2806_v40 }
 0x10b   :  { %v221_v61 = vmul.f32 %v2801_v37, %v210_v53  ;;  %v184_v29 = vsub.f32 1.5, %v183_v54  ;;  %v143_v62 = vmul.f32 0.5, %v142_v55  ;;  %v121_v63 = vmul.f32 %v113_v28, %v2729_v22 }
 0x10c   :  { %v234_v0 = vadd.f32 %v2813_v48, %v223_v58  ;;  %v164_v2 = vsub.f32 1.5, %v163_v59  ;;  %vm329_vm12 = vcmask 64512   ;;  %vm628_vm13 = vcmask 1040384  }
 0x10d   :  { %v232_v3 = vadd.f32 %v2813_v48, %v221_v61  ;;  %v185_v4 = vmul.f32 %v2500_v30, %v184_v29  ;;  %v144_v5 = vsub.f32 1.5, %v143_v62  ;;  %v129_v6 = vadd.f32 1e-05, %v121_v63  ;;  %v2506_v7 = vpop.eup %2505 }
 0x10e   :  { %252 = vst [vmem:[#allocation1 + $0x2] ss:$4 sm:$0xff] %v234_v0  ;;  %v165_v22 = vmul.f32 %v2792_v32, %v164_v2  ;;  %v191_v10 = vmul.f32 %v2506_v7, %v2794_v35  ;;  %v2508_v11 = vpop.eup %2507  ;;  %vm197_vm3 = vweird.f32 %v2506_v7  ;;  %vm624_vm15 = vcmask 15360  }
 0x10f   :  { %248 = vst [vmem:[#allocation1] ss:$4 sm:$0xff] %v232_v3  ;;  %v189_v8 = vsel %vm2833_vm11, %v2500_v30, %v185_v4  ;;  %v145_v9 = vmul.f32 %v2796_v36, %v144_v5  ;;  %2509 = vrsqrt.f32 %v129_v6  ;;  %v171_v18 = vmul.f32 %v2508_v11, %v2806_v40  ;;  %vm198_vm5 = vmor %vm196_vm2, %vm197_vm3 }
 0x110   :  { %v215_v12 = vmul.f32 %v189_v8, %v2747_v41  ;;  %v169_v13 = vsel %vm168_vm14, %v2792_v32, %v165_v22  ;;  %v192_v17 = vmul.f32 %v2506_v7, %v191_v10  ;;  %vm177_vm4 = vweird.f32 %v2508_v11 }
 0x111   :  { %v213_v14 = vmul.f32 %v169_v13, %v2749_v42  ;;  %v149_v15 = vsel %vm148_vm1, %v2796_v36, %v145_v9  ;;  %v172_v21 = vmul.f32 %v2508_v11, %v171_v18  ;;  %vm178_vm7 = vmor %vm176_vm6, %vm177_vm4  ;;  %vm206_vm9 = vweird.f32 %v129_v6 }
 0x112   :  { %v226_v16 = vmul.f32 %v2801_v37, %v215_v12  ;;  %v211_v19 = vmul.f32 %v149_v15, %v2751_v43  ;;  %v193_v41 = vmul.f32 0.5, %v192_v17  ;;  %vm284_vm11 = vcmask 261120  }
 0x113   :  { %v224_v20 = vmul.f32 %v2801_v37, %v213_v14  ;;  %v173_v26 = vmul.f32 0.5, %v172_v21  ;;  %vm525_vm14 = vcmask 9216   ;;  %vm2264_vm1 = vcmask 130048  }
 0x114   :  { %v237_v23 = vadd.f32 %v2813_v48, %v226_v16  ;;  %v222_v24 = vmul.f32 %v2801_v37, %v211_v19  ;;  %v194_v25 = vsub.f32 1.5, %v193_v41  ;;  %vm2273_vm2 = vcmask 195584  }
 0x115   :  { %v235_v42 = vadd.f32 %v2813_v48, %v224_v20  ;;  %v2510_v27 = vpop.eup %2509  ;;  %v174_v31 = vsub.f32 1.5, %v173_v26 }
 0x116   :  { %258 = vst [vmem:[#allocation1 + $0x21] ss:$4 sm:$0xff] %v237_v23  ;;  %v233_v30 = vadd.f32 %v2813_v48, %v222_v24  ;;  %v195_v43 = vmul.f32 %v2506_v7, %v194_v25  ;;  %v201_v32 = vmul.f32 %v2510_v27, %v129_v6  ;;  %vm207_vm8 = vweird.f32 %v2510_v27 }
 0x117   :  { %254 = vst [vmem:[#allocation1 + $0x3] ss:$4 sm:$0xff] %v235_v42  ;;  %v175_v34 = vmul.f32 %v2508_v11, %v174_v31  ;;  %vm208_vm10 = vmor %vm206_vm9, %vm207_vm8 }
 0x118   :  { %250 = vst [vmem:[#allocation1 + $0x1] ss:$4 sm:$0xff] %v233_v30  ;;  %v199_v33 = vsel %vm198_vm5, %v2506_v7, %v195_v43  ;;  %v202_v35 = vmul.f32 %v2510_v27, %v201_v32 }
 0x119   :  { %v216_v36 = vmul.f32 %v199_v33, %v2768_v56  ;;  %v179_v38 = vsel %vm178_vm7, %v2508_v11, %v175_v34 }
 0x11a   :  { %v203_v39 = vmul.f32 0.5, %v202_v35  ;;  %v214_v45 = vmul.f32 %v179_v38, %v2757_v46 }
 0x11b   :  { %v227_v44 = vmul.f32 %v2801_v37, %v216_v36 }
 0x11c   :  { %v204_v47 = vsub.f32 1.5, %v203_v39  ;;  %v225_v50 = vmul.f32 %v2801_v37, %v214_v45 }
 0x11d   :  { %v238_v49 = vadd.f32 %v2813_v48, %v227_v44 }
 0x11e   :  { %v205_v51 = vmul.f32 %v2510_v27, %v204_v47  ;;  %v236_v40 = vadd.f32 %v2813_v48, %v225_v50 }
 0x11f   :  { %260 = vst [vmem:[#allocation1 + $0x22] ss:$4 sm:$0xff] %v238_v49  ;;  %v263_v54 = vld.sshfl [vmem:[#allocation1] sm:$0xff pattern:$0x73625140] }
 0x120   :  { %v209_v56 = vsel %vm208_vm10, %v2510_v27, %v205_v51  ;;  %256 = vst [vmem:[#allocation1 + $0x20] ss:$4 sm:$0xff] %v236_v40 }
 0x121   :  { %v217_v52 = vmul.f32 %v209_v56, %v2770_v57 }
 0x123   :  { %v228_v53 = vmul.f32 %v2801_v37, %v217_v52 }
 0x125   :  { %v239_v46 = vadd.f32 %v2813_v48, %v228_v53 }
 0x127   :  { %262 = vst [vmem:[#allocation1 + $0x23] ss:$4 sm:$0xff] %v239_v46 }
 0x12e   :  { %v264_v55 = vld.sshfl [vmem:[#allocation1 + $0x20] sm:$0xff pattern:$0x73625140] }
 0x12f   :  { %v267_v58 = vpack.c.bf16 %v264_v55, %v263_v54 }
 0x131   :  { %2397 = vmatmul.msk.bf16.vlgmr.msra.gmra.mxu0 %vm284_vm11, %v267_v58 }
 0x1ae   :  { %v297_v59 = vpop.f32.mrf.mxu0 }
 0x1af   :  { %v304_v28 = vrot.slane %v297_v59, 2  ;;  %v305_v60 = vrot.slane %v297_v59, 4  ;;  %v2877_v63 = vpack.c.bf16 %v297_v59, %v297_v59  ;;  %v306_v7 = vrot.slane %v297_v59, 6 }
 0x1b1   :  { %v2874_v61 = vpack.c.bf16 %v304_v28, %v304_v28  ;;  %v318_v29 = vpack.c.bf16 %v305_v60, %v305_v60  ;;  %v325_v3 = vunpack.c.l.b16 %v2877_v63  ;;  %v2899_v14 = vpack.c.bf16 %v306_v7, %v306_v7 }
 0x1b3   :  { %v350_v62 = vunpack.c.l.b16 %v2874_v61  ;;  %v374_v57 = vunpack.c.l.b16 %v318_v29  ;;  %v2889_v9 = vpack.c.b16 %v325_v3, %v325_v3  ;;  %v398_v18 = vunpack.c.l.b16 %v2899_v14 }
 0x1b5   :  { %v2879_v37 = vpack.c.b16 %v350_v62, %v350_v62  ;;  %v2881_v48 = vpack.c.b16 %v374_v57, %v374_v57  ;;  %v2911_v20 = vpack.c.b16 %v398_v18, %v398_v18 }
 0x1b6   :  { %v299_v0 = vpop.f32.mrf.mxu0 }
 0x1b7   :  { %v307_v1 = vrot.slane %v299_v0, 2  ;;  %v308_v2 = vrot.slane %v299_v0, 4  ;;  %376 = vrot.lane.b32.xlu2 %v2881_v48, %s2648_s3  ;;  %352 = vrot.lane.b32.xlu1 %v2879_v37, %s2648_s3  ;;  %v309_v4 = vrot.slane %v299_v0, 6  ;;  %v2891_v10 = vpack.c.bf16 %v299_v0, %v299_v0 }
 0x1b9   :  { %v2886_v5 = vpack.c.bf16 %v307_v1, %v307_v1  ;;  %v322_v6 = vpack.c.bf16 %v308_v2, %v308_v2  ;;  %v2893_v11 = vpack.c.bf16 %v309_v4, %v309_v4  ;;  %v422_v15 = vunpack.c.l.b16 %v2891_v10 }
 0x1bb   :  { %v446_v22 = vunpack.c.l.b16 %v2886_v5  ;;  %v470_v8 = vunpack.c.l.b16 %v322_v6  ;;  %v494_v17 = vunpack.c.l.b16 %v2893_v11  ;;  %v2907_v16 = vpack.c.b16 %v422_v15, %v422_v15 }
 0x1bd   :  { %v2895_v12 = vpack.c.b16 %v446_v22, %v446_v22  ;;  %v2897_v13 = vpack.c.b16 %v470_v8, %v470_v8  ;;  %v2909_v19 = vpack.c.b16 %v494_v17, %v494_v17 }
 0x1bf   :  { %327 = vrot.lane.b32.xlu1 %v2889_v9, %s2648_s3  ;;  %472 = vrot.lane.b32.xlu2 %v2897_v13, %s2648_s3 }
 0x1c0   :  { %448 = vrot.lane.b32.xlu0 %v2895_v12, %s2648_s3 }
 0x1c7   :  { %496 = vrot.lane.b32.xlu1 %v2909_v19, %s2648_s3  ;;  %424 = vrot.lane.b32.xlu2 %v2907_v16, %s2648_s3 }
 0x1c8   :  { %400 = vrot.lane.b32.xlu0 %v2911_v20, %s2648_s3 }
 0x1cf   :  { %666 = vrot.lane.b32.xlu1 %v2881_v48, %s2649_s19  ;;  %645 = vrot.lane.b32.xlu2 %v2879_v37, %s2649_s19 }
 0x1d0   :  { %817 = vrot.lane.b32.xlu0 %v2879_v37, %s2650_s20 }
 0x1d7   :  { %622 = vrot.lane.b32.xlu1 %v2889_v9, %s2649_s19  ;;  %815 = vrot.lane.b32.xlu2 %v2879_v37, %s2651_s21 }
 0x1d8   :  { %750 = vrot.lane.b32.xlu0 %v2897_v13, %s2649_s19 }
 0x1df   :  { %687 = vrot.lane.b32.xlu1 %v2911_v20, %s2649_s19  ;;  %838 = vrot.lane.b32.xlu2 %v2881_v48, %s2651_s21 }
 0x1e0   :  { %771 = vrot.lane.b32.xlu0 %v2909_v19, %s2649_s19 }
 0x1e7   :  { %840 = vrot.lane.b32.xlu1 %v2881_v48, %s2650_s20  ;;  %708 = vrot.lane.b32.xlu2 %v2907_v16, %s2649_s19 }
 0x1ef   :  { %932 = vrot.lane.b32.xlu2 %v2897_v13, %s2650_s20  ;;  %729 = vrot.lane.b32.xlu1 %v2895_v12, %s2649_s19 }
 0x1f7   :  { %909 = vrot.lane.b32.xlu1 %v2895_v12, %s2650_s20 }
 0x211   :  { %v377_v41 = vpop.permute.xlu2 %376 }
 0x212   :  { %v382_v21 = vsel %vm329_vm12, %v377_v41, 0 }
 0x213   :  { %391 = vmatpush.bf16.xpose.msra.mxu3 %v382_v21 }
 0x219   :  { %v473_v23 = vpop.permute.xlu2 %472 }
 0x21a   :  { %2400 = vmatmul.msk.bf16.vlgmr.msra.gmra.mxu3 %vm329_vm12, %v318_v29  ;;  %v478_v24 = vsel %vm329_vm12, %v473_v23, 0 }
 0x21b   :  { %487 = vmatpush.bf16.xpose.msrb.mxu3 %v478_v24 }
 0x221   :  { %v425_v42 = vpop.permute.xlu2 %424 }
 0x222   :  { %v430_v33 = vsel %vm329_vm12, %v425_v42, 0 }
 0x229   :  { %v353_v25 = vpop.permute.xlu1 %352  ;;  %v646_v26 = vpop.permute.xlu2 %645 }
 0x22a   :  { %2404 = vmatmul.msk.bf16.vlgmr.msrb.gmra.mxu3 %vm329_vm12, %v322_v6  ;;  %v358_v27 = vsel %vm329_vm12, %v353_v25, 0  ;;  %v651_v34 = vsel %vm628_vm13, %v646_v26, 0 }
 0x22b   :  { %367 = vmatpush.bf16.xpose.msra.mxu2 %v358_v27 }
 0x231   :  { %v328_v30 = vpop.permute.xlu1 %327  ;;  %v2947_v35 = vpop.permute.xlu2 %815 }
 0x232   :  { %v449_v43 = vpop.permute.xlu0 %448  ;;  %2399 = vmatmul.msk.bf16.vlgmr.msra.gmra.mxu2 %vm329_vm12, %v2874_v61  ;;  %v334_v31 = vsel %vm329_vm12, %v328_v30, 0 }
 0x233   :  { %343 = vmatpush.bf16.xpose.msra.mxu1 %v334_v31  ;;  %v454_v32 = vsel %vm329_vm12, %v449_v43, 0 }
 0x234   :  { %463 = vmatpush.bf16.xpose.msrb.mxu2 %v454_v32 }
 0x239   :  { %v497_v36 = vpop.permute.xlu1 %496  ;;  %v2953_v45 = vpop.permute.xlu2 %838 }
 0x23a   :  { %v502_v38 = vsel %vm329_vm12, %v497_v36, 0  ;;  %v401_v39 = vpop.permute.xlu0 %400  ;;  %2398 = vmatmul.msk.bf16.vlgmr.msra.gmra.mxu1 %vm329_vm12, %v2877_v63 }
 0x23b   :  { %439 = vmatpush.bf16.xpose.msrb.mxu1 %v430_v33  ;;  %v406_v44 = vsel %vm329_vm12, %v401_v39, 0 }
 0x23c   :  { %660 = vmatpush.bf16.msra.mxu2 %v651_v34  ;;  %415 = vmatpush.bf16.xpose.msrb.mxu0 %v406_v44 }
 0x241   :  { %v667_v47 = vpop.permute.xlu1 %666  ;;  %v709_v51 = vpop.permute.xlu2 %708 }
 0x242   :  { %v672_v49 = vsel %vm628_vm13, %v667_v47, 0  ;;  %v2956_v50 = vpop.permute.xlu0 %817  ;;  %2403 = vmatmul.msk.bf16.vlgmr.msrb.gmra.mxu2 %vm329_vm12, %v2886_v5  ;;  %v714_v53 = vsel %vm628_vm13, %v709_v51, 0 }
 0x243   :  { %2401 = vmatmul.msk.bf16.vlgmr.msrb.gmra.mxu0 %vm329_vm12, %v2899_v14  ;;  %681 = vmatpush.bf16.msra.mxu3 %v672_v49 }
 0x244   :  { %511 = vmatpush.bf16.xpose.msra.mxu0 %v502_v38 }
 0x249   :  { %v623_v40 = vpop.permute.xlu1 %622  ;;  %v2992_v33 = vpop.permute.xlu2 %932 }
 0x24a   :  { %v630_v56 = vsel %vm628_vm13, %v623_v40, 0  ;;  %v751_v52 = vpop.permute.xlu0 %750  ;;  %2402 = vmatmul.msk.bf16.vlgmr.msrb.gmra.mxu1 %vm329_vm12, %v2891_v10 }
 0x24b   :  { %v756_v46 = vsel %vm628_vm13, %v751_v52, 0  ;;  %639 = vmatpush.bf16.msra.mxu1 %v630_v56 }
 0x24c   :  { %765 = vmatpush.bf16.msrb.mxu3 %v756_v46 }
 0x24f   :  { %723 = vmatpush.bf16.msrb.mxu1 %v714_v53 }
 0x251   :  { %v688_v54 = vpop.permute.xlu1 %687 }
 0x252   :  { %v693_v55 = vsel %vm628_vm13, %v688_v54, 0  ;;  %v772_v58 = vpop.permute.xlu0 %771 }
 0x253   :  { %v777_v59 = vsel %vm628_vm13, %v772_v58, 0  ;;  %2405 = vmatmul.msk.bf16.vlgmr.msra.gmra.mxu0 %vm329_vm12, %v2893_v11 }
 0x254   :  { %702 = vmatpush.bf16.msrb.mxu0 %v693_v55 }
 0x258   :  { %786 = vmatpush.bf16.msra.mxu0 %v777_v59 }
 0x259   :  { %v2971_v28 = vpop.permute.xlu1 %840 }
 0x261   :  { %v730_v60 = vpop.permute.xlu1 %729 }
 0x262   :  { %v735_v61 = vsel %vm628_vm13, %v730_v60, 0 }
 0x263   :  { %744 = vmatpush.bf16.msrb.mxu2 %v735_v61 }
 0x269   :  { %v2994_v39 = vpop.permute.xlu1 %909 }
 0x29d   :  { %v393_v29 = vpop.f32.mrf.mxu3 }
 0x29e   :  { %v519_v7 = vmul.f32 0.35355338, %v393_v29 }
 0x2a0   :  { %v532_v11 = vsel %vm525_vm14, %v519_v7, -inf }
 0x2a5   :  { %v395_v62 = vpop.f32.mrf.mxu3 }
 0x2ad   :  { %v489_v57 = vpop.f32.mrf.mxu3 }
 0x2ae   :  { %v2988_v31 = vmul.f32 0.35355338, %v489_v57 }
 0x2b0   :  { %v544_v32 = vsel %vm525_vm14, %v2988_v31, -inf }
 0x2b5   :  { %v369_v63 = vpop.f32.mrf.mxu2  ;;  %v491_v0 = vpop.f32.mrf.mxu3 }
 0x2b6   :  { %v518_v1 = vmul.f32 0.35355338, %v369_v63 }
 0x2b7   :  { %v345_v2 = vpop.f32.mrf.mxu1 }
 0x2b8   :  { %v517_v3 = vmul.f32 0.35355338, %v345_v2  ;;  %v529_v4 = vsel %vm525_vm14, %v518_v1, -inf }
 0x2b9   :  { %530 = vmax.xlane.f32.xlu0 %v529_v4 }
 0x2ba   :  { %v526_v5 = vsel %vm525_vm14, %v517_v3, -inf }
 0x2bb   :  { %527 = vmax.xlane.f32.xlu2 %v526_v5 }
 0x2bd   :  { %v371_v6 = vpop.f32.mrf.mxu2 }
 0x2bf   :  { %v347_v22 = vpop.f32.mrf.mxu1 }
 0x2c0   :  { %v417_v8 = vpop.f32.mrf.mxu0 }
 0x2c1   :  { %v520_v10 = vmul.f32 0.35355338, %v417_v8 }
 0x2c3   :  { %533 = vmax.xlane.f32.xlu2 %v532_v11  ;;  %v535_v14 = vsel %vm525_vm14, %v520_v10, -inf }
 0x2c4   :  { %536 = vmax.xlane.f32.xlu1 %v535_v14 }
 0x2c5   :  { %v465_v15 = vpop.f32.mrf.mxu2 }
 0x2c6   :  { %v2978_v17 = vmul.f32 0.35355338, %v465_v15 }
 0x2c7   :  { %v441_v18 = vpop.f32.mrf.mxu1 }
 0x2c8   :  { %v419_v41 = vpop.f32.mrf.mxu0  ;;  %v521_v21 = vmul.f32 0.35355338, %v441_v18  ;;  %v541_v24 = vsel %vm525_vm14, %v2978_v17, -inf }
 0x2ca   :  { %v538_v23 = vsel %vm525_vm14, %v521_v21, -inf }
 0x2cb   :  { %539 = vmax.xlane.f32.xlu0 %v538_v23 }
 0x2cc   :  { %542 = vmax.xlane.f32.xlu1 %v541_v24 }
 0x2cd   :  { %v467_v42 = vpop.f32.mrf.mxu2 }
 0x2cf   :  { %v443_v25 = vpop.f32.mrf.mxu1 }
 0x2d0   :  { %v513_v26 = vpop.f32.mrf.mxu0  ;;  %v823_v25 = vsel %vm329_vm12, %v2956_v50, 0 }
 0x2d1   :  { %v524_v27 = vmul.f32 0.35355338, %v513_v26 }
 0x2d3   :  { %v547_v30 = vsel %vm525_vm14, %v524_v27, -inf }
 0x2d4   :  { %548 = vmax.xlane.f32.xlu2 %v547_v30 }
 0x2d8   :  { %v515_v43 = vpop.f32.mrf.mxu0 }
 0x2df   :  { %863 = vrot.lane.b32.xlu0 %v2911_v20, %s2650_s20 }
 0x2ec   :  { %794 = vrot.lane.b32.xlu2 %v2889_v9, %s2650_s20 }
 0x309   :  { %545 = vmax.xlane.f32.xlu0 %v544_v32 }
 0x32c   :  { %v531_v34 = vpop.xlane.xlu0 %530 }
 0x32d   :  { %v551_v36 = vsub.f32 %v518_v1, %v531_v34 }
 0x32e   :  { %v528_v38 = vpop.xlane.xlu2 %527 }
 0x32f   :  { %v560_v44 = vmul.f32 1.442695, %v551_v36  ;;  %v550_v47 = vsub.f32 %v517_v3, %v528_v38 }
 0x331   :  { %2511 = vpow2.f32 %v560_v44  ;;  %v558_v49 = vmul.f32 1.442695, %v550_v47 }
 0x333   :  { %2513 = vpow2.f32 %v558_v49 }
 0x336   :  { %v534_v59 = vpop.xlane.xlu2 %533 }
 0x337   :  { %v2996_v51 = vpop.eup %2511  ;;  %v537_v40 = vpop.xlane.xlu1 %536  ;;  %v552_v60 = vsub.f32 %v519_v7, %v534_v59 }
 0x338   :  { %v553_v56 = vsub.f32 %v520_v10, %v537_v40  ;;  %v577_v52 = vsel %vm525_vm14, %v2996_v51, 0.0 }
 0x339   :  { %v3000_v53 = vpop.eup %2513  ;;  %578 = vadd.xlane.f32.xlu1 %v577_v52  ;;  %v562_v62 = vmul.f32 1.442695, %v552_v60  ;;  %v846_v60 = vsel %vm329_vm12, %v2971_v28, 0 }
 0x33a   :  { %v564_v46 = vmul.f32 1.442695, %v553_v56  ;;  %v574_v54 = vsel %vm525_vm14, %v3000_v53, 0.0 }
 0x33b   :  { %575 = vadd.xlane.f32.xlu0 %v574_v54 }
 0x33c   :  { %2515 = vpow2.f32 %v564_v46 }
 0x33d   :  { %2517 = vpow2.f32 %v562_v62 }
 0x33e   :  { %v540_v57 = vpop.xlane.xlu0 %539 }
 0x33f   :  { %v554_v0 = vsub.f32 %v521_v21, %v540_v57  ;;  %v543_v8 = vpop.xlane.xlu1 %542 }
 0x340   :  { %v555_v30 = vsub.f32 %v2978_v17, %v543_v8 }
 0x341   :  { %v566_v1 = vmul.f32 1.442695, %v554_v0 }
 0x342   :  { %v3004_v55 = vpop.eup %2515  ;;  %v568_v34 = vmul.f32 1.442695, %v555_v30 }
 0x343   :  { %v583_v58 = vsel %vm525_vm14, %v3004_v55, 0.0  ;;  %v3020_v2 = vpop.eup %2517 }
 0x344   :  { %584 = vadd.xlane.f32.xlu2 %v583_v58  ;;  %v580_v4 = vsel %vm525_vm14, %v3020_v2, 0.0 }
 0x347   :  { %v549_v61 = vpop.xlane.xlu2 %548 }
 0x348   :  { %v557_v29 = vsub.f32 %v524_v27, %v549_v61 }
 0x34a   :  { %v572_v63 = vmul.f32 1.442695, %v557_v29 }
 0x34c   :  { %2519 = vpow2.f32 %v572_v63 }
 0x34d   :  { %2521 = vpow2.f32 %v566_v1 }
 0x34f   :  { %792 = vrot.lane.b32.xlu0 %v2889_v9, %s2651_s21  ;;  %v795_v15 = vpop.permute.xlu2 %794 }
 0x350   :  { %v800_v27 = vsel %vm329_vm12, %v795_v15, 0 }
 0x351   :  { %v864_v22 = vpop.permute.xlu0 %863 }
 0x352   :  { %930 = vrot.lane.b32.xlu1 %v2897_v13, %s2651_s21  ;;  %v3022_v3 = vpop.eup %2519  ;;  %v869_v36 = vsel %vm329_vm12, %v864_v22, 0 }
 0x353   :  { %v595_v5 = vsel %vm525_vm14, %v3022_v3, 0.0  ;;  %v3030_v6 = vpop.eup %2521 }
 0x354   :  { %v586_v7 = vsel %vm525_vm14, %v3030_v6, 0.0 }
 0x35c   :  { %907 = vrot.lane.b32.xlu2 %v2895_v12, %s2651_s21 }
 0x364   :  { %861 = vrot.lane.b32.xlu2 %v2911_v20, %s2651_s21 }
 0x36c   :  { %884 = vrot.lane.b32.xlu2 %v2907_v16, %s2651_s21 }
 0x374   :  { %1101 = vrot.lane.b32.xlu2 %v2879_v37, %s2652_s22 }
 0x379   :  { %581 = vadd.xlane.f32.xlu0 %v580_v4 }
 0x37c   :  { %1273 = vrot.lane.b32.xlu2 %v2879_v37, %s2653_s23  ;;  %596 = vadd.xlane.f32.xlu1 %v595_v5  ;;  %v546_v10 = vpop.xlane.xlu0 %545 }
 0x37d   :  { %v556_v38 = vsub.f32 %v2988_v31, %v546_v10 }
 0x37f   :  { %v570_v17 = vmul.f32 1.442695, %v556_v38 }
 0x381   :  { %587 = vadd.xlane.f32.xlu0 %v586_v7 }
 0x384   :  { %1296 = vrot.lane.b32.xlu2 %v2881_v48, %s2653_s23 }
 0x38c   :  { %1271 = vrot.lane.b32.xlu2 %v2879_v37, %s2654_s24 }
 0x394   :  { %1294 = vrot.lane.b32.xlu2 %v2881_v48, %s2654_s24 }
 0x395   :  { %886 = vrot.lane.b32.xlu1 %v2907_v16, %s2650_s20  ;;  %955 = vrot.lane.b32.xlu0 %v2909_v19, %s2650_s20 }
 0x39d   :  { %953 = vrot.lane.b32.xlu1 %v2909_v19, %s2651_s21  ;;  %1185 = vrot.lane.b32.xlu0 %v2895_v12, %s2652_s22 }
 0x3a5   :  { %1122 = vrot.lane.b32.xlu1 %v2881_v48, %s2652_s22  ;;  %1164 = vrot.lane.b32.xlu0 %v2907_v16, %s2652_s22 }
 0x3ac   :  { %v579_v11 = vpop.xlane.xlu1 %578 }
 0x3ad   :  { %2523 = vrcp.f32 %v579_v11  ;;  %1206 = vrot.lane.b32.xlu1 %v2897_v13, %s2652_s22 }
 0x3ae   :  { %v576_v14 = vpop.xlane.xlu0 %575 }
 0x3af   :  { %2525 = vrcp.f32 %v576_v14 }
 0x3b3   :  { %v2524_v18 = vpop.eup %2523 }
 0x3b4   :  { %v607_v41 = vmul.f32 %v2524_v18, %v2996_v51 }
 0x3b5   :  { %v2526_v21 = vpop.eup %2525  ;;  %1080 = vrot.lane.b32.xlu1 %v2889_v9, %s2652_s22 }
 0x3b6   :  { %v615_v23 = vpack.c.bf16 %v607_v41, %v607_v41  ;;  %v606_v24 = vmul.f32 %v2526_v21, %v3000_v53 }
 0x3b7   :  { %v585_v42 = vpop.xlane.xlu2 %584 }
 0x3b8   :  { %v614_v26 = vpack.c.bf16 %v606_v24, %v606_v24  ;;  %2527 = vrcp.f32 %v585_v42  ;;  %2407 = vmatmul.msk.bf16.vlgmr.msra.gmra.mxu2 %vm624_vm15, %v615_v23 }
 0x3b9   :  { %832 = vmatpush.bf16.xpose.msra.mxu2 %v823_v25  ;;  %2529 = vpow2.f32 %v568_v34 }
 0x3ba   :  { %2406 = vmatmul.msk.bf16.vlgmr.msra.gmra.mxu1 %vm624_vm15, %v614_v26  ;;  %2531 = vpow2.f32 %v570_v17 }
 0x3bb   :  { %809 = vmatpush.bf16.xpose.msra.mxu1 %v800_v27 }
 0x3bd   :  { %1143 = vrot.lane.b32.xlu1 %v2911_v20, %s2652_s22 }
 0x3be   :  { %v2528_v43 = vpop.eup %2527 }
 0x3bf   :  { %v609_v32 = vmul.f32 %v2528_v43, %v3004_v55  ;;  %v3072_v44 = vpop.eup %2529  ;;  %v908_v63 = vpop.permute.xlu2 %907 }
 0x3c0   :  { %v589_v47 = vsel %vm525_vm14, %v3072_v44, 0.0  ;;  %v3076_v49 = vpop.eup %2531 }
 0x3c1   :  { %v617_v50 = vpack.c.bf16 %v609_v32, %v609_v32  ;;  %v592_v51 = vsel %vm525_vm14, %v3076_v49, 0.0  ;;  %v793_v40 = vpop.permute.xlu0 %792 }
 0x3c3   :  { %2409 = vmatmul.msk.bf16.vlgmr.msrb.gmra.mxu0 %vm624_vm15, %v617_v50 }
 0x3c4   :  { %878 = vmatpush.bf16.xpose.msrb.mxu0 %v869_v36  ;;  %v3080_v56 = vpop.permute.xlu1 %930  ;;  %v915_v36 = vsel %vm329_vm12, %v2994_v39, 0 }
 0x3c5   :  { %1227 = vrot.lane.b32.xlu1 %v2909_v19, %s2652_s22 }
 0x3c7   :  { %v862_v28 = vpop.permute.xlu2 %861 }
 0x3cf   :  { %590 = vadd.xlane.f32.xlu0 %v589_v47  ;;  %v885_v7 = vpop.permute.xlu2 %884 }
 0x3d7   :  { %593 = vadd.xlane.f32.xlu0 %v592_v51  ;;  %v938_v51 = vsel %vm329_vm12, %v2992_v33, 0 }
 0x3eb   :  { %1365 = vrot.lane.b32.xlu0 %v2895_v12, %s2653_s23 }
 0x3ec   :  { %v582_v31 = vpop.xlane.xlu0 %581 }
 0x3ed   :  { %2533 = vrcp.f32 %v582_v31 }
 0x3ef   :  { %v597_v52 = vpop.xlane.xlu1 %596 }
 0x3f0   :  { %2535 = vrcp.f32 %v597_v52 }
 0x3f3   :  { %v2534_v53 = vpop.eup %2533 }
 0x3f4   :  { %v608_v46 = vmul.f32 %v2534_v53, %v3020_v2  ;;  %v588_v54 = vpop.xlane.xlu0 %587 }
 0x3f5   :  { %2537 = vrcp.f32 %v588_v54 }
 0x3f6   :  { %v2536_v55 = vpop.eup %2535  ;;  %v616_v58 = vpack.c.bf16 %v608_v46, %v608_v46 }
 0x3f7   :  { %v613_v59 = vmul.f32 %v2536_v55, %v3022_v3 }
 0x3f8   :  { %2408 = vmatmul.msk.bf16.vlgmr.msra.gmra.mxu3 %vm624_vm15, %v616_v58 }
 0x3f9   :  { %v621_v61 = vpack.c.bf16 %v613_v59, %v613_v59  ;;  %855 = vmatpush.bf16.xpose.msra.mxu3 %v846_v60 }
 0x3fb   :  { %v2538_v29 = vpop.eup %2537  ;;  %2413 = vmatmul.msk.bf16.vlgmr.msra.gmra.mxu0 %vm624_vm15, %v621_v61 }
 0x3fc   :  { %v610_v62 = vmul.f32 %v2538_v29, %v3030_v6 }
 0x3fe   :  { %v618_v57 = vpack.c.bf16 %v610_v62, %v610_v62 }
 0x400   :  { %2410 = vmatmul.msk.bf16.vlgmr.msrb.gmra.mxu1 %vm624_vm15, %v618_v57 }
 0x407   :  { %v887_v0 = vpop.permute.xlu1 %886  ;;  %v956_v1 = vpop.permute.xlu0 %955 }
 0x408   :  { %v892_v2 = vsel %vm329_vm12, %v887_v0, 0  ;;  %v961_v3 = vsel %vm329_vm12, %v956_v1, 0 }
 0x409   :  { %901 = vmatpush.bf16.xpose.msrb.mxu1 %v892_v2  ;;  %970 = vmatpush.bf16.xpose.msra.mxu0 %v961_v3 }
 0x40b   :  { %2417 = vmatmul.msk.bf16.vlgmr.msrb.gmra.mxu0 %vm329_vm12, %v862_v28 }
 0x40f   :  { %v954_v4 = vpop.permute.xlu1 %953  ;;  %v1186_v6 = vpop.permute.xlu0 %1185 }
 0x410   :  { %2414 = vmatmul.msk.bf16.vlgmr.msra.gmra.mxu1 %vm329_vm12, %v793_v40 }
 0x417   :  { %v1123_v5 = vpop.permute.xlu1 %1122  ;;  %v1165_v8 = vpop.permute.xlu0 %1164 }
 0x418   :  { %v1170_v14 = vsel %vm628_vm13, %v1165_v8, 0  ;;  %v1128_v39 = vsel %vm628_vm13, %v1123_v5, 0 }
 0x41b   :  { %2421 = vmatmul.msk.bf16.vlgmr.msra.gmra.mxu0 %vm329_vm12, %v954_v4 }
 0x41f   :  { %v1207_v22 = vpop.permute.xlu1 %1206 }
 0x420   :  { %2418 = vmatmul.msk.bf16.vlgmr.msrb.gmra.mxu1 %vm329_vm12, %v885_v7  ;;  %v1212_v33 = vsel %vm628_vm13, %v1207_v22, 0 }
 0x427   :  { %v1081_v10 = vpop.permute.xlu1 %1080 }
 0x428   :  { %v1086_v11 = vsel %vm628_vm13, %v1081_v10, 0 }
 0x429   :  { %1095 = vmatpush.bf16.msra.mxu1 %v1086_v11 }
 0x42d   :  { %1179 = vmatpush.bf16.msrb.mxu1 %v1170_v14 }
 0x42f   :  { %v1144_v15 = vpop.permute.xlu1 %1143 }
 0x430   :  { %v1149_v18 = vsel %vm628_vm13, %v1144_v15, 0 }
 0x431   :  { %1158 = vmatpush.bf16.msrb.mxu0 %v1149_v18 }
 0x437   :  { %v1228_v41 = vpop.permute.xlu1 %1227  ;;  %v3101_v21 = vpop.f32.mrf.mxu1 }
 0x438   :  { %v1233_v23 = vsel %vm628_vm13, %v1228_v41, 0 }
 0x439   :  { %1242 = vmatpush.bf16.msra.mxu0 %v1233_v23 }
 0x43b   :  { %v3104_v24 = vpop.f32.mrf.mxu2 }
 0x43f   :  { %v643_v42 = vpop.f32.mrf.mxu1 }
 0x440   :  { %v3106_v25 = vpop.f32.mrf.mxu0 }
 0x442   :  { %v591_v26 = vpop.xlane.xlu0 %590 }
 0x443   :  { %2539 = vrcp.f32 %v591_v26  ;;  %v664_v27 = vpop.f32.mrf.mxu2 }
 0x448   :  { %v706_v30 = vpop.f32.mrf.mxu0 }
 0x449   :  { %v2540_v43 = vpop.eup %2539 }
 0x44a   :  { %v611_v32 = vmul.f32 %v2540_v43, %v3072_v44  ;;  %v594_v34 = vpop.xlane.xlu0 %593  ;;  %v1102_v44 = vpop.permute.xlu2 %1101 }
 0x44b   :  { %2541 = vrcp.f32 %v594_v34  ;;  %v1107_v40 = vsel %vm628_vm13, %v1102_v44, 0 }
 0x44c   :  { %v619_v50 = vpack.c.bf16 %v611_v32, %v611_v32 }
 0x44e   :  { %2411 = vmatmul.msk.bf16.vlgmr.msrb.gmra.mxu2 %vm624_vm15, %v619_v50 }
 0x44f   :  { %924 = vmatpush.bf16.xpose.msrb.mxu2 %v915_v36 }
 0x451   :  { %v2542_v38 = vpop.eup %2541 }
 0x452   :  { %v612_v17 = vmul.f32 %v2542_v38, %v3076_v49  ;;  %v1191_v49 = vsel %vm628_vm13, %v1186_v6, 0  ;;  %v3150_v27 = vpop.permute.xlu2 %1273 }
 0x454   :  { %v620_v47 = vpack.c.bf16 %v612_v17, %v612_v17 }
 0x456   :  { %2412 = vmatmul.msk.bf16.vlgmr.msrb.gmra.mxu3 %vm624_vm15, %v620_v47 }
 0x457   :  { %947 = vmatpush.bf16.xpose.msrb.mxu3 %v938_v51 }
 0x45a   :  { %v3154_v34 = vpop.permute.xlu2 %1296 }
 0x45e   :  { %2415 = vmatmul.msk.bf16.vlgmr.msra.gmra.mxu2 %vm329_vm12, %v2947_v35 }
 0x45f   :  { %1116 = vmatpush.bf16.msra.mxu2 %v1107_v40 }
 0x462   :  { %v3156_v50 = vpop.permute.xlu2 %1271 }
 0x466   :  { %2416 = vmatmul.msk.bf16.vlgmr.msra.gmra.mxu3 %vm329_vm12, %v2953_v45 }
 0x467   :  { %1137 = vmatpush.bf16.msra.mxu3 %v1128_v39 }
 0x46a   :  { %v3160_v36 = vpop.permute.xlu2 %1294 }
 0x46e   :  { %2419 = vmatmul.msk.bf16.vlgmr.msrb.gmra.mxu2 %vm329_vm12, %v908_v63 }
 0x46f   :  { %1200 = vmatpush.bf16.msrb.mxu2 %v1191_v49 }
 0x476   :  { %2420 = vmatmul.msk.bf16.vlgmr.msrb.gmra.mxu3 %vm329_vm12, %v3080_v56 }
 0x477   :  { %1221 = vmatpush.bf16.msrb.mxu3 %v1212_v33 }
 0x478   :  { %v3127_v31 = vpop.f32.mrf.mxu0 }
 0x47b   :  { %v3129_v35 = vpop.f32.mrf.mxu3 }
 0x47d   :  { %v3131_v52 = vpop.f32.mrf.mxu1 }
 0x480   :  { %v790_v53 = vpop.f32.mrf.mxu0 }
 0x483   :  { %v685_v45 = vpop.f32.mrf.mxu3 }
 0x485   :  { %v727_v46 = vpop.f32.mrf.mxu1 }
 0x488   :  { %v880_v54 = vpop.f32.mrf.mxu0 }
 0x489   :  { %v979_v55 = vmul.f32 0.35355338, %v880_v54  ;;  %v3172_v54 = vpop.permute.xlu0 %1365 }
 0x48b   :  { %v993_v58 = vsel %vm525_vm14, %v979_v55, -inf }
 0x48c   :  { %994 = vmax.xlane.f32.xlu1 %v993_v58 }
 0x48d   :  { %v811_v59 = vpop.f32.mrf.mxu1 }
 0x48e   :  { %v976_v60 = vmul.f32 0.35355338, %v811_v59 }
 0x490   :  { %v882_v61 = vpop.f32.mrf.mxu0  ;;  %v984_v56 = vsel %vm525_vm14, %v976_v60, -inf }
 0x491   :  { %985 = vmax.xlane.f32.xlu2 %v984_v56 }
 0x495   :  { %v813_v29 = vpop.f32.mrf.mxu1 }
 0x498   :  { %v972_v62 = vpop.f32.mrf.mxu0 }
 0x499   :  { %v3142_v15 = vmul.f32 0.35355338, %v972_v62 }
 0x49b   :  { %v1005_v26 = vsel %vm525_vm14, %v3142_v15, -inf }
 0x49d   :  { %v903_v57 = vpop.f32.mrf.mxu1 }
 0x49e   :  { %v980_v7 = vmul.f32 0.35355338, %v903_v57 }
 0x4a0   :  { %v974_v63 = vpop.f32.mrf.mxu0  ;;  %v996_v11 = vsel %vm525_vm14, %v980_v7, -inf }
 0x4a5   :  { %v905_v0 = vpop.f32.mrf.mxu1 }
 0x4d1   :  { %v3135_v1 = vpop.f32.mrf.mxu2 }
 0x4d9   :  { %v748_v2 = vpop.f32.mrf.mxu2  ;;  %v3137_v3 = vpop.f32.mrf.mxu3 }
 0x4e1   :  { %v769_v28 = vpop.f32.mrf.mxu3  ;;  %v834_v4 = vpop.f32.mrf.mxu2 }
 0x4e2   :  { %v977_v5 = vmul.f32 0.35355338, %v834_v4 }
 0x4e4   :  { %v987_v6 = vsel %vm525_vm14, %v977_v5, -inf }
 0x4e5   :  { %988 = vmax.xlane.f32.xlu0 %v987_v6 }
 0x4e9   :  { %v836_v22 = vpop.f32.mrf.mxu2  ;;  %v857_v8 = vpop.f32.mrf.mxu3 }
 0x4ea   :  { %v978_v10 = vmul.f32 0.35355338, %v857_v8 }
 0x4ec   :  { %v990_v14 = vsel %vm525_vm14, %v978_v10, -inf }
 0x4ed   :  { %997 = vmax.xlane.f32.xlu0 %v996_v11  ;;  %991 = vmax.xlane.f32.xlu2 %v990_v14 }
 0x4f1   :  { %v859_v18 = vpop.f32.mrf.mxu3  ;;  %v926_v41 = vpop.f32.mrf.mxu2 }
 0x4f2   :  { %v3144_v23 = vmul.f32 0.35355338, %v926_v41 }
 0x4f4   :  { %v999_v42 = vsel %vm525_vm14, %v3144_v23, -inf }
 0x4f5   :  { %1000 = vmax.xlane.f32.xlu1 %v999_v42  ;;  %1006 = vmax.xlane.f32.xlu2 %v1005_v26 }
 0x4f9   :  { %v928_v30 = vpop.f32.mrf.mxu2  ;;  %v949_v43 = vpop.f32.mrf.mxu3 }
 0x4fa   :  { %v3162_v40 = vmul.f32 0.35355338, %v949_v43 }
 0x4fc   :  { %v1002_v49 = vsel %vm525_vm14, %v3162_v40, -inf }
 0x4ff   :  { %v995_v17 = vpop.xlane.xlu1 %994 }
 0x500   :  { %v1011_v51 = vsub.f32 %v979_v55, %v995_v17 }
 0x501   :  { %1250 = vrot.lane.b32.xlu0 %v2889_v9, %s2653_s23  ;;  %v951_v32 = vpop.f32.mrf.mxu3 }
 0x502   :  { %v1022_v39 = vmul.f32 1.442695, %v1011_v51 }
 0x504   :  { %v986_v38 = vpop.xlane.xlu2 %985 }
 0x505   :  { %v1008_v47 = vsub.f32 %v976_v60, %v986_v38 }
 0x507   :  { %v1016_v44 = vmul.f32 1.442695, %v1008_v47 }
 0x509   :  { %2543 = vpow2.f32 %v1016_v44 }
 0x50a   :  { %2545 = vpow2.f32 %v1022_v39 }
 0x50d   :  { %1388 = vrot.lane.b32.xlu2 %v2897_v13, %s2653_s23 }
 0x50f   :  { %v2544_v33 = vpop.eup %2543 }
 0x510   :  { %v2546_v53 = vpop.eup %2545  ;;  %v1032_v45 = vsel %vm525_vm14, %v2544_v33, 0.0 }
 0x511   :  { %v1041_v46 = vsel %vm525_vm14, %v2546_v53, 0.0 }
 0x52b   :  { %1003 = vmax.xlane.f32.xlu0 %v1002_v49 }
 0x533   :  { %1033 = vadd.xlane.f32.xlu0 %v1032_v45 }
 0x536   :  { %1042 = vadd.xlane.f32.xlu2 %v1041_v46 }
 0x547   :  { %1386 = vrot.lane.b32.xlu0 %v2897_v13, %s2654_s24 }
 0x54e   :  { %1319 = vrot.lane.b32.xlu2 %v2911_v20, %s2653_s23 }
 0x556   :  { %1248 = vrot.lane.b32.xlu2 %v2889_v9, %s2654_s24 }
 0x558   :  { %v989_v55 = vpop.xlane.xlu0 %988 }
 0x559   :  { %v1009_v58 = vsub.f32 %v977_v5, %v989_v55 }
 0x55b   :  { %v1018_v59 = vmul.f32 1.442695, %v1009_v58 }
 0x55d   :  { %2547 = vpow2.f32 %v1018_v59 }
 0x55e   :  { %1411 = vrot.lane.b32.xlu2 %v2909_v19, %s2653_s23 }
 0x560   :  { %v992_v60 = vpop.xlane.xlu2 %991  ;;  %v998_v62 = vpop.xlane.xlu0 %997 }
 0x561   :  { %v1010_v61 = vsub.f32 %v978_v10, %v992_v60  ;;  %v1012_v63 = vsub.f32 %v980_v7, %v998_v62 }
 0x563   :  { %v3178_v56 = vpop.eup %2547  ;;  %v1020_v29 = vmul.f32 1.442695, %v1010_v61  ;;  %v1024_v0 = vmul.f32 1.442695, %v1012_v63 }
 0x564   :  { %v1035_v57 = vsel %vm525_vm14, %v3178_v56, 0.0 }
 0x565   :  { %1036 = vadd.xlane.f32.xlu1 %v1035_v57  ;;  %2549 = vpow2.f32 %v1020_v29  ;;  %v1279_v29 = vsel %vm329_vm12, %v3150_v27, 0 }
 0x566   :  { %1578 = vrot.lane.b32.xlu2 %v2881_v48, %s2655_s25  ;;  %2551 = vpow2.f32 %v1024_v0 }
 0x568   :  { %v1007_v6 = vpop.xlane.xlu2 %1006  ;;  %v1001_v26 = vpop.xlane.xlu1 %1000 }
 0x569   :  { %v1015_v7 = vsub.f32 %v3142_v15, %v1007_v6  ;;  %v1013_v15 = vsub.f32 %v3144_v23, %v1001_v26  ;;  %v1302_v6 = vsel %vm329_vm12, %v3154_v34, 0 }
 0x56b   :  { %v3184_v2 = vpop.eup %2549  ;;  %v1030_v8 = vmul.f32 1.442695, %v1015_v7  ;;  %v1026_v17 = vmul.f32 1.442695, %v1013_v15 }
 0x56c   :  { %v1038_v28 = vsel %vm525_vm14, %v3184_v2, 0.0  ;;  %v3190_v4 = vpop.eup %2551 }
 0x56d   :  { %v1044_v5 = vsel %vm525_vm14, %v3190_v4, 0.0  ;;  %2553 = vpow2.f32 %v1030_v8 }
 0x56e   :  { %1536 = vrot.lane.b32.xlu2 %v2889_v9, %s2655_s25 }
 0x570   :  { %v3203_v11 = vpop.permute.xlu2 %1388 }
 0x571   :  { %1039 = vadd.xlane.f32.xlu0 %v1038_v28 }
 0x573   :  { %v1251_v22 = vpop.permute.xlu0 %1250  ;;  %v3205_v14 = vpop.eup %2553 }
 0x574   :  { %v1053_v41 = vsel %vm525_vm14, %v3205_v14, 0.0  ;;  %v1256_v51 = vsel %vm329_vm12, %v1251_v22, 0 }
 0x576   :  { %1641 = vrot.lane.b32.xlu2 %v2895_v12, %s2655_s25 }
 0x579   :  { %1045 = vadd.xlane.f32.xlu0 %v1044_v5 }
 0x57e   :  { %1363 = vrot.lane.b32.xlu1 %v2895_v12, %s2654_s24 }
 0x58d   :  { %1342 = vrot.lane.b32.xlu0 %v2907_v16, %s2653_s23 }
 0x595   :  { %1409 = vrot.lane.b32.xlu0 %v2909_v19, %s2654_s24 }
 0x59e   :  { %v1004_v10 = vpop.xlane.xlu0 %1003 }
 0x59f   :  { %v1014_v49 = vsub.f32 %v3162_v40, %v1004_v10 }
 0x5a1   :  { %v1028_v23 = vmul.f32 1.442695, %v1014_v49 }
 0x5a6   :  { %v1034_v18 = vpop.xlane.xlu0 %1033 }
 0x5a7   :  { %2555 = vrcp.f32 %v1034_v18 }
 0x5a8   :  { %1054 = vadd.xlane.f32.xlu1 %v1053_v41 }
 0x5a9   :  { %v1043_v42 = vpop.xlane.xlu2 %1042 }
 0x5aa   :  { %2557 = vrcp.f32 %v1043_v42 }
 0x5ab   :  { %2559 = vpow2.f32 %v1026_v17 }
 0x5ac   :  { %2561 = vpow2.f32 %v1028_v23 }
 0x5ad   :  { %v2556_v30 = vpop.eup %2555 }
 0x5ae   :  { %v1064_v43 = vmul.f32 %v2556_v30, %v2544_v33 }
 0x5b0   :  { %v2558_v32 = vpop.eup %2557  ;;  %v1072_v38 = vpack.c.bf16 %v1064_v43, %v1064_v43 }
 0x5b1   :  { %v1067_v47 = vmul.f32 %v2558_v32, %v2546_v53  ;;  %v1320_v44 = vpop.permute.xlu2 %1319  ;;  %v2560_v33 = vpop.eup %2559 }
 0x5b2   :  { %2422 = vmatmul.msk.bf16.vlgmr.msra.gmra.mxu1 %vm624_vm15, %v1072_v38  ;;  %v1325_v45 = vsel %vm329_vm12, %v1320_v44, 0  ;;  %v1047_v53 = vsel %vm525_vm14, %v2560_v33, 0.0  ;;  %v3218_v46 = vpop.eup %2561 }
 0x5b3   :  { %v1075_v39 = vpack.c.bf16 %v1067_v47, %v1067_v47  ;;  %1265 = vmatpush.bf16.xpose.msra.mxu1 %v1256_v51  ;;  %v1050_v55 = vsel %vm525_vm14, %v3218_v46, 0.0 }
 0x5b5   :  { %2425 = vmatmul.msk.bf16.vlgmr.msrb.gmra.mxu0 %vm624_vm15, %v1075_v39 }
 0x5b6   :  { %1334 = vmatpush.bf16.xpose.msrb.mxu0 %v1325_v45 }
 0x5b9   :  { %v3228_v58 = vpop.permute.xlu0 %1386  ;;  %v1249_v57 = vpop.permute.xlu2 %1248 }
 0x5bf   :  { %1048 = vadd.xlane.f32.xlu0 %v1047_v53  ;;  %v1371_v53 = vsel %vm329_vm12, %v3172_v54, 0 }
 0x5c1   :  { %1317 = vrot.lane.b32.xlu1 %v2911_v20, %s2654_s24 }
 0x5c7   :  { %1051 = vadd.xlane.f32.xlu0 %v1050_v55 }
 0x5c9   :  { %1340 = vrot.lane.b32.xlu1 %v2907_v16, %s2654_s24 }
 0x5d1   :  { %1557 = vrot.lane.b32.xlu1 %v2879_v37, %s2655_s25 }
 0x5d8   :  { %v1037_v40 = vpop.xlane.xlu1 %1036 }
 0x5d9   :  { %2563 = vrcp.f32 %v1037_v40 }
 0x5db   :  { %1599 = vrot.lane.b32.xlu0 %v2911_v20, %s2655_s25 }
 0x5df   :  { %v2564_v59 = vpop.eup %2563 }
 0x5e0   :  { %v1065_v60 = vmul.f32 %v2564_v59, %v3178_v56  ;;  %v1412_v56 = vpop.permute.xlu2 %1411 }
 0x5e1   :  { %v1417_v15 = vsel %vm329_vm12, %v1412_v56, 0 }
 0x5e2   :  { %v1073_v61 = vpack.c.bf16 %v1065_v60, %v1065_v60 }
 0x5e4   :  { %2423 = vmatmul.msk.bf16.vlgmr.msra.gmra.mxu2 %vm624_vm15, %v1073_v61  ;;  %v1040_v62 = vpop.xlane.xlu0 %1039 }
 0x5e5   :  { %1288 = vmatpush.bf16.xpose.msra.mxu2 %v1279_v29  ;;  %2565 = vrcp.f32 %v1040_v62 }
 0x5e8   :  { %v1579_v8 = vpop.permute.xlu2 %1578 }
 0x5eb   :  { %v2566_v63 = vpop.eup %2565 }
 0x5ec   :  { %v1066_v0 = vmul.f32 %v2566_v63, %v3184_v2  ;;  %v1046_v28 = vpop.xlane.xlu0 %1045 }
 0x5ed   :  { %2567 = vrcp.f32 %v1046_v28 }
 0x5ee   :  { %v1074_v5 = vpack.c.bf16 %v1066_v0, %v1066_v0 }
 0x5f0   :  { %2424 = vmatmul.msk.bf16.vlgmr.msra.gmra.mxu3 %vm624_vm15, %v1074_v5  ;;  %v1537_v18 = vpop.permute.xlu2 %1536  ;;  %v1364_v34 = vpop.permute.xlu1 %1363 }
 0x5f1   :  { %1311 = vmatpush.bf16.xpose.msra.mxu3 %v1302_v6  ;;  %v1542_v41 = vsel %vm628_vm13, %v1537_v18, 0 }
 0x5f3   :  { %v2568_v27 = vpop.eup %2567 }
 0x5f4   :  { %v1068_v7 = vmul.f32 %v2568_v27, %v3190_v4 }
 0x5f6   :  { %v1076_v22 = vpack.c.bf16 %v1068_v7, %v1068_v7 }
 0x5f8   :  { %2426 = vmatmul.msk.bf16.vlgmr.msrb.gmra.mxu1 %vm624_vm15, %v1076_v22 }
 0x5ff   :  { %v1343_v10 = vpop.permute.xlu0 %1342 }
 0x600   :  { %v1348_v2 = vsel %vm329_vm12, %v1343_v10, 0 }
 0x601   :  { %1357 = vmatpush.bf16.xpose.msrb.mxu1 %v1348_v2 }
 0x607   :  { %v1410_v43 = vpop.permute.xlu0 %1409 }
 0x608   :  { %2430 = vmatmul.msk.bf16.vlgmr.msra.gmra.mxu1 %vm329_vm12, %v1249_v57 }
 0x609   :  { %1551 = vmatpush.bf16.msra.mxu1 %v1542_v41 }
 0x61b   :  { %v1055_v42 = vpop.xlane.xlu1 %1054 }
 0x61c   :  { %2569 = vrcp.f32 %v1055_v42 }
 0x622   :  { %v2570_v26 = vpop.eup %2569 }
 0x623   :  { %v1071_v4 = vmul.f32 %v2570_v26, %v3205_v14 }
 0x625   :  { %v1079_v30 = vpack.c.bf16 %v1071_v4, %v1071_v4 }
 0x627   :  { %2429 = vmatmul.msk.bf16.vlgmr.msra.gmra.mxu0 %vm624_vm15, %v1079_v30 }
 0x628   :  { %1426 = vmatpush.bf16.xpose.msra.mxu0 %v1417_v15 }
 0x62f   :  { %v3246_v32 = vpop.f32.mrf.mxu1 }
 0x632   :  { %v3248_v38 = vpop.f32.mrf.mxu0  ;;  %v1049_v17 = vpop.xlane.xlu0 %1048 }
 0x633   :  { %2571 = vrcp.f32 %v1049_v17  ;;  %v1318_v47 = vpop.permute.xlu1 %1317 }
 0x637   :  { %v1099_v51 = vpop.f32.mrf.mxu1  ;;  %2433 = vmatmul.msk.bf16.vlgmr.msrb.gmra.mxu0 %vm329_vm12, %v1318_v47 }
 0x639   :  { %v2572_v44 = vpop.eup %2571 }
 0x63a   :  { %v1069_v39 = vmul.f32 %v2572_v44, %v2560_v33  ;;  %v1162_v14 = vpop.f32.mrf.mxu0  ;;  %v1052_v49 = vpop.xlane.xlu0 %1051  ;;  %v1394_v33 = vsel %vm329_vm12, %v3203_v11, 0 }
 0x63b   :  { %2573 = vrcp.f32 %v1052_v49  ;;  %v1341_v45 = vpop.permute.xlu1 %1340  ;;  %v1642_v11 = vpop.permute.xlu2 %1641 }
 0x63c   :  { %v1077_v23 = vpack.c.bf16 %v1069_v39, %v1069_v39  ;;  %2434 = vmatmul.msk.bf16.vlgmr.msrb.gmra.mxu1 %vm329_vm12, %v1341_v45  ;;  %v1647_v62 = vsel %vm628_vm13, %v1642_v11, 0 }
 0x63e   :  { %2427 = vmatmul.msk.bf16.vlgmr.msrb.gmra.mxu2 %vm624_vm15, %v1077_v23 }
 0x63f   :  { %1380 = vmatpush.bf16.xpose.msrb.mxu2 %v1371_v53 }
 0x641   :  { %v2574_v55 = vpop.eup %2573 }
 0x642   :  { %v1070_v40 = vmul.f32 %v2574_v55, %v3218_v46  ;;  %v1584_v46 = vsel %vm628_vm13, %v1579_v8, 0 }
 0x643   :  { %v1558_v60 = vpop.permute.xlu1 %1557 }
 0x644   :  { %v1078_v59 = vpack.c.bf16 %v1070_v40, %v1070_v40  ;;  %v1563_v29 = vsel %vm628_vm13, %v1558_v60, 0 }
 0x646   :  { %2428 = vmatmul.msk.bf16.vlgmr.msrb.gmra.mxu3 %vm624_vm15, %v1078_v59 }
 0x647   :  { %1403 = vmatpush.bf16.xpose.msrb.mxu3 %v1394_v33  ;;  %2437 = vmatmul.msk.bf16.vlgmr.msra.gmra.mxu0 %vm329_vm12, %v1410_v43 }
 0x64d   :  { %v1600_v61 = vpop.permute.xlu0 %1599 }
 0x64e   :  { %v1605_v54 = vsel %vm628_vm13, %v1600_v61, 0  ;;  %2431 = vmatmul.msk.bf16.vlgmr.msra.gmra.mxu2 %vm329_vm12, %v3156_v50 }
 0x64f   :  { %1572 = vmatpush.bf16.msra.mxu2 %v1563_v29  ;;  %1614 = vmatpush.bf16.msrb.mxu0 %v1605_v54 }
 0x656   :  { %2432 = vmatmul.msk.bf16.vlgmr.msra.gmra.mxu3 %vm329_vm12, %v3160_v36 }
 0x657   :  { %1593 = vmatpush.bf16.msra.mxu3 %v1584_v46 }
 0x65e   :  { %2435 = vmatmul.msk.bf16.vlgmr.msrb.gmra.mxu2 %vm329_vm12, %v1364_v34 }
 0x65f   :  { %1656 = vmatpush.bf16.msrb.mxu2 %v1647_v62 }
 0x666   :  { %2436 = vmatmul.msk.bf16.vlgmr.msrb.gmra.mxu3 %vm329_vm12, %v3228_v58 }
 0x667   :  { %v3271_v57 = vpop.f32.mrf.mxu2 }
 0x66f   :  { %v1120_v50 = vpop.f32.mrf.mxu2 }
 0x673   :  { %v3273_v63 = vpop.f32.mrf.mxu3 }
 0x675   :  { %v3275_v0 = vpop.f32.mrf.mxu1 }
 0x67b   :  { %v1141_v28 = vpop.f32.mrf.mxu3 }
 0x67d   :  { %v1183_v5 = vpop.f32.mrf.mxu1 }
 0x685   :  { %v1267_v36 = vpop.f32.mrf.mxu1 }
 0x686   :  { %v1432_v6 = vmul.f32 0.35355338, %v1267_v36 }
 0x688   :  { %v1440_v56 = vsel %vm525_vm14, %v1432_v6, -inf }
 0x689   :  { %1441 = vmax.xlane.f32.xlu0 %v1440_v56 }
 0x68d   :  { %v1269_v27 = vpop.f32.mrf.mxu1 }
 0x6a4   :  { %v3278_v7 = vpop.f32.mrf.mxu0 }
 0x6ac   :  { %v1246_v22 = vpop.f32.mrf.mxu0 }
 0x6b4   :  { %v1336_v8 = vpop.f32.mrf.mxu0 }
 0x6b5   :  { %v1435_v58 = vmul.f32 0.35355338, %v1336_v8 }
 0x6b7   :  { %v1449_v10 = vsel %vm525_vm14, %v1435_v58, -inf }
 0x6b8   :  { %1450 = vmax.xlane.f32.xlu2 %v1449_v10 }
 0x6b9   :  { %v1359_v2 = vpop.f32.mrf.mxu1 }
 0x6ba   :  { %v1436_v18 = vmul.f32 0.35355338, %v1359_v2 }
 0x6bc   :  { %v1338_v41 = vpop.f32.mrf.mxu0  ;;  %v1452_v34 = vsel %vm525_vm14, %v1436_v18, -inf }
 0x6bd   :  { %1453 = vmax.xlane.f32.xlu0 %v1452_v34 }
 0x6c1   :  { %v3282_v42 = vpop.f32.mrf.mxu2  ;;  %v1361_v26 = vpop.f32.mrf.mxu1 }
 0x6c4   :  { %v1428_v4 = vpop.f32.mrf.mxu0 }
 0x6c5   :  { %v1439_v30 = vmul.f32 0.35355338, %v1428_v4 }
 0x6c7   :  { %v1461_v15 = vsel %vm525_vm14, %v1439_v30, -inf }
 0x6c8   :  { %1462 = vmax.xlane.f32.xlu1 %v1461_v15 }
 0x6c9   :  { %v1204_v43 = vpop.f32.mrf.mxu2  ;;  %v3285_v17 = vpop.f32.mrf.mxu3 }
 0x6cc   :  { %v1430_v47 = vpop.f32.mrf.mxu0 }
 0x6d1   :  { %1729 = vrot.lane.b32.xlu0 %v2879_v37, %s2656_s26  ;;  %v1225_v51 = vpop.f32.mrf.mxu3  ;;  %v1290_v44 = vpop.f32.mrf.mxu2 }
 0x6d2   :  { %v1433_v39 = vmul.f32 0.35355338, %v1290_v44 }
 0x6d4   :  { %v1443_v14 = vsel %vm525_vm14, %v1433_v39, -inf }
 0x6d5   :  { %1444 = vmax.xlane.f32.xlu2 %v1443_v14 }
 0x6d9   :  { %v1292_v49 = vpop.f32.mrf.mxu2  ;;  %v1313_v45 = vpop.f32.mrf.mxu3 }
 0x6da   :  { %v3290_v23 = vmul.f32 0.35355338, %v1313_v45 }
 0x6dc   :  { %v1446_v53 = vsel %vm525_vm14, %v3290_v23, -inf }
 0x6dd   :  { %1447 = vmax.xlane.f32.xlu1 %v1446_v53 }
 0x6e1   :  { %v1315_v55 = vpop.f32.mrf.mxu3  ;;  %v1382_v40 = vpop.f32.mrf.mxu2 }
 0x6e2   :  { %v3294_v59 = vmul.f32 0.35355338, %v1382_v40 }
 0x6e4   :  { %v1455_v33 = vsel %vm525_vm14, %v3294_v59, -inf }
 0x6e5   :  { %1456 = vmax.xlane.f32.xlu1 %v1455_v33 }
 0x6e9   :  { %v1384_v60 = vpop.f32.mrf.mxu2  ;;  %v1405_v61 = vpop.f32.mrf.mxu3 }
 0x6ea   :  { %v1438_v29 = vmul.f32 0.35355338, %v1405_v61 }
 0x6ec   :  { %v1458_v54 = vsel %vm525_vm14, %v1438_v29, -inf }
 0x6ed   :  { %1459 = vmax.xlane.f32.xlu2 %v1458_v54 }
 0x6f1   :  { %v1407_v46 = vpop.f32.mrf.mxu3 }
 0x6fc   :  { %v1442_v11 = vpop.xlane.xlu0 %1441 }
 0x6fd   :  { %v1464_v62 = vsub.f32 %v1432_v6, %v1442_v11 }
 0x6fe   :  { %1620 = vrot.lane.b32.xlu1 %v2907_v16, %s2655_s25 }
 0x6ff   :  { %v1472_v50 = vmul.f32 1.442695, %v1464_v62 }
 0x701   :  { %2575 = vpow2.f32 %v1472_v50 }
 0x705   :  { %1662 = vrot.lane.b32.xlu2 %v2897_v13, %s2655_s25 }
 0x706   :  { %1683 = vrot.lane.b32.xlu1 %v2909_v19, %s2655_s25 }
 0x707   :  { %v3305_v28 = vpop.eup %2575 }
 0x708   :  { %v1488_v5 = vsel %vm525_vm14, %v3305_v28, 0.0 }
 0x709   :  { %1489 = vadd.xlane.f32.xlu0 %v1488_v5 }
 0x70e   :  { %1727 = vrot.lane.b32.xlu1 %v2879_v37, %s2657_s27 }
 0x716   :  { %1750 = vrot.lane.b32.xlu1 %v2881_v48, %s2657_s27 }
 0x71e   :  { %1775 = vrot.lane.b32.xlu1 %v2911_v20, %s2656_s26 }
 0x72b   :  { %v1451_v36 = vpop.xlane.xlu2 %1450 }
 0x72c   :  { %v1467_v6 = vsub.f32 %v1435_v58, %v1451_v36 }
 0x72e   :  { %v1478_v56 = vmul.f32 1.442695, %v1467_v6 }
 0x730   :  { %2577 = vpow2.f32 %v1478_v56  ;;  %v1454_v27 = vpop.xlane.xlu0 %1453 }
 0x731   :  { %v1468_v22 = vsub.f32 %v1436_v18, %v1454_v27 }
 0x733   :  { %v1480_v8 = vmul.f32 1.442695, %v1468_v22 }
 0x735   :  { %2579 = vpow2.f32 %v1480_v8 }
 0x736   :  { %v3315_v10 = vpop.eup %2577 }
 0x737   :  { %v1497_v2 = vsel %vm525_vm14, %v3315_v10, 0.0 }
 0x738   :  { %1498 = vadd.xlane.f32.xlu0 %v1497_v2 }
 0x73b   :  { %v1463_v41 = vpop.xlane.xlu1 %1462  ;;  %v3319_v34 = vpop.eup %2579 }
 0x73c   :  { %v1471_v26 = vsub.f32 %v1439_v30, %v1463_v41  ;;  %v1500_v58 = vsel %vm525_vm14, %v3319_v34, 0.0 }
 0x73e   :  { %v1486_v4 = vmul.f32 1.442695, %v1471_v26 }
 0x740   :  { %2581 = vpow2.f32 %v1486_v4  ;;  %1501 = vadd.xlane.f32.xlu0 %v1500_v58 }
 0x743   :  { %v1730_v11 = vpop.permute.xlu0 %1729 }
 0x746   :  { %v3323_v15 = vpop.eup %2581 }
 0x747   :  { %v1509_v18 = vsel %vm525_vm14, %v3323_v15, 0.0 }
 0x748   :  { %v1445_v43 = vpop.xlane.xlu2 %1444  ;;  %1510 = vadd.xlane.f32.xlu2 %v1509_v18 }
 0x749   :  { %v1465_v47 = vsub.f32 %v1433_v39, %v1445_v43 }
 0x74b   :  { %v1474_v51 = vmul.f32 1.442695, %v1465_v47 }
 0x74d   :  { %2583 = vpow2.f32 %v1474_v51 }
 0x750   :  { %v1448_v14 = vpop.xlane.xlu1 %1447 }
 0x751   :  { %v1466_v60 = vsub.f32 %v3290_v23, %v1448_v14 }
 0x753   :  { %v3327_v44 = vpop.eup %2583  ;;  %v1476_v54 = vmul.f32 1.442695, %v1466_v60 }
 0x754   :  { %1706 = vrot.lane.b32.xlu0 %v2889_v9, %s2656_s26  ;;  %v1491_v30 = vsel %vm525_vm14, %v3327_v44, 0.0 }
 0x755   :  { %1492 = vadd.xlane.f32.xlu2 %v1491_v30 }
 0x758   :  { %v1457_v55 = vpop.xlane.xlu1 %1456 }
 0x759   :  { %v1469_v22 = vsub.f32 %v3294_v59, %v1457_v55 }
 0x75b   :  { %v1482_v41 = vmul.f32 1.442695, %v1469_v22 }
 0x760   :  { %v1460_v49 = vpop.xlane.xlu2 %1459 }
 0x761   :  { %v1470_v45 = vsub.f32 %v1438_v29, %v1460_v49 }
 0x763   :  { %v1484_v53 = vmul.f32 1.442695, %v1470_v45 }
 0x765   :  { %2585 = vpow2.f32 %v1484_v53 }
 0x766   :  { %2587 = vpow2.f32 %v1476_v54 }
 0x768   :  { %v1663_v40 = vpop.permute.xlu2 %1662 }
 0x769   :  { %v1668_v39 = vsel %vm628_vm13, %v1663_v40, 0 }
 0x76a   :  { %1677 = vmatpush.bf16.msrb.mxu3 %v1668_v39 }
 0x76b   :  { %v3334_v33 = vpop.eup %2585 }
 0x76c   :  { %v1506_v61 = vsel %vm525_vm14, %v3334_v33, 0.0  ;;  %v3345_v50 = vpop.eup %2587 }
 0x76d   :  { %1752 = vrot.lane.b32.xlu2 %v2881_v48, %s2656_s26  ;;  %1507 = vadd.xlane.f32.xlu1 %v1506_v61  ;;  %v1494_v36 = vsel %vm525_vm14, %v3345_v50, 0.0 }
 0x770   :  { %v1621_v29 = vpop.permute.xlu1 %1620 }
 0x771   :  { %v1626_v46 = vsel %vm628_vm13, %v1621_v29, 0 }
 0x772   :  { %1635 = vmatpush.bf16.msrb.mxu1 %v1626_v46  ;;  %v1735_v46 = vsel %vm329_vm12, %v1730_v11, 0 }
 0x775   :  { %1821 = vrot.lane.b32.xlu2 %v2895_v12, %s2656_s26 }
 0x778   :  { %v1684_v62 = vpop.permute.xlu1 %1683 }
 0x779   :  { %v1689_v23 = vsel %vm628_vm13, %v1684_v62, 0 }
 0x77a   :  { %1698 = vmatpush.bf16.msra.mxu0 %v1689_v23 }
 0x77c   :  { %v1490_v5 = vpop.xlane.xlu0 %1489 }
 0x77d   :  { %2589 = vrcp.f32 %v1490_v5  ;;  %1773 = vrot.lane.b32.xlu2 %v2911_v20, %s2657_s27 }
 0x77e   :  { %1495 = vadd.xlane.f32.xlu0 %v1494_v36 }
 0x783   :  { %v2590_v6 = vpop.eup %2589 }
 0x784   :  { %v1520_v56 = vmul.f32 %v2590_v6, %v3305_v28  ;;  %v3365_v28 = vpop.permute.xlu1 %1727 }
 0x785   :  { %1798 = vrot.lane.b32.xlu2 %v2907_v16, %s2656_s26 }
 0x786   :  { %v1528_v27 = vpack.c.bf16 %v1520_v56, %v1520_v56  ;;  %1704 = vrot.lane.b32.xlu1 %v2889_v9, %s2657_s27 }
 0x788   :  { %2438 = vmatmul.msk.bf16.vlgmr.msra.gmra.mxu1 %vm624_vm15, %v1528_v27 }
 0x78c   :  { %v3368_v8 = vpop.permute.xlu1 %1750 }
 0x78d   :  { %1865 = vrot.lane.b32.xlu2 %v2909_v19, %s2657_s27 }
 0x78e   :  { %1842 = vrot.lane.b32.xlu1 %v2897_v13, %s2657_s27 }
 0x792   :  { %1844 = vrot.lane.b32.xlu0 %v2897_v13, %s2656_s26 }
 0x794   :  { %v1776_v18 = vpop.permute.xlu1 %1775 }
 0x795   :  { %v1781_v47 = vsel %vm329_vm12, %v1776_v18, 0 }
 0x796   :  { %1796 = vrot.lane.b32.xlu1 %v2907_v16, %s2657_s27 }
 0x7ab   :  { %v1499_v2 = vpop.xlane.xlu0 %1498 }
 0x7ac   :  { %2591 = vrcp.f32 %v1499_v2 }
 0x7ad   :  { %2593 = vpow2.f32 %v1482_v41 }
 0x7b2   :  { %v2592_v26 = vpop.eup %2591 }
 0x7b3   :  { %v1523_v4 = vmul.f32 %v2592_v26, %v3315_v10  ;;  %v1502_v58 = vpop.xlane.xlu0 %1501  ;;  %v3373_v51 = vpop.eup %2593 }
 0x7b4   :  { %2595 = vrcp.f32 %v1502_v58  ;;  %v1503_v49 = vsel %vm525_vm14, %v3373_v51, 0.0 }
 0x7b5   :  { %v1531_v43 = vpack.c.bf16 %v1523_v4, %v1523_v4 }
 0x7b7   :  { %2441 = vmatmul.msk.bf16.vlgmr.msrb.gmra.mxu0 %vm624_vm15, %v1531_v43 }
 0x7b8   :  { %1790 = vmatpush.bf16.xpose.msrb.mxu0 %v1781_v47 }
 0x7ba   :  { %v2596_v59 = vpop.eup %2595 }
 0x7bb   :  { %v1524_v30 = vmul.f32 %v2596_v59, %v3319_v34  ;;  %v1511_v14 = vpop.xlane.xlu2 %1510 }
 0x7bc   :  { %2597 = vrcp.f32 %v1511_v14  ;;  %1504 = vadd.xlane.f32.xlu0 %v1503_v49 }
 0x7bd   :  { %v1532_v10 = vpack.c.bf16 %v1524_v30, %v1524_v30 }
 0x7bf   :  { %2442 = vmatmul.msk.bf16.vlgmr.msrb.gmra.mxu1 %vm624_vm15, %v1532_v10 }
 0x7c2   :  { %v2598_v45 = vpop.eup %2597 }
 0x7c3   :  { %v1527_v53 = vmul.f32 %v2598_v45, %v3323_v15 }
 0x7c5   :  { %v1535_v55 = vpack.c.bf16 %v1527_v53, %v1527_v53 }
 0x7c6   :  { %v1707_v40 = vpop.permute.xlu0 %1706 }
 0x7c7   :  { %v1712_v39 = vsel %vm329_vm12, %v1707_v40, 0  ;;  %2445 = vmatmul.msk.bf16.vlgmr.msra.gmra.mxu0 %vm624_vm15, %v1535_v55 }
 0x7c8   :  { %v1493_v60 = vpop.xlane.xlu2 %1492  ;;  %1721 = vmatpush.bf16.xpose.msra.mxu1 %v1712_v39 }
 0x7c9   :  { %2599 = vrcp.f32 %v1493_v60 }
 0x7cf   :  { %v2600_v34 = vpop.eup %2599 }
 0x7d0   :  { %v1521_v61 = vmul.f32 %v2600_v34, %v3327_v44  ;;  %v1753_v54 = vpop.permute.xlu2 %1752  ;;  %1819 = vrot.lane.b32.xlu0 %v2895_v12, %s2657_s27 }
 0x7d1   :  { %v1758_v22 = vsel %vm329_vm12, %v1753_v54, 0 }
 0x7d2   :  { %v1529_v29 = vpack.c.bf16 %v1521_v61, %v1521_v61 }
 0x7d4   :  { %2439 = vmatmul.msk.bf16.vlgmr.msra.gmra.mxu2 %vm624_vm15, %v1529_v29 }
 0x7d5   :  { %1744 = vmatpush.bf16.xpose.msra.mxu2 %v1735_v46 }
 0x7d8   :  { %v1822_v15 = vpop.permute.xlu2 %1821  ;;  %1867 = vrot.lane.b32.xlu0 %v2909_v19, %s2656_s26 }
 0x7d9   :  { %v1827_v49 = vsel %vm329_vm12, %v1822_v15, 0 }
 0x7e0   :  { %v1774_v62 = vpop.permute.xlu2 %1773  ;;  %2013 = vrot.lane.b32.xlu0 %v2879_v37, %s2658_s28  ;;  %v1508_v5 = vpop.xlane.xlu1 %1507 }
 0x7e1   :  { %2449 = vmatmul.msk.bf16.vlgmr.msrb.gmra.mxu0 %vm329_vm12, %v1774_v62 }
 0x7e8   :  { %v1799_v44 = vpop.permute.xlu2 %1798 }
 0x7e9   :  { %v1804_v23 = vsel %vm329_vm12, %v1799_v44, 0 }
 0x7ea   :  { %1813 = vmatpush.bf16.xpose.msrb.mxu1 %v1804_v23 }
 0x7f0   :  { %v1866_v60 = vpop.permute.xlu2 %1865 }
 0x7f1   :  { %v1496_v11 = vpop.xlane.xlu0 %1495 }
 0x7f2   :  { %2601 = vrcp.f32 %v1496_v11 }
 0x7f3   :  { %2603 = vrcp.f32 %v1508_v5 }
 0x7f8   :  { %v2602_v36 = vpop.eup %2601  ;;  %v1705_v6 = vpop.permute.xlu1 %1704 }
 0x7f9   :  { %v1522_v56 = vmul.f32 %v2602_v36, %v3345_v50  ;;  %2446 = vmatmul.msk.bf16.vlgmr.msra.gmra.mxu1 %vm329_vm12, %v1705_v6  ;;  %v2604_v2 = vpop.eup %2603 }
 0x7fa   :  { %v1526_v26 = vmul.f32 %v2604_v2, %v3334_v33 }
 0x7fb   :  { %v1530_v27 = vpack.c.bf16 %v1522_v56, %v1522_v56 }
 0x7fc   :  { %v1534_v50 = vpack.c.bf16 %v1526_v26, %v1526_v26 }
 0x7fd   :  { %2440 = vmatmul.msk.bf16.vlgmr.msra.gmra.mxu3 %vm624_vm15, %v1530_v27 }
 0x7fe   :  { %1767 = vmatpush.bf16.xpose.msra.mxu3 %v1758_v22 }
 0x800   :  { %v1843_v37 = vpop.permute.xlu1 %1842 }
 0x804   :  { %v1845_v58 = vpop.permute.xlu0 %1844 }
 0x805   :  { %v3397_v41 = vpop.f32.mrf.mxu1  ;;  %v1850_v18 = vsel %vm329_vm12, %v1845_v58, 0 }
 0x808   :  { %v1797_v4 = vpop.permute.xlu1 %1796 }
 0x809   :  { %2450 = vmatmul.msk.bf16.vlgmr.msrb.gmra.mxu1 %vm329_vm12, %v1797_v4 }
 0x80d   :  { %v1555_v43 = vpop.f32.mrf.mxu1  ;;  %2444 = vmatmul.msk.bf16.vlgmr.msrb.gmra.mxu3 %vm624_vm15, %v1534_v50 }
 0x80e   :  { %1859 = vmatpush.bf16.xpose.msrb.mxu3 %v1850_v18 }
 0x81d   :  { %2448 = vmatmul.msk.bf16.vlgmr.msra.gmra.mxu3 %vm329_vm12, %v3368_v8 }
 0x82d   :  { %2452 = vmatmul.msk.bf16.vlgmr.msrb.gmra.mxu3 %vm329_vm12, %v1843_v37 }
 0x82f   :  { %v1505_v47 = vpop.xlane.xlu0 %1504 }
 0x830   :  { %2605 = vrcp.f32 %v1505_v47 }
 0x834   :  { %v3406_v59 = vpop.f32.mrf.mxu0 }
 0x836   :  { %v2606_v33 = vpop.eup %2605 }
 0x837   :  { %v1525_v30 = vmul.f32 %v2606_v33, %v3373_v51 }
 0x839   :  { %v1533_v14 = vpack.c.bf16 %v1525_v30, %v1525_v30 }
 0x83b   :  { %2443 = vmatmul.msk.bf16.vlgmr.msrb.gmra.mxu2 %vm624_vm15, %v1533_v14 }
 0x83c   :  { %1836 = vmatpush.bf16.xpose.msrb.mxu2 %v1827_v49  ;;  %v1618_v10 = vpop.f32.mrf.mxu0  ;;  %v3411_v45 = vpop.f32.mrf.mxu1 }
 0x842   :  { %v1820_v53 = vpop.permute.xlu0 %1819 }
 0x844   :  { %v1639_v8 = vpop.f32.mrf.mxu1  ;;  %v3413_v55 = vpop.f32.mrf.mxu0 }
 0x84a   :  { %v1868_v40 = vpop.permute.xlu0 %1867 }
 0x84b   :  { %v1873_v39 = vsel %vm329_vm12, %v1868_v40, 0  ;;  %2447 = vmatmul.msk.bf16.vlgmr.msra.gmra.mxu2 %vm329_vm12, %v3365_v28 }
 0x84c   :  { %v1702_v51 = vpop.f32.mrf.mxu0  ;;  %1882 = vmatpush.bf16.xpose.msra.mxu0 %v1873_v39 }
 0x852   :  { %v2014_v34 = vpop.permute.xlu0 %2013 }
 0x853   :  { %v2019_v61 = vsel %vm628_vm13, %v2014_v34, 0  ;;  %2453 = vmatmul.msk.bf16.vlgmr.msra.gmra.mxu0 %vm329_vm12, %v1866_v60 }
 0x854   :  { %2028 = vmatpush.bf16.msra.mxu2 %v2019_v61 }
 0x857   :  { %v3420_v54 = vpop.f32.mrf.mxu2 }
 0x85b   :  { %2451 = vmatmul.msk.bf16.vlgmr.msrb.gmra.mxu2 %vm329_vm12, %v1820_v53 }
 0x85e   :  { %v1792_v29 = vpop.f32.mrf.mxu0 }
 0x85f   :  { %v1891_v46 = vmul.f32 0.35355338, %v1792_v29  ;;  %v1576_v15 = vpop.f32.mrf.mxu2 }
 0x861   :  { %v1905_v62 = vsel %vm525_vm14, %v1891_v46, -inf }
 0x862   :  { %1906 = vmax.xlane.f32.xlu0 %v1905_v62 }
 0x866   :  { %v1794_v28 = vpop.f32.mrf.mxu0 }
 0x876   :  { %v1723_v44 = vpop.f32.mrf.mxu1 }
 0x877   :  { %v1888_v23 = vmul.f32 0.35355338, %v1723_v44 }
 0x879   :  { %v1896_v5 = vsel %vm525_vm14, %v1888_v23, -inf }
 0x87a   :  { %1897 = vmax.xlane.f32.xlu2 %v1896_v5 }
 0x87e   :  { %v1725_v11 = vpop.f32.mrf.mxu1 }
 0x880   :  { %v3425_v36 = vpop.f32.mrf.mxu3 }
 0x886   :  { %v1815_v6 = vpop.f32.mrf.mxu1 }
 0x887   :  { %v1892_v56 = vmul.f32 0.35355338, %v1815_v6 }
 0x888   :  { %v1597_v27 = vpop.f32.mrf.mxu3 }
 0x889   :  { %v1908_v22 = vsel %vm525_vm14, %v1892_v56, -inf }
 0x88a   :  { %1909 = vmax.xlane.f32.xlu0 %v1908_v22 }
 0x88e   :  { %v1817_v37 = vpop.f32.mrf.mxu1 }
 0x890   :  { %v3428_v2 = vpop.f32.mrf.mxu3 }
 0x892   :  { %1992 = vrot.lane.b32.xlu2 %v2889_v9, %s2658_s28 }
 0x898   :  { %v1681_v26 = vpop.f32.mrf.mxu3 }
 0x8a0   :  { %v1769_v4 = vpop.f32.mrf.mxu3 }
 0x8a1   :  { %v1890_v60 = vmul.f32 0.35355338, %v1769_v4 }
 0x8a3   :  { %v1902_v29 = vsel %vm525_vm14, %v1890_v60, -inf }
 0x8a8   :  { %v1771_v58 = vpop.f32.mrf.mxu3 }
 0x8b0   :  { %v1861_v50 = vpop.f32.mrf.mxu3 }
 0x8b1   :  { %v1894_v18 = vmul.f32 0.35355338, %v1861_v50 }
 0x8b3   :  { %v1914_v47 = vsel %vm525_vm14, %v1894_v18, -inf }
 0x8b8   :  { %v1863_v43 = vpop.f32.mrf.mxu3 }
 0x8bb   :  { %1915 = vmax.xlane.f32.xlu2 %v1914_v47 }
 0x8be   :  { %v3433_v33 = vpop.f32.mrf.mxu2 }
 0x8c6   :  { %v1660_v30 = vpop.f32.mrf.mxu2 }
 0x8ce   :  { %v1746_v14 = vpop.f32.mrf.mxu2 }
 0x8cf   :  { %v1889_v49 = vmul.f32 0.35355338, %v1746_v14 }
 0x8d0   :  { %v1884_v10 = vpop.f32.mrf.mxu0 }
 0x8d1   :  { %v1895_v53 = vmul.f32 0.35355338, %v1884_v10  ;;  %v1899_v8 = vsel %vm525_vm14, %v1889_v49, -inf }
 0x8d2   :  { %1900 = vmax.xlane.f32.xlu0 %v1899_v8 }
 0x8d3   :  { %v1917_v9 = vsel %vm525_vm14, %v1895_v53, -inf }
 0x8d4   :  { %1918 = vmax.xlane.f32.xlu1 %v1917_v9 }
 0x8d5   :  { %v1907_v40 = vpop.xlane.xlu0 %1906 }
 0x8d6   :  { %v1923_v39 = vsub.f32 %v1891_v46, %v1907_v40  ;;  %v1748_v51 = vpop.f32.mrf.mxu2 }
 0x8d8   :  { %v1934_v34 = vmul.f32 1.442695, %v1923_v39  ;;  %v1886_v61 = vpop.f32.mrf.mxu0 }
 0x8da   :  { %2607 = vpow2.f32 %v1934_v34 }
 0x8dc   :  { %1903 = vmax.xlane.f32.xlu1 %v1902_v29 }
 0x8de   :  { %v1838_v15 = vpop.f32.mrf.mxu2 }
 0x8df   :  { %v1893_v62 = vmul.f32 0.35355338, %v1838_v15 }
 0x8e0   :  { %v3438_v28 = vpop.eup %2607 }
 0x8e1   :  { %v1953_v44 = vsel %vm525_vm14, %v3438_v28, 0.0  ;;  %v1911_v5 = vsel %vm525_vm14, %v1893_v62, -inf }
 0x8e2   :  { %1954 = vadd.xlane.f32.xlu2 %v1953_v44 }
 0x8e4   :  { %1912 = vmax.xlane.f32.xlu1 %v1911_v5 }
 0x8e6   :  { %2055 = vrot.lane.b32.xlu0 %v2911_v20, %s2658_s28  ;;  %v1840_v46 = vpop.f32.mrf.mxu2 }
 0x8ed   :  { %v1898_v11 = vpop.xlane.xlu2 %1897 }
 0x8ee   :  { %v1920_v20 = vsub.f32 %v1888_v23, %v1898_v11 }
 0x8f0   :  { %v1928_v50 = vmul.f32 1.442695, %v1920_v20 }
 0x8f5   :  { %v1993_v6 = vpop.permute.xlu2 %1992 }
 0x8f6   :  { %v1998_v27 = vsel %vm628_vm13, %v1993_v6, 0 }
 0x8f7   :  { %2007 = vmatpush.bf16.msra.mxu1 %v1998_v27 }
 0x8fd   :  { %2034 = vrot.lane.b32.xlu1 %v2881_v48, %s2658_s28  ;;  %v1910_v22 = vpop.xlane.xlu0 %1909 }
 0x8fe   :  { %v1924_v37 = vsub.f32 %v1892_v56, %v1910_v22 }
 0x900   :  { %v1936_v26 = vmul.f32 1.442695, %v1924_v37 }
 0x902   :  { %2609 = vpow2.f32 %v1936_v26 }
 0x903   :  { %2611 = vpow2.f32 %v1928_v50 }
 0x908   :  { %v3448_v4 = vpop.eup %2609 }
 0x909   :  { %v1956_v58 = vsel %vm525_vm14, %v3448_v4, 0.0  ;;  %v3452_v43 = vpop.eup %2611 }
 0x90a   :  { %1957 = vadd.xlane.f32.xlu2 %v1956_v58  ;;  %v1944_v47 = vsel %vm525_vm14, %v3452_v43, 0.0 }
 0x927   :  { %1945 = vadd.xlane.f32.xlu1 %v1944_v47 }
 0x92e   :  { %v1916_v48 = vpop.xlane.xlu2 %1915 }
 0x92f   :  { %v1926_v30 = vsub.f32 %v1894_v18, %v1916_v48 }
 0x931   :  { %v1940_v56 = vmul.f32 1.442695, %v1926_v30 }
 0x933   :  { %2613 = vpow2.f32 %v1940_v56 }
 0x939   :  { %v3456_v14 = vpop.eup %2613 }
 0x93a   :  { %v1962_v10 = vsel %vm525_vm14, %v3456_v14, 0.0 }
 0x93b   :  { %1963 = vadd.xlane.f32.xlu1 %v1962_v10 }
 0x945   :  { %v1901_v8 = vpop.xlane.xlu0 %1900 }
 0x946   :  { %v1921_v23 = vsub.f32 %v1889_v49, %v1901_v8 }
 0x947   :  { %v1919_v9 = vpop.xlane.xlu1 %1918 }
 0x948   :  { %v1930_v40 = vmul.f32 1.442695, %v1921_v23  ;;  %v1927_v39 = vsub.f32 %v1895_v53, %v1919_v9 }
 0x94a   :  { %2615 = vpow2.f32 %v1930_v40  ;;  %v1942_v51 = vmul.f32 1.442695, %v1927_v39 }
 0x94c   :  { %2617 = vpow2.f32 %v1942_v51 }
 0x94f   :  { %v1904_v34 = vpop.xlane.xlu1 %1903 }
 0x950   :  { %v3460_v61 = vpop.eup %2615  ;;  %v1922_v18 = vsub.f32 %v1890_v60, %v1904_v34 }
 0x951   :  { %v1947_v29 = vsel %vm525_vm14, %v3460_v61, 0.0 }
 0x952   :  { %v3464_v15 = vpop.eup %2617  ;;  %v1932_v44 = vmul.f32 1.442695, %v1922_v18  ;;  %1948 = vadd.xlane.f32.xlu2 %v1947_v29 }
 0x953   :  { %v1965_v49 = vsel %vm525_vm14, %v3464_v15, 0.0 }
 0x954   :  { %2619 = vpow2.f32 %v1932_v44  ;;  %2097 = vrot.lane.b32.xlu1 %v2895_v12, %s2658_s28  ;;  %1966 = vadd.xlane.f32.xlu0 %v1965_v49 }
 0x955   :  { %v1955_v53 = vpop.xlane.xlu2 %1954 }
 0x956   :  { %2621 = vrcp.f32 %v1955_v53 }
 0x957   :  { %v1913_v5 = vpop.xlane.xlu1 %1912 }
 0x958   :  { %v1925_v46 = vsub.f32 %v1893_v62, %v1913_v5  ;;  %v2056_v60 = vpop.permute.xlu0 %2055 }
 0x959   :  { %v2061_v11 = vsel %vm628_vm13, %v2056_v60, 0 }
 0x95a   :  { %v3471_v6 = vpop.eup %2619  ;;  %v1938_v27 = vmul.f32 1.442695, %v1925_v46  ;;  %2070 = vmatpush.bf16.msrb.mxu0 %v2061_v11 }
 0x95b   :  { %v1950_v22 = vsel %vm525_vm14, %v3471_v6, 0.0 }
 0x95c   :  { %v2622_v37 = vpop.eup %2621  ;;  %2623 = vpow2.f32 %v1938_v27  ;;  %2168 = vrot.lane.b32.xlu1 %v3246_v32, %s2659_s29  ;;  %1951 = vadd.xlane.f32.xlu0 %v1950_v22 }
 0x95d   :  { %v1979_v12 = vmul.f32 %v2622_v37, %v3438_v28 }
 0x95f   :  { %v1987_v26 = vpack.c.bf16 %v1979_v12, %v1979_v12 }
 0x961   :  { %2457 = vmatmul.msk.bf16.vlgmr.msrb.gmra.mxu0 %vm624_vm15, %v1987_v26 }
 0x962   :  { %v3478_v62 = vpop.eup %2623 }
 0x963   :  { %v1959_v58 = vsel %vm525_vm14, %v3478_v62, 0.0 }
 0x964   :  { %2174 = vrot.lane.b32.xlu1 %v3248_v38, %s2659_s29  ;;  %1960 = vadd.xlane.f32.xlu0 %v1959_v58 }
 0x96a   :  { %2118 = vrot.lane.b32.xlu2 %v2897_v13, %s2658_s28 }
 0x96c   :  { %2180 = vrot.lane.b32.xlu1 %v3285_v17, %s2659_s29 }
 0x96f   :  { %v2035_v32 = vpop.permute.xlu1 %2034 }
 0x970   :  { %v2040_v20 = vsel %vm628_vm13, %v2035_v32, 0 }
 0x971   :  { %2049 = vmatpush.bf16.msra.mxu3 %v2040_v20 }
 0x972   :  { %2139 = vrot.lane.b32.xlu2 %v2909_v19, %s2658_s28 }
 0x974   :  { %2202 = vrot.lane.b32.xlu1 %v3420_v54, %s2660_s30 }
 0x978   :  { %2076 = vrot.lane.b32.xlu0 %v2907_v16, %s2658_s28 }
 0x97a   :  { %2172 = vrot.lane.b32.xlu2 %v3273_v63, %s2659_s29 }
 0x97c   :  { %2208 = vrot.lane.b32.xlu1 %v3411_v45, %s2660_s30 }
 0x980   :  { %2170 = vrot.lane.b32.xlu0 %v3271_v57, %s2659_s29  ;;  %v1958_v57 = vpop.xlane.xlu2 %1957 }
 0x982   :  { %2178 = vrot.lane.b32.xlu2 %v3282_v42, %s2659_s29 }
 0x984   :  { %2214 = vrot.lane.b32.xlu1 %v3413_v55, %s2660_s30 }
 0x988   :  { %2176 = vrot.lane.b32.xlu0 %v3275_v0, %s2659_s29 }
 0x98a   :  { %2200 = vrot.lane.b32.xlu2 %v3397_v41, %s2660_s30 }
 0x990   :  { %2182 = vrot.lane.b32.xlu0 %v3278_v7, %s2659_s29 }
 0x992   :  { %2206 = vrot.lane.b32.xlu2 %v3406_v59, %s2660_s30 }
 0x998   :  { %2204 = vrot.lane.b32.xlu0 %v3425_v36, %s2660_s30 }
 0x99a   :  { %v1946_v13 = vpop.xlane.xlu1 %1945  ;;  %2212 = vrot.lane.b32.xlu2 %v3428_v2, %s2660_s30 }
 0x99b   :  { %2625 = vrcp.f32 %v1946_v13 }
 0x9a0   :  { %2210 = vrot.lane.b32.xlu0 %v3433_v33, %s2660_s30 }
 0x9a1   :  { %v2626_v16 = vpop.eup %2625 }
 0x9a2   :  { %v1976_v19 = vmul.f32 %v2626_v16, %v3452_v43 }
 0x9a4   :  { %v1984_v38 = vpack.c.bf16 %v1976_v19, %v1976_v19 }
 0x9a6   :  { %2454 = vmatmul.msk.bf16.vlgmr.msra.gmra.mxu1 %vm624_vm15, %v1984_v38 }
 0x9ae   :  { %v1964_v63 = vpop.xlane.xlu1 %1963 }
 0x9c5   :  { %v1949_v0 = vpop.xlane.xlu2 %1948 }
 0x9c6   :  { %2627 = vrcp.f32 %v1949_v0  ;;  %v2098_v7 = vpop.permute.xlu1 %2097 }
 0x9c7   :  { %v2103_v42 = vsel %vm628_vm13, %v2098_v7, 0  ;;  %v1967_v17 = vpop.xlane.xlu0 %1966 }
 0x9c8   :  { %2112 = vmatpush.bf16.msrb.mxu2 %v2103_v42  ;;  %2629 = vrcp.f32 %v1967_v17 }
 0x9cc   :  { %v2628_v41 = vpop.eup %2627 }
 0x9cd   :  { %v1977_v59 = vmul.f32 %v2628_v41, %v3460_v61  ;;  %v2119_v45 = vpop.permute.xlu2 %2118 }
 0x9ce   :  { %v2124_v55 = vsel %vm628_vm13, %v2119_v45, 0  ;;  %v2630_v2 = vpop.eup %2629  ;;  %v3509_v33 = vpop.permute.xlu1 %2168 }
 0x9cf   :  { %v1985_v54 = vpack.c.bf16 %v1977_v59, %v1977_v59  ;;  %2133 = vmatpush.bf16.msrb.mxu3 %v2124_v55  ;;  %v1952_v36 = vpop.xlane.xlu0 %1951  ;;  %v1983_v28 = vmul.f32 %v2630_v2, %v3464_v15  ;;  %v2256_v55 = vsel %vm329_vm12, %v3101_v21, %v3509_v33  ;;  %v2474_v21 = vld [vmem:[%s3643_s4 + $0x8] sm:$0xff] }
 0x9d0   :  { %2631 = vrcp.f32 %v1952_v36 }
 0x9d1   :  { %2455 = vmatmul.msk.bf16.vlgmr.msra.gmra.mxu2 %vm624_vm15, %v1985_v54  ;;  %v1991_v56 = vpack.c.bf16 %v1983_v28, %v1983_v28 }
 0x9d5   :  { %v2140_v50 = vpop.permute.xlu2 %2139 }
 0x9d6   :  { %v2632_v43 = vpop.eup %2631  ;;  %v2145_v47 = vsel %vm628_vm13, %v2140_v50, 0  ;;  %v3516_v8 = vpop.permute.xlu1 %2174 }
 0x9d7   :  { %v1978_v48 = vmul.f32 %v2632_v43, %v3471_v6  ;;  %2154 = vmatpush.bf16.msra.mxu0 %v2145_v47  ;;  %v1961_v30 = vpop.xlane.xlu0 %1960  ;;  %v2259_v50 = vsel %vm329_vm12, %v3106_v25, %v3516_v8 }
 0x9d8   :  { %2633 = vrcp.f32 %v1961_v30 }
 0x9d9   :  { %v1986_v10 = vpack.c.bf16 %v1978_v48, %v1978_v48  ;;  %2635 = vrcp.f32 %v1964_v63 }
 0x9da   :  { %2461 = vmatmul.msk.bf16.vlgmr.msra.gmra.mxu0 %vm624_vm15, %v1991_v56  ;;  %2637 = vrcp.f32 %v1958_v57  ;;  %v2473_v56 = vld [vmem:[%s3643_s4] sm:$0xff] }
 0x9db   :  { %2456 = vmatmul.msk.bf16.vlgmr.msra.gmra.mxu3 %vm624_vm15, %v1986_v10 }
 0x9dd   :  { %v2173_v37 = vpop.permute.xlu2 %2172 }
 0x9de   :  { %v2634_v23 = vpop.eup %2633  ;;  %v2072_v9 = vpop.f32.mrf.mxu0  ;;  %v2258_v12 = vsel %vm329_vm12, %v3129_v35, %v2173_v37 }
 0x9df   :  { %v1981_v40 = vmul.f32 %v2634_v23, %v3478_v62  ;;  %v2636_v51 = vpop.eup %2635  ;;  %v3522_v61 = vpop.permute.xlu1 %2180 }
 0x9e0   :  { %v1982_v34 = vmul.f32 %v2636_v51, %v3456_v14  ;;  %v2638_v18 = vpop.eup %2637 }
 0x9e1   :  { %v1989_v39 = vpack.c.bf16 %v1981_v40, %v1981_v40  ;;  %v1980_v15 = vmul.f32 %v2638_v18, %v3448_v4 }
 0x9e2   :  { %v1990_v44 = vpack.c.bf16 %v1982_v34, %v1982_v34 }
 0x9e3   :  { %2459 = vmatmul.msk.bf16.vlgmr.msrb.gmra.mxu2 %vm624_vm15, %v1989_v39  ;;  %v1988_v5 = vpack.c.bf16 %v1980_v15, %v1980_v15 }
 0x9e5   :  { %v2179_v58 = vpop.permute.xlu2 %2178 }
 0x9e6   :  { %v2074_v29 = vpop.f32.mrf.mxu0  ;;  %v2261_v32 = vsel %vm329_vm12, %v3135_v1, %v2179_v58 }
 0x9e7   :  { %v3527_v46 = vpop.permute.xlu1 %2202 }
 0x9ea   :  { %v2077_v49 = vpop.permute.xlu0 %2076 }
 0x9eb   :  { %v2082_v53 = vsel %vm628_vm13, %v2077_v49, 0  ;;  %2460 = vmatmul.msk.bf16.vlgmr.msrb.gmra.mxu3 %vm624_vm15, %v1990_v44 }
 0x9ec   :  { %2091 = vmatpush.bf16.msrb.mxu1 %v2082_v53 }
 0x9ed   :  { %v2201_v45 = vpop.permute.xlu2 %2200 }
 0x9ee   :  { %v2265_v54 = vsel %vm2264_vm1, %v2256_v55, %v2201_v45 }
 0x9ef   :  { %2458 = vmatmul.msk.bf16.vlgmr.msrb.gmra.mxu1 %vm624_vm15, %v1988_v5  ;;  %v2209_v14 = vpop.permute.xlu1 %2208 }
 0x9f0   :  { %2335 = vmatpush.bf16.msra.mxu1 %v2474_v21 }
 0x9f2   :  { %v3530_v60 = vpop.permute.xlu0 %2170 }
 0x9f3   :  { %v2257_v23 = vsel %vm329_vm12, %v3104_v24, %v3530_v60  ;;  %v2262_v24 = vsel %vm329_vm12, %v3137_v3, %v3522_v61  ;;  %v2639_v3 = vld [vmem:[%s3638_s0] sm:$0x3] }
 0x9f4   :  { %2336 = vmatpush.bf16.msra.mxu1 %v2473_v56 }
 0x9f5   :  { %v2207_v28 = vpop.permute.xlu2 %2206 }
 0x9f6   :  { %v2268_v43 = vsel %vm2264_vm1, %v2259_v50, %v2207_v28 }
 0x9f7   :  { %v2215_v27 = vpop.permute.xlu1 %2214 }
 0x9fa   :  { %v2177_v11 = vpop.permute.xlu0 %2176 }
 0x9fb   :  { %v2260_v33 = vsel %vm329_vm12, %v3131_v52, %v2177_v11  ;;  %v2266_v52 = vsel %vm2264_vm1, %v2257_v23, %v3527_v46 }
 0x9fc   :  { %v2269_v10 = vsel %vm2264_vm1, %v2260_v33, %v2209_v14  ;;  %v2492_v14 = vld [vmem:[%s3642_s5] ss:$0 sm:$0xff] }
 0x9fd   :  { %v2213_v30 = vpop.permute.xlu2 %2212 }
 0x9fe   :  { %v2271_v44 = vsel %vm2264_vm1, %v2262_v24, %v2213_v30 }
 0xa02   :  { %v2183_v6 = vpop.permute.xlu0 %2182 }
 0xa03   :  { %v2263_v4 = vsel %vm329_vm12, %v3127_v31, %v2183_v6 }
 0xa04   :  { %v3535_v22 = vsel %vm2264_vm1, %v2263_v4, %v2215_v27 }
 0xa0a   :  { %v2205_v26 = vpop.permute.xlu0 %2204 }
 0xa0b   :  { %v2267_v62 = vsel %vm2264_vm1, %v2258_v12, %v2205_v26  ;;  %v2641_v12 = vld [vmem:[%s3638_s0 + $0x4] sm:$0x3] }
 0xa12   :  { %v2211_v20 = vpop.permute.xlu0 %2210 }
 0xa13   :  { %v2270_v13 = vsel %vm2264_vm1, %v2261_v32, %v2211_v20 }
 0xa23   :  { %v2009_v16 = vpop.f32.mrf.mxu1 }
 0xa24   :  { %2232 = vrot.lane.b32.xlu0 %v2009_v16, %s2661_s7 }
 0xa2b   :  { %v2011_v31 = vpop.f32.mrf.mxu1 }
 0xa2c   :  { %2238 = vrot.lane.b32.xlu0 %v2072_v9, %s2661_s7 }
 0xa54   :  { %v2030_v19 = vpop.f32.mrf.mxu2 }
 0xa57   :  { %v2156_v38 = vpop.f32.mrf.mxu0 }
 0xa5c   :  { %v2032_v57 = vpop.f32.mrf.mxu2 }
 0xa5e   :  { %v2051_v63 = vpop.f32.mrf.mxu3 }
 0xa5f   :  { %v2158_v35 = vpop.f32.mrf.mxu0  ;;  %2236 = vrot.lane.b32.xlu1 %v2051_v63, %s2661_s7  ;;  %v2643_v63 = vld [vmem:[%s3638_s0 + $0x8] sm:$0x3] }
 0xa66   :  { %v2053_v0 = vpop.f32.mrf.mxu3  ;;  %v2114_v7 = vpop.f32.mrf.mxu2 }
 0xa67   :  { %2242 = vrot.lane.b32.xlu1 %v2114_v7, %s2661_s7  ;;  %v2644_v0 = vld [vmem:[%s3638_s0 + $0xa] sm:$0x3] }
 0xa6c   :  { %v2093_v42 = vpop.f32.mrf.mxu1 }
 0xa6d   :  { %2240 = vrot.lane.b32.xlu2 %v2093_v42, %s2661_s7  ;;  %v2645_v42 = vld [vmem:[%s3638_s0 + $0xc] sm:$0x3] }
 0xa6e   :  { %v2116_v1 = vpop.f32.mrf.mxu2  ;;  %v2135_v17 = vpop.f32.mrf.mxu3 }
 0xa6f   :  { %2244 = vrot.lane.b32.xlu0 %v2135_v17, %s2661_s7  ;;  %v2646_v17 = vld [vmem:[%s3638_s0 + $0xe] sm:$0x3] }
 0xa74   :  { %v2095_v41 = vpop.f32.mrf.mxu1 }
 0xa75   :  { %2234 = vrot.lane.b32.xlu2 %v2030_v19, %s2661_s7 }
 0xa76   :  { %v2137_v59 = vpop.f32.mrf.mxu3 }
 0xa7d   :  { %2246 = vrot.lane.b32.xlu2 %v2156_v38, %s2661_s7 }
 0xa96   :  { %v2233_v36 = vpop.permute.xlu0 %2232 }
 0xa97   :  { %v2274_v2 = vsel %vm2273_vm2, %v2265_v54, %v2233_v36 }
 0xa98   :  { %2290 = vst [vmem:[#allocation1] ss:$4 sm:$0xff] %v2274_v2 }
 0xa9e   :  { %v2239_v47 = vpop.permute.xlu0 %2238 }
 0xa9f   :  { %v2277_v48 = vsel %vm2273_vm2, %v2268_v43, %v2239_v47 }
 0xaa0   :  { %2296 = vst [vmem:[#allocation1 + $0x3] ss:$4 sm:$0xff] %v2277_v48 }
 0xac7   :  { %v2241_v25 = vpop.permute.xlu2 %2240 }
 0xac8   :  { %v2278_v8 = vsel %vm2273_vm2, %v2269_v10, %v2241_v25 }
 0xac9   :  { %2298 = vst [vmem:[#allocation1 + $0x20] ss:$4 sm:$0xff] %v2278_v8 }
 0xacf   :  { %v2235_v9 = vpop.permute.xlu2 %2234 }
 0xad0   :  { %v2275_v40 = vsel %vm2273_vm2, %v2266_v52, %v2235_v9 }
 0xad1   :  { %2292 = vst [vmem:[#allocation1 + $0x1] ss:$4 sm:$0xff] %v2275_v40  ;;  %v2237_v39 = vpop.permute.xlu1 %2236 }
 0xad2   :  { %v2276_v51 = vsel %vm2273_vm2, %v2267_v62, %v2237_v39  ;;  %v2642_v62 = vld [vmem:[%s3638_s0 + $0x6] sm:$0x3] }
 0xad3   :  { %2294 = vst [vmem:[#allocation1 + $0x2] ss:$4 sm:$0xff] %v2276_v51 }
 0xad7   :  { %v2247_v34 = vpop.permute.xlu2 %2246 }
 0xad8   :  { %v2281_v18 = vsel %vm2273_vm2, %v3535_v22, %v2247_v34  ;;  %v2640_v22 = vld [vmem:[%s3638_s0 + $0x2] sm:$0x3] }
 0xad9   :  { %2304 = vst [vmem:[#allocation1 + $0x23] ss:$4 sm:$0xff] %v2281_v18  ;;  %v2243_v29 = vpop.permute.xlu1 %2242 }
 0xada   :  { %v2279_v15 = vsel %vm2273_vm2, %v2270_v13, %v2243_v29  ;;  %v2305_v5 = vld.sshfl [vmem:[#allocation1] sm:$0xff pattern:$0x73625140] }
 0xadb   :  { %2300 = vst [vmem:[#allocation1 + $0x21] ss:$4 sm:$0xff] %v2279_v15 }
 0xae1   :  { %v2245_v49 = vpop.permute.xlu0 %2244 }
 0xae2   :  { %v2280_v53 = vsel %vm2273_vm2, %v2271_v44, %v2245_v49 }
 0xae3   :  { %2302 = vst [vmem:[#allocation1 + $0x22] ss:$4 sm:$0xff] %v2280_v53 }
 0xaea   :  { %v2306_v46 = vld.sshfl [vmem:[#allocation1 + $0x20] sm:$0xff pattern:$0x73625140] }
 0xaeb   :  { %v2309_v60 = vpack.c.bf16 %v2306_v46, %v2305_v5 }
 0xaed   :  { %2470 = vmatmul.msk.bf16.vlgmr.msra.gmra.mxu1 %vm284_vm11, %v2309_v60 }
 0xb6a   :  { %v2338_v11 = vpop.f32.mrf.mxu1 }
 0xb6b   :  { %v2345_v6 = vrot.slane %v2338_v11, 2  ;;  %v2346_v27 = vrot.slane %v2338_v11, 4  ;;  %v2347_v4 = vrot.slane %v2338_v11, 6  ;;  %v2357_v61 = vadd.f32 %v2639_v3, %v2338_v11 }
 0xb6d   :  { %v2358_v37 = vadd.f32 %v2640_v22, %v2345_v6  ;;  %v2359_v26 = vadd.f32 %v2641_v12, %v2346_v27  ;;  %v2360_v58 = vadd.f32 %v2642_v62, %v2347_v4  ;;  %v2369_v32 = vadd.f32 %v2492_v14, %v2357_v61 }
 0xb6f   :  { %v2370_v20 = vadd.f32 %v2492_v14, %v2358_v37  ;;  %v2371_v13 = vadd.f32 %v2492_v14, %v2359_v26  ;;  %v2372_v16 = vadd.f32 %v2492_v14, %v2360_v58  ;;  %2377 = vst.msk [vmem:[%s3644_s6] sm:$0x3] %vm34_vm0, %v2369_v32 }
 0xb71   :  { %2378 = vst.msk [vmem:[%s3644_s6 + $0x2] sm:$0x3] %vm34_vm0, %v2370_v20 }
 0xb72   :  { %2379 = vst.msk [vmem:[%s3644_s6 + $0x4] sm:$0x3] %vm34_vm0, %v2371_v13  ;;  %v2340_v31 = vpop.f32.mrf.mxu1 }
 0xb73   :  { %2380 = vst.msk [vmem:[%s3644_s6 + $0x6] sm:$0x3] %vm34_vm0, %v2372_v16  ;;  %v2348_v19 = vrot.slane %v2340_v31, 2  ;;  %v2349_v38 = vrot.slane %v2340_v31, 4  ;;  %v2350_v57 = vrot.slane %v2340_v31, 6  ;;  %v2361_v35 = vadd.f32 %v2643_v63, %v2340_v31 }
 0xb75   :  { %v2362_v7 = vadd.f32 %v2644_v0, %v2348_v19  ;;  %v2363_v1 = vadd.f32 %v2645_v42, %v2349_v38  ;;  %v2364_v41 = vadd.f32 %v2646_v17, %v2350_v57  ;;  %v2373_v59 = vadd.f32 %v2492_v14, %v2361_v35 }
 0xb77   :  { %v2374_v45 = vadd.f32 %v2492_v14, %v2362_v7  ;;  %v2375_v55 = vadd.f32 %v2492_v14, %v2363_v1  ;;  %v2376_v54 = vadd.f32 %v2492_v14, %v2364_v41  ;;  %2381 = vst.msk [vmem:[%s3644_s6 + $0x8] sm:$0x3] %vm34_vm0, %v2373_v59 }
 0xb79   :  { %2382 = vst.msk [vmem:[%s3644_s6 + $0xa] sm:$0x3] %vm34_vm0, %v2374_v45 }
 0xb7a   :  { %2383 = vst.msk [vmem:[%s3644_s6 + $0xc] sm:$0x3] %vm34_vm0, %v2375_v55 }
 0xb7b   :  { %2384 = vst.msk [vmem:[%s3644_s6 + $0xe] sm:$0x3] %vm34_vm0, %v2376_v54 }

</bundles_post_ra>
